<compile_context>
chip_gen: v5e
topology: v5e:2x2
jax: 0.10.0
libtpu: 0.0.40
codegen_flags: <defaults>
</compile_context>

<pallas_src>
import jax
import jax.numpy as jnp
from jax.experimental import pallas as pl
from jax.experimental.pallas import tpu as pltpu

D_IN, H1, H2, D_OUT = 28 * 28, 256, 64, 10
D_IN_PAD = 896      # 7 * 128: lane-aligned K for the first (dominant) matmul
D_OUT_PAD = 128     # lane-dense output width; real logits are [:, :10]


def _round_up(n, m):
    return ((n + m - 1) // m) * m


def mlp_kernel(x_ref, w1_ref, b1_ref, w2_ref, b2_ref, w3_ref, b3_ref, o_ref):
    # Whole MLP fused per batch tile: 3 MXU matmuls (bf16 in, fp32 accumulate) + bias + ReLU.
    x = x_ref[...]                                                          # (tb, 896) bf16
    h1 = jnp.dot(x, w1_ref[...], preferred_element_type=jnp.float32) + b1_ref[...]
    h1 = jnp.maximum(h1, 0.0).astype(jnp.bfloat16)                          # (tb, 256)
    h2 = jnp.dot(h1, w2_ref[...], preferred_element_type=jnp.float32) + b2_ref[...]
    h2 = jnp.maximum(h2, 0.0).astype(jnp.bfloat16)                          # (tb, 64)
    out = jnp.dot(h2, w3_ref[...], preferred_element_type=jnp.float32) + b3_ref[...]
    o_ref[...] = out                                                        # (tb, 128) f32


def net_forward(x, params, *, block_b=512):
    """x: (B, 784) float32. params: dict of w1,b1,w2,b2,w3,b3 (fp32, (in,out) layout).
    Returns (B, 10) float32 logits."""
    B = x.shape[0]
    # Large batch tiles keep the MXU fed and amortize the ~0.35us/step pipeline overhead;
    # clamp so a tiny test batch isn't padded up to a huge tile.
    tb = max(8, min(block_b, _round_up(B, 256)))
    B_pad = _round_up(B, tb)
    grid = (B_pad // tb,)

    # bf16 activations/weights (fp32 accumulation happens inside the kernel); biases fp32.
    xp = jnp.zeros((B_pad, D_IN_PAD), jnp.bfloat16)
    xp = xp.at[:B, :D_IN].set(x.astype(jnp.bfloat16))

    w1 = jnp.zeros((D_IN_PAD, H1), jnp.bfloat16).at[:D_IN, :].set(params["w1"].astype(jnp.bfloat16))
    w2 = params["w2"].astype(jnp.bfloat16)
    w3 = jnp.zeros((H2, D_OUT_PAD), jnp.bfloat16).at[:, :D_OUT].set(params["w3"].astype(jnp.bfloat16))
    b1 = params["b1"].astype(jnp.float32)
    b2 = params["b2"].astype(jnp.float32)
    b3 = jnp.zeros((1, D_OUT_PAD), jnp.float32).at[:, :D_OUT].set(params["b3"].astype(jnp.float32))

    # Weights/biases: same block every grid step -> resident in VMEM, never re-DMA'd.
    full = lambda shape: pl.BlockSpec(shape, lambda i: (0, 0))

    out_pad = pl.pallas_call(
        mlp_kernel,
        out_shape=jax.ShapeDtypeStruct((B_pad, D_OUT_PAD), jnp.float32),
        grid_spec=pltpu.PrefetchScalarGridSpec(
            num_scalar_prefetch=0,
            grid=grid,
            in_specs=[
                pl.BlockSpec((tb, D_IN_PAD), lambda i: (i, 0)),  # x tile streams over batch
                full((D_IN_PAD, H1)),   # w1
                full((1, H1)),          # b1
                full((H1, H2)),         # w2
                full((1, H2)),          # b2
                full((H2, D_OUT_PAD)),  # w3 (lane-padded)
                full((1, D_OUT_PAD)),   # b3 (lane-padded)
            ],
            out_specs=pl.BlockSpec((tb, D_OUT_PAD), lambda i: (i, 0)),
        ),
        compiler_params=pltpu.CompilerParams(
            # Batch axis is embarrassingly parallel -> shard across TCs on megacore parts.
            dimension_semantics=("parallel",),
        ),
    )(xp, w1, b1, w2, b2, w3, b3)

    return out_pad[:B, :D_OUT]


def init_params(key):
    """Deterministic synthetic init matching nn.Linear shapes (stored transposed: (in, out))."""
    ks = jax.random.split(key, 6)

    def linear_init(kw, kb, fan_in, fan_out):
        # PyTorch default: U(-1/sqrt(fan_in), 1/sqrt(fan_in))
        bound = 1.0 / jnp.sqrt(fan_in)
        w = jax.random.uniform(kw, (fan_in, fan_out), jnp.float32, -bound, bound)
        b = jax.random.uniform(kb, (1, fan_out), jnp.float32, -bound, bound)
        return w, b

    w1, b1 = linear_init(ks[0], ks[1], D_IN, H1)
    w2, b2 = linear_init(ks[2], ks[3], H1, H2)
    w3, b3 = linear_init(ks[4], ks[5], H2, D_OUT)
    return dict(w1=w1, b1=b1, w2=w2, b2=b2, w3=w3, b3=b3)


def net_forward_ref(x, p):
    """Pure-JAX reference mirroring the kernel's bf16-input / fp32-accumulate numerics."""
    xb = x.astype(jnp.bfloat16)
    w1 = p["w1"].astype(jnp.bfloat16)
    w2 = p["w2"].astype(jnp.bfloat16)
    w3 = p["w3"].astype(jnp.bfloat16)
    h1 = jnp.maximum(jnp.dot(xb, w1, preferred_element_type=jnp.float32) + p["b1"], 0.0)
    h1 = h1.astype(jnp.bfloat16)
    h2 = jnp.maximum(jnp.dot(h1, w2, preferred_element_type=jnp.float32) + p["b2"], 0.0)
    h2 = h2.astype(jnp.bfloat16)
    return jnp.dot(h2, w3, preferred_element_type=jnp.float32) + p["b3"]


if __name__ == "__main__":
    key = jax.random.PRNGKey(0)
    kx, kp = jax.random.split(key)

    B = 8  # small test batch; MNIST-flattened features fixed at 784
    x = jax.random.normal(kx, (B, D_IN), dtype=jnp.float32)
    params = init_params(kp)

    out = jax.block_until_ready(net_forward(x, params))
    ref = jax.block_until_ready(net_forward_ref(x, params))

    assert out.shape == (B, D_OUT)
    # bf16 inputs -> tolerance reflects bf16 rounding; accumulation is fp32 in both paths.
    assert jnp.allclose(out, ref, atol=2e-2, rtol=2e-2), float(jnp.max(jnp.abs(out - ref)))

    print("KERNEL_OK")
</pallas_src>

<mosaic_0001>
module attributes {stable_mosaic.version = 11 : i64} {
  func.func @mlp_kernel(%arg0: i32, %arg1: memref<256x896xbf16, #tpu.memory_space<vmem>>, %arg2: memref<896x256xbf16, #tpu.memory_space<vmem>>, %arg3: memref<1x256xf32, #tpu.memory_space<vmem>>, %arg4: memref<256x64xbf16, #tpu.memory_space<vmem>>, %arg5: memref<1x64xf32, #tpu.memory_space<vmem>>, %arg6: memref<64x128xbf16, #tpu.memory_space<vmem>>, %arg7: memref<1x128xf32, #tpu.memory_space<vmem>>, %arg8: memref<256x128xf32, #tpu.memory_space<vmem>>) attributes {dimension_semantics = [#tpu.dimension_semantics<parallel>], iteration_bounds = array<i64: 1>, scalar_prefetch = 0 : i64, scratch_operands = 0 : i64, tpu.core_type = #tpu.core_type<tc>, window_params = [{transform_indices = @transform_0, window_bounds = array<i64: 256, 896>}, {pipeline_mode = #tpu.pipeline_mode<synchronous>, transform_indices = @transform_1, window_bounds = array<i64: 896, 256>}, {pipeline_mode = #tpu.pipeline_mode<synchronous>, transform_indices = @transform_2, window_bounds = array<i64: 1, 256>}, {pipeline_mode = #tpu.pipeline_mode<synchronous>, transform_indices = @transform_3, window_bounds = array<i64: 256, 64>}, {pipeline_mode = #tpu.pipeline_mode<synchronous>, transform_indices = @transform_4, window_bounds = array<i64: 1, 64>}, {pipeline_mode = #tpu.pipeline_mode<synchronous>, transform_indices = @transform_5, window_bounds = array<i64: 64, 128>}, {pipeline_mode = #tpu.pipeline_mode<synchronous>, transform_indices = @transform_6, window_bounds = array<i64: 1, 128>}, {transform_indices = @transform_7, window_bounds = array<i64: 256, 128>}]} {
    %c0 = arith.constant 0 : index
    %c0_0 = arith.constant 0 : index
    %0 = vector.load %arg1[%c0, %c0_0] : memref<256x896xbf16, #tpu.memory_space<vmem>>, vector<256x896xbf16>
    %c0_1 = arith.constant 0 : index
    %c0_2 = arith.constant 0 : index
    %1 = vector.load %arg2[%c0_1, %c0_2] : memref<896x256xbf16, #tpu.memory_space<vmem>>, vector<896x256xbf16>
    %cst = arith.constant dense<0.000000e+00> : vector<256x256xf32>
    %2 = tpu.matmul %0, %1, %cst {dimension_numbers = #tpu.dot_dimension_numbers<[1], [0], [0], [1], [0, 0, 1, 1], [], []>} : vector<256x896xbf16>, vector<896x256xbf16>, vector<256x256xf32> -> vector<256x256xf32>
    %c0_3 = arith.constant 0 : index
    %c0_4 = arith.constant 0 : index
    %3 = vector.load %arg3[%c0_3, %c0_4] : memref<1x256xf32, #tpu.memory_space<vmem>>, vector<1x256xf32>
    %4 = vector.broadcast %3 : vector<1x256xf32> to vector<256x256xf32>
    %5 = arith.addf %2, %4 : vector<256x256xf32>
    %cst_5 = arith.constant 0.000000e+00 : f32
    %6 = vector.broadcast %cst_5 : f32 to vector<256x256xf32>
    %7 = arith.maximumf %5, %6 : vector<256x256xf32>
    %8 = arith.truncf %7 : vector<256x256xf32> to vector<256x256xbf16>
    %c0_6 = arith.constant 0 : index
    %c0_7 = arith.constant 0 : index
    %9 = vector.load %arg4[%c0_6, %c0_7] : memref<256x64xbf16, #tpu.memory_space<vmem>>, vector<256x64xbf16>
    %cst_8 = arith.constant dense<0.000000e+00> : vector<256x64xf32>
    %10 = tpu.matmul %8, %9, %cst_8 {dimension_numbers = #tpu.dot_dimension_numbers<[1], [0], [0], [1], [0, 0, 1, 1], [], []>} : vector<256x256xbf16>, vector<256x64xbf16>, vector<256x64xf32> -> vector<256x64xf32>
    %c0_9 = arith.constant 0 : index
    %c0_10 = arith.constant 0 : index
    %11 = vector.load %arg5[%c0_9, %c0_10] : memref<1x64xf32, #tpu.memory_space<vmem>>, vector<1x64xf32>
    %12 = vector.broadcast %11 : vector<1x64xf32> to vector<256x64xf32>
    %13 = arith.addf %10, %12 : vector<256x64xf32>
    %cst_11 = arith.constant 0.000000e+00 : f32
    %14 = vector.broadcast %cst_11 : f32 to vector<256x64xf32>
    %15 = arith.maximumf %13, %14 : vector<256x64xf32>
    %16 = arith.truncf %15 : vector<256x64xf32> to vector<256x64xbf16>
    %c0_12 = arith.constant 0 : index
    %c0_13 = arith.constant 0 : index
    %17 = vector.load %arg6[%c0_12, %c0_13] : memref<64x128xbf16, #tpu.memory_space<vmem>>, vector<64x128xbf16>
    %cst_14 = arith.constant dense<0.000000e+00> : vector<256x128xf32>
    %18 = tpu.matmul %16, %17, %cst_14 {dimension_numbers = #tpu.dot_dimension_numbers<[1], [0], [0], [1], [0, 0, 1, 1], [], []>} : vector<256x64xbf16>, vector<64x128xbf16>, vector<256x128xf32> -> vector<256x128xf32>
    %c0_15 = arith.constant 0 : index
    %c0_16 = arith.constant 0 : index
    %19 = vector.load %arg7[%c0_15, %c0_16] : memref<1x128xf32, #tpu.memory_space<vmem>>, vector<1x128xf32>
    %20 = vector.broadcast %19 : vector<1x128xf32> to vector<256x128xf32>
    %21 = arith.addf %18, %20 : vector<256x128xf32>
    %c0_17 = arith.constant 0 : index
    %c0_18 = arith.constant 0 : index
    %22 = vector.load %arg8[%c0_17, %c0_18] : memref<256x128xf32, #tpu.memory_space<vmem>>, vector<256x128xf32>
    tpu.vector_store %arg8[%c0_17, %c0_18], %21 {strides = array<i32>} : memref<256x128xf32, #tpu.memory_space<vmem>>, vector<256x128xf32>,
    return
  }
  func.func @transform_0(%arg0: i32) -> (i32, i32) {
    %c0_i32 = arith.constant 0 : i32
    %c0_i32_0 = arith.constant 0 : i32
    return %arg0, %c0_i32 : i32, i32
  }
  func.func @transform_1(%arg0: i32) -> (i32, i32) {
    %c0_i32 = arith.constant 0 : i32
    %c0_i32_0 = arith.constant 0 : i32
    %c0_i32_1 = arith.constant 0 : i32
    return %c0_i32, %c0_i32_0 : i32, i32
  }
  func.func @transform_2(%arg0: i32) -> (i32, i32) {
    %c0_i32 = arith.constant 0 : i32
    %c0_i32_0 = arith.constant 0 : i32
    %c0_i32_1 = arith.constant 0 : i32
    return %c0_i32, %c0_i32_0 : i32, i32
  }
  func.func @transform_3(%arg0: i32) -> (i32, i32) {
    %c0_i32 = arith.constant 0 : i32
    %c0_i32_0 = arith.constant 0 : i32
    %c0_i32_1 = arith.constant 0 : i32
    return %c0_i32, %c0_i32_0 : i32, i32
  }
  func.func @transform_4(%arg0: i32) -> (i32, i32) {
    %c0_i32 = arith.constant 0 : i32
    %c0_i32_0 = arith.constant 0 : i32
    %c0_i32_1 = arith.constant 0 : i32
    return %c0_i32, %c0_i32_0 : i32, i32
  }
  func.func @transform_5(%arg0: i32) -> (i32, i32) {
    %c0_i32 = arith.constant 0 : i32
    %c0_i32_0 = arith.constant 0 : i32
    %c0_i32_1 = arith.constant 0 : i32
    return %c0_i32, %c0_i32_0 : i32, i32
  }
  func.func @transform_6(%arg0: i32) -> (i32, i32) {
    %c0_i32 = arith.constant 0 : i32
    %c0_i32_0 = arith.constant 0 : i32
    %c0_i32_1 = arith.constant 0 : i32
    return %c0_i32, %c0_i32_0 : i32, i32
  }
  func.func @transform_7(%arg0: i32) -> (i32, i32) {
    %c0_i32 = arith.constant 0 : i32
    %c0_i32_0 = arith.constant 0 : i32
    return %arg0, %c0_i32 : i32, i32
  }
}

</mosaic_0001>

<bundles_post_ra>
// kernel: tpu_custom_call.1
= control target key start
LH: loop header
LB: loop body
LE: loop exit
PB: predicated region body
PF: predicated region fallthrough
CT: control target
= control target key end

     0   :  { %12 = vsyncpa [#allocation3], 0  ;;  %s5954_s0 = inlined_call_operand.hbm [shape: bf16[256,896], index: 0, kind: input, shape index: {}]   ;;  %s5955_s1 = inlined_call_operand.hbm [shape: bf16[896,256], index: 1, kind: input, shape index: {}]   ;;  %s5956_s2 = inlined_call_operand.vmem [shape: f32[1,256], index: 2, kind: input, shape index: {}]   ;;  %s5957_s3 = inlined_call_operand.vmem [shape: bf16[256,64], index: 3, kind: input, shape index: {}]   ;;  %s5958_s4 = inlined_call_operand.vmem [shape: f32[1,64], index: 4, kind: input, shape index: {}]   ;;  %s5959_s5 = inlined_call_operand.vmem [shape: bf16[64,128], index: 5, kind: input, shape index: {}]   ;;  %s5960_s6 = inlined_call_operand.vmem [shape: f32[1,128], index: 6, kind: input, shape index: {}]   ;;  %s5961_s7 = inlined_call_operand.hbm [shape: f32[256,128], index: 7, kind: output, shape index: {}]  }
   0x1   :  { %13 = vsyncpa [#allocation6], 0 }
   0x2   :  { %14 = vsyncpa [#allocation4], 0  ;;  %s19_s26 = sshll.u32 %s5954_s0, 4  ;;  %s4716_s27 = smov [#allocation2]   ;;  %s20_s26 = int_to_ptr.hbm [resolvable:$true] %s19_s26 }
   0x3   :  { %s21_s28 = sshll.u32 %s4716_s27, 4  ;;  %s32_s8 = sshll.u32 %s5955_s1, 4  ;;  %s22_s28 = int_to_ptr.vmem [resolvable:$true] %s21_s28  ;;  %s33_s8 = int_to_ptr.hbm [resolvable:$true] %s32_s8 }
   0x4   :  { %s4717_s9 = smov 448   ;;  %s4718_s10 = smov 28  }
   0x5   :  { %27 = dma.hbm_to_vmem [thread:$0]  %s20_s26, 14336, %s22_s28, [#allocation3], %s4717_s9, %s4717_s9, %s4718_s10  }
   0x6   :  { %s4719_s11 = smov [#allocation5]   ;;  %s4720_s13 = smov 128  }
   0x7   :  { %s34_s12 = sshll.u32 %s4719_s11, 4  ;;  %s4721_s14 = smov 8   ;;  %s35_s12 = int_to_ptr.vmem [resolvable:$true] %s34_s12 }
   0x8   :  { %40 = dma.hbm_to_vmem [thread:$0]  %s33_s8, 14336, %s35_s12, [#allocation6], %s4720_s13, %s4720_s13, %s4721_s14  }
   0x9   :  { %4710 = dma.done.wait [#allocation3], 14336  }
   0xa   :  { %4711 = vsyncadd [#allocation3], 4294952960 }
   0xb   :  { %4712 = dma.done.wait [#allocation6], 14336  }
   0xc   :  { %4713 = vsyncadd [#allocation6], 4294952960  ;;  %v3874_v0 = vld [vmem:[#allocation5 + $0x70] sm:$0xf]  ;;  %v4487_v1 = vld [vmem:[#allocation5 + $0x74] sm:$0xf0] }
   0xd   :  { %v3866_v2 = vld [vmem:[#allocation5 + $0x60] sm:$0xf]  ;;  %v3875_v3 = vor.u32 %v4487_v1, %v3874_v0  ;;  %v4485_v4 = vld [vmem:[#allocation5 + $0x64] sm:$0xf0]  ;;  %v3858_v6 = vld [vmem:[#allocation5 + $0x50] sm:$0xf] }
   0xe   :  { %v3867_v5 = vor.u32 %v4485_v4, %v3866_v2  ;;  %v4483_v7 = vld [vmem:[#allocation5 + $0x54] sm:$0xf0]  ;;  %v3850_v9 = vld [vmem:[#allocation5 + $0x40] sm:$0xf]  ;;  %v4481_v10 = vld [vmem:[#allocation5 + $0x44] sm:$0xf0] }
   0xf   :  { %4604 = vmatpush.bf16.msra.mxu1 %v3875_v3  ;;  %4605 = vmatpush.bf16.msra.mxu2 %v3875_v3  ;;  %v3859_v8 = vor.u32 %v4483_v7, %v3858_v6  ;;  %v3851_v11 = vor.u32 %v4481_v10, %v3850_v9  ;;  %v3842_v12 = vld [vmem:[#allocation5 + $0x30] sm:$0xf]  ;;  %v4479_v13 = vld [vmem:[#allocation5 + $0x34] sm:$0xf0]  ;;  %v3834_v15 = vld [vmem:[#allocation5 + $0x20] sm:$0xf] }
  0x10   :  { %4606 = vmatpush.bf16.msra.mxu3 %v3875_v3  ;;  %1442 = vmatpush.bf16.msra.mxu0 %v3875_v3  ;;  %v3843_v14 = vor.u32 %v4479_v13, %v3842_v12  ;;  %v4477_v16 = vld [vmem:[#allocation5 + $0x24] sm:$0xf0]  ;;  %v3826_v18 = vld [vmem:[#allocation5 + $0x10] sm:$0xf]  ;;  %v4475_v19 = vld [vmem:[#allocation5 + $0x14] sm:$0xf0] }
  0x11   :  { %v3835_v17 = vor.u32 %v4477_v16, %v3834_v15  ;;  %v3827_v20 = vor.u32 %v4475_v19, %v3826_v18  ;;  %v3818_v21 = vld [vmem:[#allocation5] sm:$0xf]  ;;  %v4473_v22 = vld [vmem:[#allocation5 + $0x4] sm:$0xf0]  ;;  %v3938_v23 = vld [vmem:[#allocation5 + $0xf0] sm:$0xf] }
  0x12   :  { %v4503_v24 = vld [vmem:[#allocation5 + $0xf4] sm:$0xf0]  ;;  %v3482_v25 = vld [vmem:[#allocation2 + $0xe0] sm:$0xf]  ;;  %v3819_v26 = vor.u32 %v4473_v22, %v3818_v21  ;;  %v4391_v27 = vld [vmem:[#allocation2 + $0xf8] sm:$0xf0] }
  0x13   :  { %4607 = vmatpush.bf16.msra.mxu1 %v3867_v5  ;;  %4608 = vmatpush.bf16.msra.mxu2 %v3867_v5  ;;  %v3594_v28 = vld [vmem:[#allocation2 + $0x1c0] sm:$0xf]  ;;  %v4419_v29 = vld [vmem:[#allocation2 + $0x1d8] sm:$0xf0]  ;;  %v3939_v30 = vor.u32 %v4503_v24, %v3938_v23  ;;  %v4501_v34 = vld [vmem:[#allocation5 + $0xe4] sm:$0xf0]  ;;  %v4772_v37 = vor.u32 %v4391_v27, %v3482_v25 }
  0x14   :  { %4609 = vmatpush.bf16.msra.mxu3 %v3867_v5  ;;  %1443 = vmatpush.bf16.msra.mxu0 %v3867_v5  ;;  %v3706_v31 = vld [vmem:[#allocation2 + $0x2a0] sm:$0xf]  ;;  %v4447_v32 = vld [vmem:[#allocation2 + $0x2b8] sm:$0xf0]  ;;  %v4774_v38 = vor.u32 %v4419_v29, %v3594_v28  ;;  %v4002_v42 = vld [vmem:[#allocation5 + $0x170] sm:$0xf] }
  0x15   :  { %v3930_v33 = vld [vmem:[#allocation5 + $0xe0] sm:$0xf]  ;;  %v4363_v36 = vld [vmem:[#allocation2 + $0x18] sm:$0xf0]  ;;  %v4776_v39 = vor.u32 %v4447_v32, %v3706_v31  ;;  %v4519_v43 = vld [vmem:[#allocation5 + $0x174] sm:$0xf0] }
  0x16   :  { %v3370_v35 = vld [vmem:[#allocation2] sm:$0xf]  ;;  %6044 = vst [vmem:[#allocation11_spill] sm:$0xff] %v4774_v38  ;;  %v3931_v40 = vor.u32 %v4501_v34, %v3930_v33  ;;  %v3922_v44 = vld [vmem:[#allocation5 + $0xd0] sm:$0xf]  ;;  %v4003_v46 = vor.u32 %v4519_v43, %v4002_v42  ;;  %vm3178_vm0 = vcmask 523264  }
  0x17   :  { %4610 = vmatpush.bf16.msra.mxu1 %v3859_v8  ;;  %4611 = vmatpush.bf16.msra.mxu2 %v3859_v8  ;;  %6045 = vst [vmem:[#allocation12_spill] sm:$0xff] %v4776_v39  ;;  %v4778_v41 = vor.u32 %v4363_v36, %v3370_v35  ;;  %v4499_v45 = vld [vmem:[#allocation5 + $0xd4] sm:$0xf0]  ;;  %v4066_v47 = vld [vmem:[#allocation5 + $0x1f0] sm:$0xf]  ;;  %s3354_s0 = sshll.u32 %s5961_s7, 4  ;;  %s3355_s0 = int_to_ptr.hbm [resolvable:$true] %s3354_s0 }
  0x18   :  { %4612 = vmatpush.bf16.msra.mxu3 %v3859_v8  ;;  %1444 = vmatpush.bf16.msra.mxu0 %v3859_v8  ;;  %v4535_v48 = vld [vmem:[#allocation5 + $0x1f4] sm:$0xf0]  ;;  %v3994_v49 = vld [vmem:[#allocation5 + $0x160] sm:$0xf]  ;;  %v4517_v50 = vld [vmem:[#allocation5 + $0x164] sm:$0xf0]  ;;  %v3923_v51 = vor.u32 %v4499_v45, %v3922_v44 }
  0x19   :  { %v3914_v52 = vld [vmem:[#allocation5 + $0xc0] sm:$0xf]  ;;  %v4067_v53 = vor.u32 %v4535_v48, %v4066_v47  ;;  %v3995_v54 = vor.u32 %v4517_v50, %v3994_v49  ;;  %v4533_v56 = vld [vmem:[#allocation5 + $0x1e4] sm:$0xf0]  ;;  %v3986_v58 = vld [vmem:[#allocation5 + $0x150] sm:$0xf] }
  0x1a   :  { %v4058_v55 = vld [vmem:[#allocation5 + $0x1e0] sm:$0xf]  ;;  %v4497_v57 = vld [vmem:[#allocation5 + $0xc4] sm:$0xf0]  ;;  %v4515_v59 = vld [vmem:[#allocation5 + $0x154] sm:$0xf0] }
  0x1b   :  { %4613 = vmatpush.bf16.msra.mxu1 %v3851_v11  ;;  %4614 = vmatpush.bf16.msra.mxu2 %v3851_v11  ;;  %v4059_v60 = vor.u32 %v4533_v56, %v4058_v55  ;;  %v4050_v61 = vld [vmem:[#allocation5 + $0x1d0] sm:$0xf]  ;;  %v3987_v62 = vor.u32 %v4515_v59, %v3986_v58  ;;  %v4531_v63 = vld [vmem:[#allocation5 + $0x1d4] sm:$0xf0]  ;;  %v3915_v2 = vor.u32 %v4497_v57, %v3914_v52  ;;  %v3978_v5 = vld [vmem:[#allocation5 + $0x140] sm:$0xf] }
  0x1c   :  { %4615 = vmatpush.bf16.msra.mxu3 %v3851_v11  ;;  %1445 = vmatpush.bf16.msra.mxu0 %v3851_v11  ;;  %v4130_v0 = vld [vmem:[#allocation5 + $0x270] sm:$0xf]  ;;  %v4551_v1 = vld [vmem:[#allocation5 + $0x274] sm:$0xf0]  ;;  %v4513_v6 = vld [vmem:[#allocation5 + $0x144] sm:$0xf0]  ;;  %v4051_v11 = vor.u32 %v4531_v63, %v4050_v61 }
  0x1d   :  { %v3906_v3 = vld [vmem:[#allocation5 + $0xb0] sm:$0xf]  ;;  %v4131_v4 = vor.u32 %v4551_v1, %v4130_v0  ;;  %v4495_v7 = vld [vmem:[#allocation5 + $0xb4] sm:$0xf0]  ;;  %v4122_v8 = vld [vmem:[#allocation5 + $0x260] sm:$0xf]  ;;  %v3979_v16 = vor.u32 %v4513_v6, %v3978_v5 }
  0x1e   :  { %v4549_v9 = vld [vmem:[#allocation5 + $0x264] sm:$0xf0]  ;;  %v3510_v10 = vld [vmem:[#allocation2 + $0x118] sm:$0xf]  ;;  %v4398_v13 = vld [vmem:[#allocation2 + $0x130] sm:$0xf0] }
  0x1f   :  { %4616 = vmatpush.bf16.msra.mxu1 %v3843_v14  ;;  %4617 = vmatpush.bf16.msra.mxu2 %v3843_v14  ;;  %v4123_v12 = vor.u32 %v4549_v9, %v4122_v8  ;;  %v4426_v15 = vld [vmem:[#allocation2 + $0x210] sm:$0xf0]  ;;  %v3398_v19 = vld [vmem:[#allocation2 + $0x38] sm:$0xf]  ;;  %v3898_v22 = vld [vmem:[#allocation5 + $0xa0] sm:$0xf]  ;;  %v4784_v24 = vor.u32 %v4398_v13, %v3510_v10 }
  0x20   :  { %4618 = vmatpush.bf16.msra.mxu3 %v3843_v14  ;;  %1446 = vmatpush.bf16.msra.mxu0 %v3843_v14  ;;  %v3622_v14 = vld [vmem:[#allocation2 + $0x1f8] sm:$0xf]  ;;  %v4454_v18 = vld [vmem:[#allocation2 + $0x2f0] sm:$0xf0]  ;;  %v4493_v23 = vld [vmem:[#allocation5 + $0xa4] sm:$0xf0] }
  0x21   :  { %v4370_v21 = vld [vmem:[#allocation2 + $0x50] sm:$0xf0]  ;;  %v4786_v25 = vor.u32 %v4426_v15, %v3622_v14  ;;  %v4529_v27 = vld [vmem:[#allocation5 + $0x1c4] sm:$0xf0]  ;;  %v3970_v31 = vld [vmem:[#allocation5 + $0x130] sm:$0xf] }
  0x22   :  { %v4790_v29 = vor.u32 %v4370_v21, %v3398_v19  ;;  %v4511_v32 = vld [vmem:[#allocation5 + $0x134] sm:$0xf0]  ;;  %v3890_v35 = vld [vmem:[#allocation5 + $0x90] sm:$0xf]  ;;  %v3962_v47 = vld [vmem:[#allocation5 + $0x120] sm:$0xf] }
  0x23   :  { %4619 = vmatpush.bf16.msra.mxu1 %v3835_v17  ;;  %4620 = vmatpush.bf16.msra.mxu2 %v3835_v17  ;;  %6046 = vst [vmem:[#allocation13_spill] sm:$0xff] %v4786_v25  ;;  %v3971_v34 = vor.u32 %v4511_v32, %v3970_v31  ;;  %v4491_v36 = vld [vmem:[#allocation5 + $0x94] sm:$0xf0]  ;;  %v4114_v43 = vld [vmem:[#allocation5 + $0x250] sm:$0xf] }
  0x24   :  { %4621 = vmatpush.bf16.msra.mxu3 %v3835_v17  ;;  %1447 = vmatpush.bf16.msra.mxu0 %v3835_v17  ;;  %v3734_v17 = vld [vmem:[#allocation2 + $0x2d8] sm:$0xf]  ;;  %v3891_v45 = vor.u32 %v4491_v36, %v3890_v35  ;;  %v4509_v48 = vld [vmem:[#allocation5 + $0x124] sm:$0xf0]  ;;  %v4026_v49 = vld [vmem:[#allocation5 + $0x1a0] sm:$0xf] }
  0x25   :  { %v4788_v28 = vor.u32 %v4454_v18, %v3734_v17  ;;  %v4527_v42 = vld [vmem:[#allocation5 + $0x1b4] sm:$0xf0]  ;;  %v4525_v52 = vld [vmem:[#allocation5 + $0x1a4] sm:$0xf0]  ;;  %v3882_v56 = vld [vmem:[#allocation5 + $0x80] sm:$0xf] }
  0x26   :  { %v4547_v44 = vld [vmem:[#allocation5 + $0x254] sm:$0xf0]  ;;  %v4489_v57 = vld [vmem:[#allocation5 + $0x84] sm:$0xf0]  ;;  %v3954_v58 = vld [vmem:[#allocation5 + $0x110] sm:$0xf]  ;;  %v4027_v0 = vor.u32 %v4525_v52, %v4026_v49 }
  0x27   :  { %4622 = vmatpush.bf16.msra.mxu1 %v3827_v20  ;;  %4623 = vmatpush.bf16.msra.mxu2 %v3827_v20  ;;  %6047 = vst [vmem:[#allocation14_spill] sm:$0xff] %v4788_v28  ;;  %v4507_v59 = vld [vmem:[#allocation5 + $0x114] sm:$0xf0]  ;;  %v3538_v63 = vld [vmem:[#allocation2 + $0x150] sm:$0xf] }
  0x28   :  { %4624 = vmatpush.bf16.msra.mxu3 %v3827_v20  ;;  %1448 = vmatpush.bf16.msra.mxu0 %v3827_v20  ;;  %v3907_v20 = vor.u32 %v4495_v7, %v3906_v3  ;;  %v3955_v61 = vor.u32 %v4507_v59, %v3954_v58  ;;  %v4543_v1 = vld [vmem:[#allocation5 + $0x234] sm:$0xf0]  ;;  %v4505_v3 = vld [vmem:[#allocation5 + $0x104] sm:$0xf0]  ;;  %v4018_v5 = vld [vmem:[#allocation5 + $0x190] sm:$0xf] }
  0x29   :  { %v4523_v6 = vld [vmem:[#allocation5 + $0x194] sm:$0xf0]  ;;  %v3650_v8 = vld [vmem:[#allocation2 + $0x230] sm:$0xf]  ;;  %v4433_v9 = vld [vmem:[#allocation2 + $0x248] sm:$0xf0] }
  0x2a   :  { %v3762_v10 = vld [vmem:[#allocation2 + $0x310] sm:$0xf]  ;;  %v4090_v13 = vld [vmem:[#allocation5 + $0x220] sm:$0xf]  ;;  %v4541_v14 = vld [vmem:[#allocation5 + $0x224] sm:$0xf0]  ;;  %v4019_v17 = vor.u32 %v4523_v6, %v4018_v5  ;;  %v4798_v19 = vor.u32 %v4433_v9, %v3650_v8 }
  0x2b   :  { %4625 = vmatpush.bf16.msra.mxu1 %v3819_v26  ;;  %4626 = vmatpush.bf16.msra.mxu2 %v3819_v26  ;;  %v3426_v15 = vld [vmem:[#allocation2 + $0x70] sm:$0xf]  ;;  %v4521_v21 = vld [vmem:[#allocation5 + $0x184] sm:$0xf0]  ;;  %v4567_v31 = vld [vmem:[#allocation5 + $0x2f4] sm:$0xf0] }
  0x2c   :  { %4627 = vmatpush.bf16.msra.mxu3 %v3819_v26  ;;  %1449 = vmatpush.bf16.msra.mxu0 %v3819_v26  ;;  %v4042_v26 = vld [vmem:[#allocation5 + $0x1c0] sm:$0xf]  ;;  %6049 = vst [vmem:[#allocation16_spill] sm:$0xff] %v4798_v19  ;;  %v4082_v32 = vld [vmem:[#allocation5 + $0x210] sm:$0xf] }
  0x2d   :  { %v4043_v33 = vor.u32 %v4529_v27, %v4042_v26  ;;  %v4074_v36 = vld [vmem:[#allocation5 + $0x200] sm:$0xf]  ;;  %v3454_v49 = vld [vmem:[#allocation2 + $0xa8] sm:$0xf]  ;;  %v4364_v58 = vld [vmem:[#allocation2 + $0x20] sm:$0xf0] }
  0x2e   :  { %1470 = vmatmul.bf16.vlgmr.msra.gmra.mxu1 %v4772_v37  ;;  %1490 = vmatmul.bf16.vlgmr.msra.gmra.mxu2 %v4774_v38  ;;  %v4361_v59 = vld [vmem:[#allocation2 + $0xc] sm:$0xf]  ;;  %v4367_v6 = vld [vmem:[#allocation2 + $0x3c] sm:$0xf]  ;;  %v3406_v8 = vld [vmem:[#allocation2 + $0x40] sm:$0xf] }
  0x2f   :  { %1531 = vmatpush.bf16.msrb.mxu1 %v3939_v30  ;;  %1510 = vmatmul.bf16.vlgmr.msra.gmra.mxu3 %v4776_v39  ;;  %v3899_v30 = vor.u32 %v4493_v23, %v3898_v22  ;;  %v4091_v23 = vor.u32 %v4541_v14, %v4090_v13  ;;  %v4371_v9 = vld [vmem:[#allocation2 + $0x58] sm:$0xf0]  ;;  %v4372_v13 = vld [vmem:[#allocation2 + $0x60] sm:$0xf0] }
  0x30   :  { %1620 = vmatpush.bf16.msrb.mxu2 %v4003_v46  ;;  %1450 = vmatmul.bf16.vlgmr.msra.gmra.mxu0 %v4778_v41  ;;  %v4115_v46 = vor.u32 %v4547_v44, %v4114_v43  ;;  %v3566_v43 = vld [vmem:[#allocation2 + $0x188] sm:$0xf]  ;;  %v4412_v44 = vld [vmem:[#allocation2 + $0x1a0] sm:$0xf0] }
  0x31   :  { %1709 = vmatpush.bf16.msrb.mxu3 %v4067_v53  ;;  %1798 = vmatpush.bf16.msrb.mxu0 %v4131_v4  ;;  %v4106_v53 = vld [vmem:[#allocation5 + $0x240] sm:$0xf]  ;;  %v4405_v4 = vld [vmem:[#allocation2 + $0x168] sm:$0xf0] }
  0x32   :  { %v4796_v18 = vor.u32 %v4405_v4, %v3538_v63  ;;  %v4565_v4 = vld [vmem:[#allocation5 + $0x2e4] sm:$0xf0] }
  0x33   :  { %1532 = vmatpush.bf16.msrb.mxu1 %v3931_v40  ;;  %v4034_v40 = vld [vmem:[#allocation5 + $0x1b0] sm:$0xf] }
  0x34   :  { %1621 = vmatpush.bf16.msrb.mxu2 %v3995_v54  ;;  %v4035_v50 = vor.u32 %v4527_v42, %v4034_v40  ;;  %v4545_v54 = vld [vmem:[#allocation5 + $0x244] sm:$0xf0]  ;;  %6048 = vst [vmem:[#allocation15_spill] sm:$0xff] %v4796_v18 }
  0x35   :  { %1710 = vmatpush.bf16.msrb.mxu3 %v4059_v60  ;;  %1799 = vmatpush.bf16.msrb.mxu0 %v4123_v12  ;;  %v4107_v55 = vor.u32 %v4545_v54, %v4106_v53  ;;  %v3883_v60 = vor.u32 %v4489_v57, %v3882_v56  ;;  %v4461_v12 = vld [vmem:[#allocation2 + $0x328] sm:$0xf0]  ;;  %v4537_v40 = vld [vmem:[#allocation5 + $0x204] sm:$0xf0]  ;;  %v3372_v56 = vld [vmem:[#allocation2 + $0x1c] sm:$0xf0] }
  0x36   :  { %v4800_v22 = vor.u32 %v4461_v12, %v3762_v10  ;;  %v4075_v42 = vor.u32 %v4537_v40, %v4074_v36  ;;  %v3378_v57 = vld [vmem:[#allocation2 + $0x8] sm:$0xf]  ;;  %v4368_v10 = vld [vmem:[#allocation2 + $0x44] sm:$0xf] }
  0x37   :  { %1533 = vmatpush.bf16.msrb.mxu1 %v3923_v51  ;;  %v3963_v51 = vor.u32 %v4509_v48, %v3962_v47  ;;  %v3790_v47 = vld [vmem:[#allocation2 + $0x348] sm:$0xf]  ;;  %v4468_v48 = vld [vmem:[#allocation2 + $0x360] sm:$0xf0] }
  0x38   :  { %1622 = vmatpush.bf16.msrb.mxu2 %v3987_v62  ;;  %v4098_v62 = vld [vmem:[#allocation5 + $0x230] sm:$0xf]  ;;  %6050 = vst [vmem:[#allocation17_spill] sm:$0xff] %v4800_v22  ;;  %v4812_v53 = vor.u32 %v4468_v48, %v3790_v47  ;;  %v3414_v12 = vld [vmem:[#allocation2 + $0x48] sm:$0xf] }
  0x39   :  { %1711 = vmatpush.bf16.msrb.mxu3 %v4051_v11  ;;  %1800 = vmatpush.bf16.msrb.mxu0 %v4115_v46  ;;  %v4099_v7 = vor.u32 %v4543_v1, %v4098_v62  ;;  %v4440_v46 = vld [vmem:[#allocation2 + $0x280] sm:$0xf0]  ;;  %v4365_v62 = vld [vmem:[#allocation2 + $0x28] sm:$0xf0]  ;;  %v3462_v47 = vld [vmem:[#allocation2 + $0xb0] sm:$0xf] }
  0x3a   :  { %6053 = vst [vmem:[#allocation20_spill] sm:$0xff] %v4812_v53  ;;  %v4385_v48 = vld [vmem:[#allocation2 + $0xc8] sm:$0xf0] }
  0x3b   :  { %1534 = vmatpush.bf16.msrb.mxu1 %v3915_v2  ;;  %v3946_v2 = vld [vmem:[#allocation5 + $0x100] sm:$0xf] }
  0x3c   :  { %1623 = vmatpush.bf16.msrb.mxu2 %v3979_v16  ;;  %v3947_v11 = vor.u32 %v4505_v3, %v3946_v2  ;;  %v4377_v16 = vld [vmem:[#allocation2 + $0x88] sm:$0xf0]  ;;  %v4186_v3 = vld [vmem:[#allocation5 + $0x2e0] sm:$0xf] }
  0x3d   :  { %1712 = vmatpush.bf16.msrb.mxu3 %v4043_v33  ;;  %1801 = vmatpush.bf16.msrb.mxu0 %v4107_v55  ;;  %v4802_v26 = vor.u32 %v4377_v16, %v3426_v15  ;;  %v4360_v55 = vld [vmem:[#allocation2 + $0x4] sm:$0xf]  ;;  %v4187_v5 = vor.u32 %v4565_v4, %v4186_v3  ;;  %v4834_v15 = vor.u32 %v4371_v9, %v3406_v8  ;;  %v3484_v3 = vld [vmem:[#allocation2 + $0xfc] sm:$0xf0]  ;;  %v3490_v4 = vld [vmem:[#allocation2 + $0xe8] sm:$0xf] }
  0x3e   :  { %1475 = vmatmul.bf16.gmra.mxu1 %v4784_v24  ;;  %1495 = vmatmul.bf16.gmra.mxu2 %v4786_v25  ;;  %v4820_v63 = vor.u32 %v4360_v55, %v3372_v56  ;;  %v3470_v55 = vld [vmem:[#allocation2 + $0xb8] sm:$0xf]  ;;  %v4386_v56 = vld [vmem:[#allocation2 + $0xd0] sm:$0xf0]  ;;  %v3492_v8 = vld [vmem:[#allocation2 + $0x104] sm:$0xf0] }
  0x3f   :  { %1535 = vmatpush.bf16.msrb.mxu1 %v3907_v20  ;;  %1515 = vmatmul.bf16.gmra.mxu3 %v4788_v28  ;;  %v4010_v20 = vld [vmem:[#allocation5 + $0x180] sm:$0xf]  ;;  %6057 = vst [vmem:[#allocation24_spill] sm:$0xff] %v4834_v15  ;;  %v3498_v9 = vld [vmem:[#allocation2 + $0xf0] sm:$0xf] }
  0x40   :  { %1624 = vmatpush.bf16.msrb.mxu2 %v3971_v34  ;;  %1455 = vmatmul.bf16.gmra.mxu0 %v4790_v29  ;;  %v4011_v27 = vor.u32 %v4521_v21, %v4010_v20  ;;  %v4539_v34 = vld [vmem:[#allocation5 + $0x214] sm:$0xf0]  ;;  %v4374_v20 = vld [vmem:[#allocation2 + $0x74] sm:$0xf]  ;;  %v3428_v21 = vld [vmem:[#allocation2 + $0x8c] sm:$0xf0] }
  0x41   :  { %1713 = vmatpush.bf16.msrb.mxu3 %v4035_v50  ;;  %1802 = vmatpush.bf16.msrb.mxu0 %v4099_v7  ;;  %v4083_v35 = vor.u32 %v4539_v34, %v4082_v32  ;;  %v4384_v50 = vld [vmem:[#allocation2 + $0xc0] sm:$0xf0]  ;;  %v3400_v7 = vld [vmem:[#allocation2 + $0x54] sm:$0xf0]  ;;  %v3442_v32 = vld [vmem:[#allocation2 + $0x80] sm:$0xf]  ;;  %v4844_v34 = vor.u32 %v4374_v20, %v3428_v21 }
  0x42   :  { %v4814_v54 = vor.u32 %v4384_v50, %v3454_v49  ;;  %v4832_v14 = vor.u32 %v4367_v6, %v3400_v7  ;;  %v4382_v49 = vld [vmem:[#allocation2 + $0xb4] sm:$0xf]  ;;  %v3464_v50 = vld [vmem:[#allocation2 + $0xcc] sm:$0xf0]  ;;  %v4389_v7 = vld [vmem:[#allocation2 + $0xec] sm:$0xf] }
  0x43   :  { %1536 = vmatpush.bf16.msrb.mxu1 %v3899_v30  ;;  %v4194_v30 = vld [vmem:[#allocation5 + $0x2f0] sm:$0xf]  ;;  %v4877_v20 = vor.u32 %v4389_v7, %v3492_v8 }
  0x44   :  { %1625 = vmatpush.bf16.msrb.mxu2 %v3963_v51  ;;  %v4195_v33 = vor.u32 %v4567_v31, %v4194_v30  ;;  %v4808_v51 = vor.u32 %v4412_v44, %v3566_v43  ;;  %v4375_v30 = vld [vmem:[#allocation2 + $0x7c] sm:$0xf]  ;;  %v3436_v31 = vld [vmem:[#allocation2 + $0x94] sm:$0xf0] }
  0x45   :  { %1714 = vmatpush.bf16.msrb.mxu3 %v4027_v0  ;;  %1803 = vmatpush.bf16.msrb.mxu0 %v4091_v23  ;;  %v4822_v0 = vor.u32 %v4364_v58, %v3378_v57  ;;  %v3434_v23 = vld [vmem:[#allocation2 + $0x78] sm:$0xf]  ;;  %v4848_v36 = vor.u32 %v4375_v30, %v3436_v31  ;;  %v4858_v58 = vor.u32 %v4385_v48, %v3462_v47  ;;  %v4170_v30 = vld [vmem:[#allocation5 + $0x2c0] sm:$0xf]  ;;  %v4561_v31 = vld [vmem:[#allocation5 + $0x2c4] sm:$0xf0] }
  0x46   :  { %6051 = vst [vmem:[#allocation18_spill] sm:$0xff] %v4808_v51  ;;  %v4563_v43 = vld [vmem:[#allocation5 + $0x2d4] sm:$0xf0]  ;;  %v4395_v48 = vld [vmem:[#allocation2 + $0x11c] sm:$0xf] }
  0x47   :  { %1537 = vmatpush.bf16.msrb.mxu1 %v3891_v45  ;;  %v3678_v45 = vld [vmem:[#allocation2 + $0x268] sm:$0xf]  ;;  %6054 = vst [vmem:[#allocation21_spill] sm:$0xff] %v4822_v0 }
  0x48   :  { %1626 = vmatpush.bf16.msrb.mxu2 %v3955_v61  ;;  %v4810_v52 = vor.u32 %v4440_v46, %v3678_v45  ;;  %v3386_v61 = vld [vmem:[#allocation2 + $0x10] sm:$0xf]  ;;  %6061 = vst [vmem:[#allocation28_spill] sm:$0xff] %v4848_v36  ;;  %v4381_v45 = vld [vmem:[#allocation2 + $0xac] sm:$0xf] }
  0x49   :  { %1715 = vmatpush.bf16.msrb.mxu3 %v4019_v17  ;;  %1804 = vmatpush.bf16.msrb.mxu0 %v4083_v35  ;;  %v4826_v2 = vor.u32 %v4365_v62, %v3386_v61  ;;  %v4838_v17 = vor.u32 %v4372_v13, %v3414_v12  ;;  %v3456_v46 = vld [vmem:[#allocation2 + $0xc4] sm:$0xf0]  ;;  %6063 = vst [vmem:[#allocation30_spill] sm:$0xff] %v4858_v58  ;;  %v300_v61 = vld [vmem:[%s5956_s2] sm:$0x3] }
  0x4a   :  { %6052 = vst [vmem:[#allocation19_spill] sm:$0xff] %v4810_v52  ;;  %v4856_v57 = vor.u32 %v4381_v45, %v3456_v46  ;;  %v4388_v62 = vld [vmem:[#allocation2 + $0xe4] sm:$0xf]  ;;  %v4871_v6 = vperm.slane %v300_v61, 0  ;;  %v3520_v61 = vld [vmem:[#allocation2 + $0x13c] sm:$0xf0] }
  0x4b   :  { %1538 = vmatpush.bf16.msrb.mxu1 %v3883_v60  ;;  %v3380_v60 = vld [vmem:[#allocation2 + $0x24] sm:$0xf0]  ;;  %6056 = vst [vmem:[#allocation23_spill] sm:$0xff] %v4826_v2 }
  0x4c   :  { %1627 = vmatpush.bf16.msrb.mxu2 %v3947_v11  ;;  %v4824_v1 = vor.u32 %v4361_v59, %v3380_v60  ;;  %v3408_v11 = vld [vmem:[#allocation2 + $0x5c] sm:$0xf0]  ;;  %6059 = vst [vmem:[#allocation26_spill] sm:$0xff] %v4838_v17  ;;  %v4860_v59 = vor.u32 %v4382_v49, %v3464_v50  ;;  %v4862_v60 = vor.u32 %v4386_v56, %v3470_v55  ;;  %v3512_v49 = vld [vmem:[#allocation2 + $0x134] sm:$0xf0] }
  0x4d   :  { %1716 = vmatpush.bf16.msrb.mxu3 %v4011_v27  ;;  %1805 = vmatpush.bf16.msrb.mxu0 %v4075_v42  ;;  %v4836_v16 = vor.u32 %v4368_v10, %v3408_v11  ;;  %v4378_v27 = vld [vmem:[#allocation2 + $0x90] sm:$0xf0]  ;;  %v4178_v42 = vld [vmem:[#allocation5 + $0x2d0] sm:$0xf]  ;;  %v4393_v10 = vld [vmem:[#allocation2 + $0x108] sm:$0xf0]  ;;  %v4873_v11 = vor.u32 %v4388_v62, %v3484_v3  ;;  %v4904_v8 = vor.u32 %v4395_v48, %v3512_v49 }
  0x4e   :  { %1480 = vmatmul.bf16.gmra.mxu1 %v4796_v18  ;;  %1500 = vmatmul.bf16.gmra.mxu2 %v4798_v19  ;;  %6055 = vst [vmem:[#allocation22_spill] sm:$0xff] %v4824_v1  ;;  %v4846_v35 = vor.u32 %v4378_v27, %v3434_v23  ;;  %v4179_v44 = vor.u32 %v4563_v43, %v4178_v42  ;;  %v3518_v50 = vld [vmem:[#allocation2 + $0x120] sm:$0xf]  ;;  %v4399_v55 = vld [vmem:[#allocation2 + $0x138] sm:$0xf0] }
  0x4f   :  { %1520 = vmatmul.bf16.gmra.mxu3 %v4800_v22  ;;  %1887 = vmatpush.bf16.msra.mxu1 %v4195_v33  ;;  %6058 = vst [vmem:[#allocation25_spill] sm:$0xff] %v4836_v16  ;;  %v4379_v33 = vld [vmem:[#allocation2 + $0x98] sm:$0xf0]  ;;  %v4882_v23 = vor.u32 %v4393_v10, %v3498_v9  ;;  %v4396_v56 = vld [vmem:[#allocation2 + $0x124] sm:$0xf]  ;;  %v4906_v9 = vor.u32 %v4399_v55, %v3518_v50 }
  0x50   :  { %1460 = vmatmul.bf16.gmra.mxu0 %v4802_v26  ;;  %6060 = vst [vmem:[#allocation27_spill] sm:$0xff] %v4846_v35  ;;  %v4850_v40 = vor.u32 %v4379_v33, %v3442_v32  ;;  %v4171_v32 = vor.u32 %v4561_v31, %v4170_v30  ;;  %v3526_v3 = vld [vmem:[#allocation2 + $0x128] sm:$0xf]  ;;  %v4911_v30 = vor.u32 %v4396_v56, %v3520_v61  ;;  %v4402_v61 = vld [vmem:[#allocation2 + $0x154] sm:$0xf] }
  0x51   :  { %6064 = vst [vmem:[#allocation31_spill] sm:$0xff] %v4860_v59 }
  0x52   :  { %6062 = vst [vmem:[#allocation29_spill] sm:$0xff] %v4850_v40 }
  0x53   :  { %1888 = vmatpush.bf16.msra.mxu1 %v4187_v5  ;;  %6065 = vst [vmem:[#allocation32_spill] sm:$0xff] %v4862_v60  ;;  %v4392_v5 = vld [vmem:[#allocation2 + $0x100] sm:$0xf0] }
  0x54   :  { %v4875_v12 = vor.u32 %v4392_v5, %v3490_v4  ;;  %6067 = vst [vmem:[#allocation34_spill] sm:$0xff] %v4877_v20  ;;  %v4400_v4 = vld [vmem:[#allocation2 + $0x140] sm:$0xf0] }
  0x55   :  { %6068 = vst [vmem:[#allocation35_spill] sm:$0xff] %v4882_v23 }
  0x56   :  { %6066 = vst [vmem:[#allocation33_spill] sm:$0xff] %v4875_v12 }
  0x57   :  { %1889 = vmatpush.bf16.msra.mxu1 %v4179_v44  ;;  %6069 = vst [vmem:[#allocation36_spill] sm:$0xff] %v4906_v9 }
  0x58   :  { %6070 = vst [vmem:[#allocation37_spill] sm:$0xff] %v4911_v30 }
  0x5b   :  { %1890 = vmatpush.bf16.msra.mxu1 %v4171_v32  ;;  %v4916_v32 = vor.u32 %v4400_v4, %v3526_v3  ;;  %v3546_v3 = vld [vmem:[#allocation2 + $0x158] sm:$0xf]  ;;  %v4406_v4 = vld [vmem:[#allocation2 + $0x170] sm:$0xf0] }
  0x5d   :  { %6071 = vst [vmem:[#allocation38_spill] sm:$0xff] %v4916_v32 }
  0x5e   :  { %1485 = vmatmul.bf16.gmra.mxu1 %v4808_v51  ;;  %1505 = vmatmul.bf16.gmra.mxu2 %v4810_v52 }
  0x5f   :  { %1525 = vmatmul.bf16.gmra.mxu3 %v4812_v53 }
  0x60   :  { %1465 = vmatmul.bf16.gmra.mxu0 %v4814_v54 }
  0x6e   :  { %1539 = vmatmul.bf16.vlgmr.msrb.gmra.mxu1 %v4820_v63  ;;  %1628 = vmatmul.bf16.vlgmr.msrb.gmra.mxu2 %v4822_v0  ;;  %v3876_v0 = vld [vmem:[#allocation5 + $0x78] sm:$0xf0] }
  0x6f   :  { %1717 = vmatmul.bf16.vlgmr.msrb.gmra.mxu3 %v4824_v1  ;;  %v4486_v1 = vld [vmem:[#allocation5 + $0x74] sm:$0xf] }
  0x70   :  { %1806 = vmatmul.bf16.vlgmr.msrb.gmra.mxu0 %v4826_v2 }
  0x7e   :  { %1544 = vmatmul.bf16.gmra.mxu1 %v4832_v14  ;;  %1633 = vmatmul.bf16.gmra.mxu2 %v4834_v15 }
  0x7f   :  { %1722 = vmatmul.bf16.gmra.mxu3 %v4836_v16  ;;  %v4414_v16 = vld [vmem:[#allocation2 + $0x1b0] sm:$0xf0] }
  0x80   :  { %1811 = vmatmul.bf16.gmra.mxu0 %v4838_v17  ;;  %v3582_v17 = vld [vmem:[#allocation2 + $0x198] sm:$0xf] }
  0x8e   :  { %1549 = vmatmul.bf16.gmra.mxu1 %v4844_v34  ;;  %1638 = vmatmul.bf16.gmra.mxu2 %v4846_v35 }
  0x8f   :  { %1727 = vmatmul.bf16.gmra.mxu3 %v4848_v36  ;;  %v4410_v36 = vld [vmem:[#allocation2 + $0x194] sm:$0xf] }
  0x90   :  { %1816 = vmatmul.bf16.gmra.mxu0 %v4850_v40 }
  0x9e   :  { %1554 = vmatmul.bf16.gmra.mxu1 %v4856_v57  ;;  %1643 = vmatmul.bf16.gmra.mxu2 %v4858_v58 }
  0x9f   :  { %1732 = vmatmul.bf16.gmra.mxu3 %v4860_v59 }
  0xa0   :  { %1821 = vmatmul.bf16.gmra.mxu0 %v4862_v60 }
  0xab   :  { %v1471_v13 = vpop.f32.mrf.mxu1 }
  0xac   :  { %v4880_v21 = vadd.f32 %v1471_v13, %v4871_v6 }
  0xad   :  { %v4884_v27 = vpop.f32.mrf.mxu0 }
  0xae   :  { %1559 = vmatmul.bf16.gmra.mxu1 %v4873_v11  ;;  %1648 = vmatmul.bf16.gmra.mxu2 %v4875_v12 }
  0xaf   :  { %1737 = vmatmul.bf16.gmra.mxu3 %v4877_v20  ;;  %v4940_v20 = vor.u32 %v4406_v4, %v3546_v3 }
  0xb0   :  { %1826 = vmatmul.bf16.gmra.mxu0 %v4882_v23 }
  0xb1   :  { %v1491_v33 = vpop.f32.mrf.mxu2  ;;  %6073 = vst [vmem:[#allocation40_spill] sm:$0xff] %v4940_v20 }
  0xb2   :  { %v4891_v42 = vadd.f32 %v1491_v33, %v4871_v6  ;;  %v1511_v43 = vpop.f32.mrf.mxu3 }
  0xb3   :  { %v1473_v44 = vpop.f32.mrf.mxu1  ;;  %v4894_v45 = vadd.f32 %v1511_v43, %v4871_v6 }
  0xb4   :  { %v4897_v46 = vadd.f32 %v1473_v44, %v4871_v6 }
  0xb5   :  { %v4899_v47 = vpop.f32.mrf.mxu0 }
  0xb9   :  { %v1493_v62 = vpop.f32.mrf.mxu2 }
  0xba   :  { %v4902_v5 = vadd.f32 %v1493_v62, %v4871_v6  ;;  %v1513_v7 = vpop.f32.mrf.mxu3  ;;  %v3540_v62 = vld [vmem:[#allocation2 + $0x16c] sm:$0xf0] }
  0xbb   :  { %v1476_v10 = vpop.f32.mrf.mxu1  ;;  %v4909_v13 = vadd.f32 %v1513_v7, %v4871_v6  ;;  %v4403_v7 = vld [vmem:[#allocation2 + $0x15c] sm:$0xf] }
  0xbc   :  { %v4914_v31 = vadd.f32 %v1476_v10, %v4871_v6  ;;  %v3548_v10 = vld [vmem:[#allocation2 + $0x174] sm:$0xf0] }
  0xbd   :  { %v4918_v33 = vpop.f32.mrf.mxu0  ;;  %v4945_v60 = vor.u32 %v4403_v7, %v3548_v10 }
  0xbe   :  { %1564 = vmatmul.bf16.gmra.mxu1 %v4904_v8  ;;  %1653 = vmatmul.bf16.gmra.mxu2 %v4906_v9 }
  0xbf   :  { %1742 = vmatmul.bf16.gmra.mxu3 %v4911_v30  ;;  %v3554_v30 = vld [vmem:[#allocation2 + $0x160] sm:$0xf]  ;;  %6075 = vst [vmem:[#allocation42_spill] sm:$0xff] %v4945_v60 }
  0xc0   :  { %1831 = vmatmul.bf16.gmra.mxu0 %v4916_v32 }
  0xc1   :  { %v1496_v43 = vpop.f32.mrf.mxu2 }
  0xc2   :  { %v4925_v44 = vadd.f32 %v1496_v43, %v4871_v6  ;;  %v1516_v48 = vpop.f32.mrf.mxu3  ;;  %v4407_v43 = vld [vmem:[#allocation2 + $0x178] sm:$0xf0] }
  0xc3   :  { %v1478_v49 = vpop.f32.mrf.mxu1  ;;  %v4928_v50 = vadd.f32 %v1516_v48, %v4871_v6  ;;  %v4938_v48 = vor.u32 %v4402_v61, %v3540_v62  ;;  %v4950_v58 = vor.u32 %v4407_v43, %v3554_v30  ;;  %v4559_v61 = vld [vmem:[#allocation5 + $0x2b4] sm:$0xf0] }
  0xc4   :  { %v4931_v55 = vadd.f32 %v1478_v49, %v4871_v6 }
  0xc5   :  { %v4933_v56 = vpop.f32.mrf.mxu0  ;;  %6072 = vst [vmem:[#allocation39_spill] sm:$0xff] %v4938_v48 }
  0xc6   :  { %6076 = vst [vmem:[#allocation43_spill] sm:$0xff] %v4950_v58 }
  0xc9   :  { %v1498_v32 = vpop.f32.mrf.mxu2 }
  0xca   :  { %v4936_v9 = vadd.f32 %v1498_v32, %v4871_v6  ;;  %v1518_v23 = vpop.f32.mrf.mxu3  ;;  %v4162_v32 = vld [vmem:[#allocation5 + $0x2b0] sm:$0xf] }
  0xcb   :  { %v1481_v49 = vpop.f32.mrf.mxu1  ;;  %v4943_v12 = vadd.f32 %v1518_v23, %v4871_v6  ;;  %v4163_v62 = vor.u32 %v4559_v61, %v4162_v32  ;;  %v4583_v32 = vld [vmem:[#allocation5 + $0x374] sm:$0xf0]  ;;  %v3568_v61 = vld [vmem:[#allocation2 + $0x1a4] sm:$0xf0] }
  0xcc   :  { %v4948_v59 = vadd.f32 %v1481_v49, %v4871_v6  ;;  %v4409_v49 = vld [vmem:[#allocation2 + $0x18c] sm:$0xf] }
  0xcd   :  { %6074 = vst [vmem:[#allocation41_spill] sm:$0xff] %v4943_v12  ;;  %v4952_v40 = vpop.f32.mrf.mxu0  ;;  %1891 = vmatpush.bf16.msra.mxu1 %v4163_v62  ;;  %v4972_v15 = vor.u32 %v4409_v49, %v3568_v61  ;;  %v3596_v49 = vld [vmem:[#allocation2 + $0x1dc] sm:$0xf0]  ;;  %v3602_v61 = vld [vmem:[#allocation2 + $0x1c8] sm:$0xf] }
  0xce   :  { %1569 = vmatmul.bf16.gmra.mxu1 %v4938_v48  ;;  %1658 = vmatmul.bf16.gmra.mxu2 %v4940_v20  ;;  %v4413_v20 = vld [vmem:[#allocation2 + $0x1a8] sm:$0xf0] }
  0xcf   :  { %1747 = vmatmul.bf16.gmra.mxu3 %v4945_v60  ;;  %v4258_v60 = vld [vmem:[#allocation5 + $0x370] sm:$0xf]  ;;  %6078 = vst [vmem:[#allocation45_spill] sm:$0xff] %v4972_v15 }
  0xd0   :  { %1836 = vmatmul.bf16.gmra.mxu0 %v4950_v58  ;;  %v3574_v58 = vld [vmem:[#allocation2 + $0x190] sm:$0xf]  ;;  %v4259_v62 = vor.u32 %v4583_v32, %v4258_v60  ;;  %v3879_v32 = vor.u32 %v4486_v1, %v3876_v0 }
  0xd1   :  { %v1501_v23 = vpop.f32.mrf.mxu2  ;;  %v4974_v2 = vor.u32 %v4413_v20, %v3574_v58  ;;  %v4416_v20 = vld [vmem:[#allocation2 + $0x1c4] sm:$0xf] }
  0xd2   :  { %v4959_v3 = vadd.f32 %v1501_v23, %v4871_v6  ;;  %v1521_v30 = vpop.f32.mrf.mxu3  ;;  %v3576_v23 = vld [vmem:[#allocation2 + $0x1ac] sm:$0xf0]  ;;  %1976 = vmatpush.bf16.msra.mxu2 %v4259_v62  ;;  %v4984_v62 = vor.u32 %v4414_v16, %v3582_v17  ;;  %2065 = vmatpush.bf16.msra.mxu3 %v3879_v32  ;;  %v4417_v32 = vld [vmem:[#allocation2 + $0x1cc] sm:$0xf] }
  0xd3   :  { %v1483_v4 = vpop.f32.mrf.mxu1  ;;  %v4962_v7 = vadd.f32 %v1521_v30, %v4871_v6  ;;  %6079 = vst [vmem:[#allocation46_spill] sm:$0xff] %v4974_v2  ;;  %v4979_v60 = vor.u32 %v4410_v36, %v3576_v23  ;;  %v4420_v23 = vld [vmem:[#allocation2 + $0x1e0] sm:$0xf0] }
  0xd4   :  { %v4965_v10 = vadd.f32 %v1483_v4, %v4871_v6  ;;  %6082 = vst [vmem:[#allocation49_spill] sm:$0xff] %v4984_v62  ;;  %v5010_v52 = vor.u32 %v4420_v23, %v3602_v61 }
  0xd5   :  { %6077 = vst [vmem:[#allocation44_spill] sm:$0xff] %v4962_v7  ;;  %v4967_v43 = vpop.f32.mrf.mxu0 }
  0xd6   :  { %6081 = vst [vmem:[#allocation48_spill] sm:$0xff] %v4979_v60 }
  0xd7   :  { %6085 = vst [vmem:[#allocation52_spill] sm:$0xff] %v5010_v52 }
  0xd9   :  { %v1503_v35 = vpop.f32.mrf.mxu2 }
  0xda   :  { %v4970_v30 = vadd.f32 %v1503_v35, %v4871_v6  ;;  %v1523_v4 = vpop.f32.mrf.mxu3 }
  0xdb   :  { %v1486_v53 = vpop.f32.mrf.mxu1  ;;  %v4977_v22 = vadd.f32 %v1523_v4, %v4871_v6  ;;  %v1452_v4 = vadd.f32 %v4884_v27, %v4871_v6 }
  0xdc   :  { %v4982_v28 = vadd.f32 %v1486_v53, %v4871_v6 }
  0xdd   :  { %6080 = vst [vmem:[#allocation47_spill] sm:$0xff] %v4977_v22  ;;  %v4986_v35 = vpop.f32.mrf.mxu0  ;;  %v4428_v22 = vld [vmem:[#allocation2 + $0x220] sm:$0xf0] }
  0xde   :  { %1574 = vmatmul.bf16.gmra.mxu1 %v4972_v15  ;;  %1663 = vmatmul.bf16.gmra.mxu2 %v4974_v2  ;;  %v4421_v2 = vld [vmem:[#allocation2 + $0x1e8] sm:$0xf0] }
  0xdf   :  { %1752 = vmatmul.bf16.gmra.mxu3 %v4979_v60  ;;  %v3610_v60 = vld [vmem:[#allocation2 + $0x1d0] sm:$0xf] }
  0xe0   :  { %1841 = vmatmul.bf16.gmra.mxu0 %v4984_v62  ;;  %v5017_v15 = vor.u32 %v4421_v2, %v3610_v60 }
  0xe1   :  { %v1506_v58 = vpop.f32.mrf.mxu2 }
  0xe2   :  { %v4993_v36 = vadd.f32 %v1506_v58, %v4871_v6  ;;  %v1526_v0 = vpop.f32.mrf.mxu3  ;;  %v3604_v58 = vld [vmem:[#allocation2 + $0x1e4] sm:$0xf0]  ;;  %6088 = vst [vmem:[#allocation55_spill] sm:$0xff] %v5017_v15 }
  0xe3   :  { %v1488_v53 = vpop.f32.mrf.mxu1  ;;  %v4996_v1 = vadd.f32 %v1526_v0, %v4871_v6  ;;  %v5015_v38 = vor.u32 %v4417_v32, %v3604_v58  ;;  %v4423_v58 = vld [vmem:[#allocation2 + $0x1fc] sm:$0xf] }
  0xe4   :  { %v4999_v16 = vadd.f32 %v1488_v53, %v4871_v6  ;;  %v5008_v53 = vor.u32 %v4416_v20, %v3596_v49 }
  0xe5   :  { %6083 = vst [vmem:[#allocation50_spill] sm:$0xff] %v4996_v1  ;;  %v5001_v17 = vpop.f32.mrf.mxu0  ;;  %v4557_v1 = vld [vmem:[#allocation5 + $0x2a4] sm:$0xf0] }
  0xe6   :  { %6084 = vst [vmem:[#allocation51_spill] sm:$0xff] %v5008_v53 }
  0xe7   :  { %6087 = vst [vmem:[#allocation54_spill] sm:$0xff] %v5015_v38 }
  0xe9   :  { %v1508_v62 = vpop.f32.mrf.mxu2 }
  0xea   :  { %v5006_v0 = vadd.f32 %v1508_v62, %v4871_v6  ;;  %v1528_v39 = vpop.f32.mrf.mxu3  ;;  %v4154_v62 = vld [vmem:[#allocation5 + $0x2a0] sm:$0xf] }
  0xeb   :  { %v5013_v19 = vadd.f32 %v1528_v39, %v4871_v6  ;;  %v1540_v25 = vpop.f32.mrf.mxu1  ;;  %v4155_v20 = vor.u32 %v4557_v1, %v4154_v62  ;;  %v1454_v39 = vadd.f32 %v4899_v47, %v4871_v6  ;;  %v3630_v1 = vld [vmem:[#allocation2 + $0x200] sm:$0xf]  ;;  %v4427_v62 = vld [vmem:[#allocation2 + $0x218] sm:$0xf0]  ;;  %v1457_v47 = vadd.f32 %v4918_v33, %v4871_v6 }
  0xec   :  { %v1541_v27 = vadd.f32 %v1540_v25, %v1452_v4 }
  0xed   :  { %6086 = vst [vmem:[#allocation53_spill] sm:$0xff] %v5013_v19  ;;  %v1807_v51 = vpop.f32.mrf.mxu0  ;;  %1892 = vmatpush.bf16.msra.mxu1 %v4155_v20  ;;  %v3632_v20 = vld [vmem:[#allocation2 + $0x21c] sm:$0xf0] }
  0xee   :  { %1579 = vmatmul.bf16.gmra.mxu1 %v5008_v53  ;;  %1668 = vmatmul.bf16.gmra.mxu2 %v5010_v52  ;;  %v4250_v52 = vld [vmem:[#allocation5 + $0x360] sm:$0xf]  ;;  %v4581_v53 = vld [vmem:[#allocation5 + $0x364] sm:$0xf0] }
  0xef   :  { %1757 = vmatmul.bf16.gmra.mxu3 %v5015_v38  ;;  %v3624_v38 = vld [vmem:[#allocation2 + $0x214] sm:$0xf0]  ;;  %v4251_v19 = vor.u32 %v4581_v53, %v4250_v52 }
  0xf0   :  { %1846 = vmatmul.bf16.gmra.mxu0 %v5017_v15  ;;  %v4424_v15 = vld [vmem:[#allocation2 + $0x204] sm:$0xf] }
  0xf1   :  { %v1629_v49 = vpop.f32.mrf.mxu2  ;;  %1977 = vmatpush.bf16.msra.mxu2 %v4251_v19  ;;  %v5033_v48 = vor.u32 %v4424_v15, %v3632_v20  ;;  %v3658_v20 = vld [vmem:[#allocation2 + $0x238] sm:$0xf] }
  0xf2   :  { %v1630_v25 = vadd.f32 %v1629_v49, %v1541_v27  ;;  %v1718_v2 = vpop.f32.mrf.mxu3  ;;  %v3638_v49 = vld [vmem:[#allocation2 + $0x208] sm:$0xf] }
  0xf3   :  { %v1542_v60 = vpop.f32.mrf.mxu1  ;;  %6091 = vst [vmem:[#allocation58_spill] sm:$0xff] %v5033_v48  ;;  %v5035_v18 = vor.u32 %v4428_v22, %v3638_v49  ;;  %v1462_v49 = vadd.f32 %v4952_v40, %v4871_v6 }
  0xf4   :  { %v1543_v61 = vadd.f32 %v1542_v60, %v1454_v39  ;;  %v1719_v23 = vadd.f32 %v1718_v2, %v1630_v25  ;;  %v5031_v2 = vor.u32 %v4427_v62, %v3630_v1  ;;  %v4484_v60 = vld [vmem:[#allocation5 + $0x64] sm:$0xf]  ;;  %v4430_v62 = vld [vmem:[#allocation2 + $0x234] sm:$0xf] }
  0xf5   :  { %v1809_v4 = vpop.f32.mrf.mxu0  ;;  %6092 = vst [vmem:[#allocation59_spill] sm:$0xff] %v5035_v18 }
  0xf6   :  { %v5025_v32 = vadd.f32 %v1807_v51, %v1719_v23  ;;  %v5029_v51 = vor.u32 %v4423_v58, %v3624_v38  ;;  %6090 = vst [vmem:[#allocation57_spill] sm:$0xff] %v5031_v2  ;;  %v3868_v23 = vld [vmem:[#allocation5 + $0x68] sm:$0xf0]  ;;  %v1459_v38 = vadd.f32 %v4933_v56, %v4871_v6  ;;  %v3660_v56 = vld [vmem:[#allocation2 + $0x254] sm:$0xf0] }
  0xf7   :  { %v3871_v52 = vor.u32 %v4484_v60, %v3868_v23  ;;  %v3666_v60 = vld [vmem:[#allocation2 + $0x240] sm:$0xf]  ;;  %v4435_v23 = vld [vmem:[#allocation2 + $0x258] sm:$0xf0] }
  0xf8   :  { %6089 = vst [vmem:[#allocation56_spill] sm:$0xff] %v5025_v32 }
  0xf9   :  { %v1631_v27 = vpop.f32.mrf.mxu2  ;;  %2066 = vmatpush.bf16.msra.mxu3 %v3871_v52 }
  0xfa   :  { %v1632_v39 = vadd.f32 %v1631_v27, %v1543_v61  ;;  %v1720_v25 = vpop.f32.mrf.mxu3  ;;  %v4434_v27 = vld [vmem:[#allocation2 + $0x250] sm:$0xf0] }
  0xfb   :  { %v1545_v32 = vpop.f32.mrf.mxu1 }
  0xfc   :  { %v1546_v53 = vadd.f32 %v1545_v32, %v1457_v47  ;;  %v1721_v33 = vadd.f32 %v1720_v25, %v1632_v39  ;;  %v3652_v47 = vld [vmem:[#allocation2 + $0x24c] sm:$0xf0]  ;;  %v4431_v39 = vld [vmem:[#allocation2 + $0x23c] sm:$0xf] }
  0xfd   :  { %v1812_v7 = vpop.f32.mrf.mxu0 }
  0xfe   :  { %v5037_v12 = vadd.f32 %v1809_v4, %v1721_v33  ;;  %1584 = vmatmul.bf16.gmra.mxu1 %v5029_v51  ;;  %1673 = vmatmul.bf16.gmra.mxu2 %v5031_v2  ;;  %v5049_v33 = vor.u32 %v4430_v62, %v3652_v47  ;;  %v1464_v47 = vadd.f32 %v4967_v43, %v4871_v6 }
  0xff   :  { %1762 = vmatmul.bf16.gmra.mxu3 %v5033_v48  ;;  %v1467_v43 = vadd.f32 %v4986_v35, %v4871_v6 }
 0x100   :  { %1851 = vmatmul.bf16.gmra.mxu0 %v5035_v18  ;;  %6093 = vst [vmem:[#allocation60_spill] sm:$0xff] %v5049_v33 }
 0x101   :  { %v1634_v19 = vpop.f32.mrf.mxu2 }
 0x102   :  { %v1635_v15 = vadd.f32 %v1634_v19, %v1546_v53  ;;  %v1723_v61 = vpop.f32.mrf.mxu3  ;;  %v5053_v19 = vor.u32 %v4431_v39, %v3660_v56 }
 0x103   :  { %v1547_v22 = vpop.f32.mrf.mxu1 }
 0x104   :  { %v1548_v32 = vadd.f32 %v1547_v22, %v1459_v38  ;;  %v1724_v58 = vadd.f32 %v1723_v61, %v1635_v15  ;;  %v5051_v38 = vor.u32 %v4434_v27, %v3658_v20  ;;  %6095 = vst [vmem:[#allocation62_spill] sm:$0xff] %v5053_v19  ;;  %v5055_v22 = vor.u32 %v4435_v23, %v3666_v60 }
 0x105   :  { %v1814_v1 = vpop.f32.mrf.mxu0 }
 0x106   :  { %v5045_v4 = vadd.f32 %v1812_v7, %v1724_v58  ;;  %6094 = vst [vmem:[#allocation61_spill] sm:$0xff] %v5051_v38 }
 0x107   :  { %6096 = vst [vmem:[#allocation63_spill] sm:$0xff] %v5055_v22 }
 0x109   :  { %v1636_v25 = vpop.f32.mrf.mxu2 }
 0x10a   :  { %v1637_v52 = vadd.f32 %v1636_v25, %v1548_v32  ;;  %v1725_v53 = vpop.f32.mrf.mxu3  ;;  %v4146_v32 = vld [vmem:[#allocation5 + $0x290] sm:$0xf]  ;;  %v4555_v25 = vld [vmem:[#allocation5 + $0x294] sm:$0xf0] }
 0x10b   :  { %v1550_v7 = vpop.f32.mrf.mxu1  ;;  %v4147_v62 = vor.u32 %v4555_v25, %v4146_v32  ;;  %v3686_v32 = vld [vmem:[#allocation2 + $0x270] sm:$0xf]  ;;  %v4441_v25 = vld [vmem:[#allocation2 + $0x288] sm:$0xf0] }
 0x10c   :  { %v1551_v15 = vadd.f32 %v1550_v7, %v1462_v49  ;;  %v1726_v61 = vadd.f32 %v1725_v53, %v1637_v52  ;;  %v4437_v52 = vld [vmem:[#allocation2 + $0x26c] sm:$0xf]  ;;  %v4242_v53 = vld [vmem:[#allocation5 + $0x350] sm:$0xf]  ;;  %v4579_v7 = vld [vmem:[#allocation5 + $0x354] sm:$0xf0] }
 0x10d   :  { %v1817_v58 = vpop.f32.mrf.mxu0  ;;  %1893 = vmatpush.bf16.msra.mxu1 %v4147_v62  ;;  %v3688_v62 = vld [vmem:[#allocation2 + $0x28c] sm:$0xf0] }
 0x10e   :  { %v5057_v40 = vadd.f32 %v1814_v1, %v1726_v61  ;;  %1589 = vmatmul.bf16.gmra.mxu1 %v5049_v33  ;;  %1678 = vmatmul.bf16.gmra.mxu2 %v5051_v38  ;;  %v3680_v61 = vld [vmem:[#allocation2 + $0x284] sm:$0xf0]  ;;  %v4442_v38 = vld [vmem:[#allocation2 + $0x290] sm:$0xf0] }
 0x10f   :  { %1767 = vmatmul.bf16.gmra.mxu3 %v5053_v19  ;;  %v4243_v19 = vor.u32 %v4579_v7, %v4242_v53 }
 0x110   :  { %1856 = vmatmul.bf16.gmra.mxu0 %v5055_v22  ;;  %v4438_v22 = vld [vmem:[#allocation2 + $0x274] sm:$0xf] }
 0x111   :  { %v1639_v20 = vpop.f32.mrf.mxu2  ;;  %1978 = vmatpush.bf16.msra.mxu2 %v4243_v19  ;;  %v5073_v48 = vor.u32 %v4438_v22, %v3688_v62  ;;  %v1469_v19 = vadd.f32 %v5001_v17, %v4871_v6  ;;  %v3714_v62 = vld [vmem:[#allocation2 + $0x2a8] sm:$0xf]  ;;  %v4449_v6 = vld [vmem:[#allocation2 + $0x2c8] sm:$0xf0] }
 0x112   :  { %v1640_v27 = vadd.f32 %v1639_v20, %v1551_v15  ;;  %v1728_v49 = vpop.f32.mrf.mxu3  ;;  %v3694_v20 = vld [vmem:[#allocation2 + $0x278] sm:$0xf] }
 0x113   :  { %v1552_v1 = vpop.f32.mrf.mxu1  ;;  %6099 = vst [vmem:[#allocation66_spill] sm:$0xff] %v5073_v48  ;;  %v5075_v2 = vor.u32 %v4442_v38, %v3694_v20  ;;  %v4445_v20 = vld [vmem:[#allocation2 + $0x2ac] sm:$0xf] }
 0x114   :  { %v1553_v39 = vadd.f32 %v1552_v1, %v1464_v47  ;;  %v1729_v56 = vadd.f32 %v1728_v49, %v1640_v27  ;;  %v5071_v49 = vor.u32 %v4441_v25, %v3686_v32  ;;  %v4482_v1 = vld [vmem:[#allocation5 + $0x54] sm:$0xf]  ;;  %v4444_v25 = vld [vmem:[#allocation2 + $0x2a4] sm:$0xf] }
 0x115   :  { %v1819_v60 = vpop.f32.mrf.mxu0  ;;  %6100 = vst [vmem:[#allocation67_spill] sm:$0xff] %v5075_v2 }
 0x116   :  { %v5065_v23 = vadd.f32 %v1817_v58, %v1729_v56  ;;  %v5069_v58 = vor.u32 %v4437_v52, %v3680_v61  ;;  %6098 = vst [vmem:[#allocation65_spill] sm:$0xff] %v5071_v49  ;;  %v3860_v56 = vld [vmem:[#allocation5 + $0x58] sm:$0xf0] }
 0x117   :  { %v3863_v53 = vor.u32 %v4482_v1, %v3860_v56  ;;  %v3722_v1 = vld [vmem:[#allocation2 + $0x2b0] sm:$0xf] }
 0x118   :  { %6097 = vst [vmem:[#allocation64_spill] sm:$0xff] %v5065_v23 }
 0x119   :  { %v1641_v15 = vpop.f32.mrf.mxu2  ;;  %2067 = vmatpush.bf16.msra.mxu3 %v3863_v53 }
 0x11a   :  { %v1642_v47 = vadd.f32 %v1641_v15, %v1553_v39  ;;  %v1730_v27 = vpop.f32.mrf.mxu3  ;;  %v4448_v15 = vld [vmem:[#allocation2 + $0x2c0] sm:$0xf0] }
 0x11b   :  { %v1555_v18 = vpop.f32.mrf.mxu1 }
 0x11c   :  { %v1556_v7 = vadd.f32 %v1555_v18, %v1467_v43  ;;  %v1731_v35 = vadd.f32 %v1730_v27, %v1642_v47  ;;  %v3708_v43 = vld [vmem:[#allocation2 + $0x2bc] sm:$0xf0]  ;;  %v3716_v47 = vld [vmem:[#allocation2 + $0x2c4] sm:$0xf0] }
 0x11d   :  { %v1822_v33 = vpop.f32.mrf.mxu0  ;;  %v5087_v53 = vor.u32 %v4444_v25, %v3708_v43 }
 0x11e   :  { %v5077_v23 = vadd.f32 %v1819_v60, %v1731_v35  ;;  %1594 = vmatmul.bf16.gmra.mxu1 %v5069_v58  ;;  %1683 = vmatmul.bf16.gmra.mxu2 %v5071_v49 }
 0x11f   :  { %1772 = vmatmul.bf16.gmra.mxu3 %v5073_v48  ;;  %6101 = vst [vmem:[#allocation68_spill] sm:$0xff] %v5087_v53  ;;  %v4500_v48 = vld [vmem:[#allocation5 + $0xe4] sm:$0xf] }
 0x120   :  { %1861 = vmatmul.bf16.gmra.mxu0 %v5075_v2  ;;  %v4456_v2 = vld [vmem:[#allocation2 + $0x300] sm:$0xf0] }
 0x121   :  { %v1644_v22 = vpop.f32.mrf.mxu2 }
 0x122   :  { %v1645_v18 = vadd.f32 %v1644_v22, %v1556_v7  ;;  %v1733_v39 = vpop.f32.mrf.mxu3  ;;  %v5089_v7 = vor.u32 %v4448_v15, %v3714_v62 }
 0x123   :  { %v1557_v38 = vpop.f32.mrf.mxu1 }
 0x124   :  { %v1558_v52 = vadd.f32 %v1557_v38, %v1469_v19  ;;  %v1734_v61 = vadd.f32 %v1733_v39, %v1645_v18  ;;  %6102 = vst [vmem:[#allocation69_spill] sm:$0xff] %v5089_v7  ;;  %v5091_v19 = vor.u32 %v4445_v20, %v3716_v47  ;;  %v5094_v18 = vor.u32 %v4449_v6, %v3722_v1  ;;  %v3736_v1 = vld [vmem:[#allocation2 + $0x2f4] sm:$0xf0] }
 0x125   :  { %v1824_v32 = vpop.f32.mrf.mxu0 }
 0x126   :  { %v5085_v60 = vadd.f32 %v1822_v33, %v1734_v61  ;;  %6103 = vst [vmem:[#allocation70_spill] sm:$0xff] %v5091_v19  ;;  %v4553_v61 = vld [vmem:[#allocation5 + $0x284] sm:$0xf0] }
 0x127   :  { %6104 = vst [vmem:[#allocation71_spill] sm:$0xff] %v5094_v18 }
 0x129   :  { %v1646_v27 = vpop.f32.mrf.mxu2 }
 0x12a   :  { %v1647_v17 = vadd.f32 %v1646_v27, %v1558_v52  ;;  %v1735_v56 = vpop.f32.mrf.mxu3  ;;  %v4138_v52 = vld [vmem:[#allocation5 + $0x280] sm:$0xf]  ;;  %v4451_v27 = vld [vmem:[#allocation2 + $0x2dc] sm:$0xf] }
 0x12b   :  { %v1560_v35 = vpop.f32.mrf.mxu1  ;;  %v4139_v25 = vor.u32 %v4553_v61, %v4138_v52  ;;  %v4455_v52 = vld [vmem:[#allocation2 + $0x2f8] sm:$0xf0] }
 0x12c   :  { %v1561_v33 = vadd.f32 %v1560_v35, %v4880_v21  ;;  %v1736_v22 = vadd.f32 %v1735_v56, %v1647_v17  ;;  %v4234_v17 = vld [vmem:[#allocation5 + $0x340] sm:$0xf]  ;;  %v4577_v56 = vld [vmem:[#allocation5 + $0x344] sm:$0xf0]  ;;  %v4502_v35 = vld [vmem:[#allocation5 + $0xf4] sm:$0xf] }
 0x12d   :  { %v1827_v39 = vpop.f32.mrf.mxu0  ;;  %1894 = vmatpush.bf16.msra.mxu1 %v4139_v25  ;;  %v4235_v61 = vor.u32 %v4577_v56, %v4234_v17  ;;  %v3744_v25 = vld [vmem:[#allocation2 + $0x2fc] sm:$0xf0] }
 0x12e   :  { %v5096_v38 = vadd.f32 %v1824_v32, %v1736_v22  ;;  %1599 = vmatmul.bf16.gmra.mxu1 %v5087_v53  ;;  %1688 = vmatmul.bf16.gmra.mxu2 %v5089_v7  ;;  %v3742_v22 = vld [vmem:[#allocation2 + $0x2e0] sm:$0xf]  ;;  %v3750_v7 = vld [vmem:[#allocation2 + $0x2e8] sm:$0xf]  ;;  %v3932_v53 = vld [vmem:[#allocation5 + $0xe8] sm:$0xf0] }
 0x12f   :  { %1777 = vmatmul.bf16.gmra.mxu3 %v5091_v19  ;;  %v4452_v19 = vld [vmem:[#allocation2 + $0x2e4] sm:$0xf]  ;;  %1979 = vmatpush.bf16.msra.mxu2 %v4235_v61  ;;  %v4226_v61 = vld [vmem:[#allocation5 + $0x330] sm:$0xf] }
 0x130   :  { %1866 = vmatmul.bf16.gmra.mxu0 %v5094_v18  ;;  %v3940_v18 = vld [vmem:[#allocation5 + $0xf8] sm:$0xf0]  ;;  %v5109_v17 = vor.u32 %v4452_v19, %v3744_v25 }
 0x131   :  { %v1649_v43 = vpop.f32.mrf.mxu2  ;;  %v3844_v25 = vld [vmem:[#allocation5 + $0x38] sm:$0xf0] }
 0x132   :  { %v1650_v21 = vadd.f32 %v1649_v43, %v1561_v33  ;;  %v1738_v62 = vpop.f32.mrf.mxu3  ;;  %v3943_v33 = vor.u32 %v4502_v35, %v3940_v18  ;;  %6108 = vst [vmem:[#allocation75_spill] sm:$0xff] %v5109_v17 }
 0x133   :  { %v1562_v15 = vpop.f32.mrf.mxu1 }
 0x134   :  { %v1563_v20 = vadd.f32 %v1562_v15, %v4897_v46  ;;  %v1739_v32 = vadd.f32 %v1738_v62, %v1650_v21  ;;  %v5105_v62 = vor.u32 %v4451_v27, %v3736_v1  ;;  %2154 = vmatpush.bf16.msra.mxu0 %v3943_v33  ;;  %v4480_v15 = vld [vmem:[#allocation5 + $0x44] sm:$0xf]  ;;  %v4575_v1 = vld [vmem:[#allocation5 + $0x334] sm:$0xf0]  ;;  %v4498_v33 = vld [vmem:[#allocation5 + $0xd4] sm:$0xf] }
 0x135   :  { %v1829_v47 = vpop.f32.mrf.mxu0  ;;  %v4227_v19 = vor.u32 %v4575_v1, %v4226_v61 }
 0x136   :  { %v5103_v6 = vadd.f32 %v1827_v39, %v1739_v32  ;;  %6106 = vst [vmem:[#allocation73_spill] sm:$0xff] %v5105_v62  ;;  %v5107_v39 = vor.u32 %v4455_v52, %v3742_v22  ;;  %v3852_v32 = vld [vmem:[#allocation5 + $0x48] sm:$0xf0]  ;;  %v4478_v52 = vld [vmem:[#allocation5 + $0x34] sm:$0xf] }
 0x137   :  { %v3855_v56 = vor.u32 %v4480_v15, %v3852_v32  ;;  %1980 = vmatpush.bf16.msra.mxu2 %v4227_v19  ;;  %v3836_v15 = vld [vmem:[#allocation5 + $0x28] sm:$0xf0]  ;;  %v4496_v32 = vld [vmem:[#allocation5 + $0xc4] sm:$0xf] }
 0x138   :  { %6105 = vst [vmem:[#allocation72_spill] sm:$0xff] %v5103_v6  ;;  %v5112_v6 = vor.u32 %v4456_v2, %v3750_v7  ;;  %v3924_v2 = vld [vmem:[#allocation5 + $0xd8] sm:$0xf0] }
 0x139   :  { %v1651_v43 = vpop.f32.mrf.mxu2  ;;  %6107 = vst [vmem:[#allocation74_spill] sm:$0xff] %v5107_v39  ;;  %2068 = vmatpush.bf16.msra.mxu3 %v3855_v56 }
 0x13a   :  { %v1652_v46 = vadd.f32 %v1651_v43, %v1563_v20  ;;  %v1740_v21 = vpop.f32.mrf.mxu3  ;;  %6109 = vst [vmem:[#allocation76_spill] sm:$0xff] %v5112_v6  ;;  %v3935_v20 = vor.u32 %v4500_v48, %v3932_v53  ;;  %v3927_v48 = vor.u32 %v4498_v33, %v3924_v2  ;;  %v4573_v53 = vld [vmem:[#allocation5 + $0x324] sm:$0xf0]  ;;  %v4458_v2 = vld [vmem:[#allocation2 + $0x314] sm:$0xf] }
 0x13b   :  { %v1565_v49 = vpop.f32.mrf.mxu1 }
 0x13c   :  { %v1566_v18 = vadd.f32 %v1565_v49, %v4914_v31  ;;  %v1741_v35 = vadd.f32 %v1740_v21, %v1652_v46  ;;  %2155 = vmatpush.bf16.msra.mxu0 %v3935_v20  ;;  %v3847_v31 = vor.u32 %v4478_v52, %v3844_v25  ;;  %v4218_v49 = vld [vmem:[#allocation5 + $0x320] sm:$0xf]  ;;  %v4476_v21 = vld [vmem:[#allocation5 + $0x24] sm:$0xf]  ;;  %v3916_v20 = vld [vmem:[#allocation5 + $0xc8] sm:$0xf0] }
 0x13d   :  { %v1832_v27 = vpop.f32.mrf.mxu0  ;;  %v3919_v19 = vor.u32 %v4496_v32, %v3916_v20  ;;  %v4210_v52 = vld [vmem:[#allocation5 + $0x310] sm:$0xf]  ;;  %v4571_v25 = vld [vmem:[#allocation5 + $0x314] sm:$0xf0]  ;;  %v4202_v32 = vld [vmem:[#allocation5 + $0x300] sm:$0xf] }
 0x13e   :  { %v5114_v22 = vadd.f32 %v1829_v47, %v1741_v35  ;;  %1604 = vmatmul.bf16.gmra.mxu1 %v5105_v62  ;;  %1693 = vmatmul.bf16.gmra.mxu2 %v5107_v39  ;;  %v4219_v47 = vor.u32 %v4573_v53, %v4218_v49  ;;  %v3839_v35 = vor.u32 %v4476_v21, %v3836_v15  ;;  %v3770_v49 = vld [vmem:[#allocation2 + $0x318] sm:$0xf]  ;;  %v4462_v21 = vld [vmem:[#allocation2 + $0x330] sm:$0xf0]  ;;  %v4459_v15 = vld [vmem:[#allocation2 + $0x31c] sm:$0xf] }
 0x13f   :  { %1782 = vmatmul.bf16.gmra.mxu3 %v5109_v17  ;;  %v3778_v17 = vld [vmem:[#allocation2 + $0x320] sm:$0xf]  ;;  %v4463_v39 = vld [vmem:[#allocation2 + $0x338] sm:$0xf0]  ;;  %v4472_v62 = vld [vmem:[#allocation5 + $0x4] sm:$0xf] }
 0x140   :  { %6110 = vst [vmem:[#allocation77_spill] sm:$0xff] %v5114_v22  ;;  %1871 = vmatmul.bf16.gmra.mxu0 %v5112_v6  ;;  %2069 = vmatpush.bf16.msra.mxu3 %v3847_v31  ;;  %v3764_v31 = vld [vmem:[#allocation2 + $0x32c] sm:$0xf0]  ;;  %v3828_v6 = vld [vmem:[#allocation5 + $0x18] sm:$0xf0] }
 0x141   :  { %v1654_v7 = vpop.f32.mrf.mxu2  ;;  %2156 = vmatpush.bf16.msra.mxu0 %v3927_v48  ;;  %1981 = vmatpush.bf16.msra.mxu2 %v4219_v47  ;;  %v4494_v48 = vld [vmem:[#allocation5 + $0xb4] sm:$0xf]  ;;  %v3772_v47 = vld [vmem:[#allocation2 + $0x334] sm:$0xf0] }
 0x142   :  { %v1655_v43 = vadd.f32 %v1654_v7, %v1566_v18  ;;  %v1743_v46 = vpop.f32.mrf.mxu3  ;;  %v4211_v18 = vor.u32 %v4571_v25, %v4210_v52  ;;  %v4474_v7 = vld [vmem:[#allocation5 + $0x14] sm:$0xf]  ;;  %v5123_v52 = vor.u32 %v4458_v2, %v3764_v31  ;;  %v5125_v25 = vor.u32 %v4462_v21, %v3770_v49  ;;  %v4004_v21 = vld [vmem:[#allocation5 + $0x178] sm:$0xf0] }
 0x143   :  { %v1567_v56 = vpop.f32.mrf.mxu1  ;;  %v4518_v49 = vld [vmem:[#allocation5 + $0x174] sm:$0xf] }
 0x144   :  { %v1568_v61 = vadd.f32 %v1567_v56, %v4931_v55  ;;  %v1744_v1 = vadd.f32 %v1743_v46, %v1655_v43  ;;  %2070 = vmatpush.bf16.msra.mxu3 %v3839_v35  ;;  %v3831_v55 = vor.u32 %v4474_v7, %v3828_v6  ;;  %v3908_v43 = vld [vmem:[#allocation5 + $0xb8] sm:$0xf0]  ;;  %v4569_v56 = vld [vmem:[#allocation5 + $0x304] sm:$0xf0]  ;;  %6112 = vst [vmem:[#allocation79_spill] sm:$0xff] %v5125_v25 }
 0x145   :  { %v1834_v33 = vpop.f32.mrf.mxu0  ;;  %2157 = vmatpush.bf16.msra.mxu0 %v3919_v19  ;;  %1982 = vmatpush.bf16.msra.mxu2 %v4211_v18  ;;  %v3911_v46 = vor.u32 %v4494_v48, %v3908_v43  ;;  %v4203_v35 = vor.u32 %v4569_v56, %v4202_v32  ;;  %v3820_v19 = vld [vmem:[#allocation5 + $0x8] sm:$0xf0]  ;;  %v4492_v6 = vld [vmem:[#allocation5 + $0xa4] sm:$0xf] }
 0x146   :  { %v5121_v53 = vadd.f32 %v1832_v27, %v1744_v1  ;;  %v3823_v18 = vor.u32 %v4472_v62, %v3820_v19  ;;  %v3900_v48 = vld [vmem:[#allocation5 + $0xa8] sm:$0xf0]  ;;  %v3892_v62 = vld [vmem:[#allocation5 + $0x98] sm:$0xf0] }
 0x147   :  { %v4465_v19 = vld [vmem:[#allocation2 + $0x34c] sm:$0xf] }
 0x148   :  { %6111 = vst [vmem:[#allocation78_spill] sm:$0xff] %v5121_v53  ;;  %2071 = vmatpush.bf16.msra.mxu3 %v3831_v55  ;;  %v5127_v53 = vor.u32 %v4459_v15, %v3772_v47  ;;  %v5130_v55 = vor.u32 %v4463_v39, %v3778_v17  ;;  %v4490_v15 = vld [vmem:[#allocation5 + $0x94] sm:$0xf] }
 0x149   :  { %v1656_v20 = vpop.f32.mrf.mxu2  ;;  %2158 = vmatpush.bf16.msra.mxu0 %v3911_v46  ;;  %1983 = vmatpush.bf16.msra.mxu2 %v4203_v35  ;;  %v3895_v39 = vor.u32 %v4490_v15, %v3892_v62  ;;  %v3884_v46 = vld [vmem:[#allocation5 + $0x88] sm:$0xf0] }
 0x14a   :  { %v1657_v27 = vadd.f32 %v1656_v20, %v1568_v61  ;;  %v1745_v1 = vpop.f32.mrf.mxu3  ;;  %6113 = vst [vmem:[#allocation80_spill] sm:$0xff] %v5127_v53  ;;  %v3903_v61 = vor.u32 %v4492_v6, %v3900_v48  ;;  %v3792_v6 = vld [vmem:[#allocation2 + $0x364] sm:$0xf0]  ;;  %v4466_v48 = vld [vmem:[#allocation2 + $0x354] sm:$0xf] }
 0x14b   :  { %v1570_v7 = vpop.f32.mrf.mxu1  ;;  %6114 = vst [vmem:[#allocation81_spill] sm:$0xff] %v5130_v55  ;;  %v5141_v62 = vor.u32 %v4465_v19, %v3792_v6 }
 0x14c   :  { %v1571_v43 = vadd.f32 %v1570_v7, %v4948_v59  ;;  %v1746_v22 = vadd.f32 %v1745_v1, %v1657_v27  ;;  %2072 = vmatpush.bf16.msra.mxu3 %v3823_v18  ;;  %v4007_v59 = vor.u32 %v4518_v49, %v4004_v21  ;;  %v3798_v7 = vld [vmem:[#allocation2 + $0x350] sm:$0xf]  ;;  %v4469_v18 = vld [vmem:[#allocation2 + $0x368] sm:$0xf0]  ;;  %v3806_v49 = vld [vmem:[#allocation2 + $0x358] sm:$0xf] }
 0x14d   :  { %v1837_v2 = vpop.f32.mrf.mxu0  ;;  %2159 = vmatpush.bf16.msra.mxu0 %v3903_v61  ;;  %v3800_v61 = vld [vmem:[#allocation2 + $0x36c] sm:$0xf0]  ;;  %v4470_v21 = vld [vmem:[#allocation2 + $0x370] sm:$0xf0] }
 0x14e   :  { %v5132_v31 = vadd.f32 %v1834_v33, %v1746_v22  ;;  %1609 = vmatmul.bf16.gmra.mxu1 %v5123_v52  ;;  %1698 = vmatmul.bf16.gmra.mxu2 %v5125_v25  ;;  %v4488_v33 = vld [vmem:[#allocation5 + $0x84] sm:$0xf] }
 0x14f   :  { %1787 = vmatmul.bf16.gmra.mxu3 %v5127_v53  ;;  %2243 = vmatpush.bf16.msrb.mxu1 %v4007_v59  ;;  %v3887_v56 = vor.u32 %v4488_v33, %v3884_v46 }
 0x150   :  { %1876 = vmatmul.bf16.gmra.mxu0 %v5130_v55  ;;  %v4548_v55 = vld [vmem:[#allocation5 + $0x264] sm:$0xf] }
 0x151   :  { %v1659_v17 = vpop.f32.mrf.mxu2  ;;  %2160 = vmatpush.bf16.msra.mxu0 %v3895_v39  ;;  %v5143_v39 = vor.u32 %v4469_v18, %v3798_v7  ;;  %v3388_v18 = vld [vmem:[#allocation2 + $0x2c] sm:$0xf0] }
 0x152   :  { %v1660_v47 = vadd.f32 %v1659_v17, %v1571_v43  ;;  %v1748_v22 = vpop.f32.mrf.mxu3  ;;  %v5145_v17 = vor.u32 %v4466_v48, %v3800_v61  ;;  %v3394_v48 = vld [vmem:[#allocation2 + $0x18] sm:$0xf]  ;;  %v4366_v61 = vld [vmem:[#allocation2 + $0x30] sm:$0xf0] }
 0x153   :  { %v1572_v32 = vpop.f32.mrf.mxu1  ;;  %6115 = vst [vmem:[#allocation82_spill] sm:$0xff] %v5143_v39 }
 0x154   :  { %v1573_v20 = vadd.f32 %v1572_v32, %v4965_v10  ;;  %v1749_v35 = vadd.f32 %v1748_v22, %v1660_v47  ;;  %6116 = vst [vmem:[#allocation83_spill] sm:$0xff] %v5145_v17  ;;  %v5148_v22 = vor.u32 %v4470_v21, %v3806_v49 }
 0x155   :  { %v1839_v27 = vpop.f32.mrf.mxu0  ;;  %2161 = vmatpush.bf16.msra.mxu0 %v3887_v56 }
 0x156   :  { %v5139_v1 = vadd.f32 %v1837_v2, %v1749_v35  ;;  %6117 = vst [vmem:[#allocation84_spill] sm:$0xff] %v5148_v22 }
 0x159   :  { %v1661_v43 = vpop.f32.mrf.mxu2 }
 0x15a   :  { %v1662_v15 = vadd.f32 %v1661_v43, %v1573_v20  ;;  %v1750_v59 = vpop.f32.mrf.mxu3 }
 0x15b   :  { %v1575_v10 = vpop.f32.mrf.mxu1 }
 0x15c   :  { %v1576_v2 = vadd.f32 %v1575_v10, %v4982_v28  ;;  %v1751_v47 = vadd.f32 %v1750_v59, %v1662_v15  ;;  %v5161_v59 = vor.u32 %v4366_v61, %v3394_v48  ;;  %v4369_v61 = vld [vmem:[#allocation2 + $0x4c] sm:$0xf] }
 0x15d   :  { %v1842_v33 = vpop.f32.mrf.mxu0 }
 0x15e   :  { %v5150_v46 = vadd.f32 %v1839_v27, %v1751_v47  ;;  %1614 = vmatmul.bf16.gmra.mxu1 %v5141_v62  ;;  %1703 = vmatmul.bf16.gmra.mxu2 %v5143_v39  ;;  %v4362_v27 = vld [vmem:[#allocation2 + $0x14] sm:$0xf]  ;;  %6118 = vst [vmem:[#allocation85_spill] sm:$0xff] %v5161_v59 }
 0x15f   :  { %1792 = vmatmul.bf16.gmra.mxu3 %v5145_v17  ;;  %v5159_v15 = vor.u32 %v4362_v27, %v3388_v18  ;;  %v3640_v17 = vld [vmem:[#allocation2 + $0x224] sm:$0xf0] }
 0x160   :  { %1881 = vmatmul.bf16.gmra.mxu0 %v5148_v22 }
 0x161   :  { %v1664_v32 = vpop.f32.mrf.mxu2 }
 0x162   :  { %v1665_v56 = vadd.f32 %v1664_v32, %v1576_v2  ;;  %v1753_v20 = vpop.f32.mrf.mxu3 }
 0x163   :  { %v1577_v35 = vpop.f32.mrf.mxu1 }
 0x164   :  { %v1578_v28 = vadd.f32 %v1577_v35, %v4999_v16  ;;  %v1754_v19 = vadd.f32 %v1753_v20, %v1665_v56  ;;  %v3996_v56 = vld [vmem:[#allocation5 + $0x168] sm:$0xf0] }
 0x165   :  { %v1844_v6 = vpop.f32.mrf.mxu0 }
 0x166   :  { %v5157_v7 = vadd.f32 %v1842_v33, %v1754_v19  ;;  %v4516_v33 = vld [vmem:[#allocation5 + $0x164] sm:$0xf] }
 0x167   :  { %v3999_v20 = vor.u32 %v4516_v33, %v3996_v56 }
 0x169   :  { %v1666_v43 = vpop.f32.mrf.mxu2  ;;  %2244 = vmatpush.bf16.msrb.mxu1 %v3999_v20 }
 0x16a   :  { %v1667_v49 = vadd.f32 %v1666_v43, %v1578_v28  ;;  %v1755_v21 = vpop.f32.mrf.mxu3  ;;  %v3416_v43 = vld [vmem:[#allocation2 + $0x64] sm:$0xf0] }
 0x16b   :  { %v1580_v10 = vpop.f32.mrf.mxu1  ;;  %v5173_v33 = vor.u32 %v4369_v61, %v3416_v43  ;;  %v3444_v43 = vld [vmem:[#allocation2 + $0x9c] sm:$0xf0] }
 0x16c   :  { %v1581_v2 = vadd.f32 %v1580_v10, %v4891_v42  ;;  %v1756_v47 = vadd.f32 %v1755_v21, %v1667_v49  ;;  %v3422_v49 = vld [vmem:[#allocation2 + $0x50] sm:$0xf]  ;;  %v4373_v21 = vld [vmem:[#allocation2 + $0x68] sm:$0xf0] }
 0x16d   :  { %v1847_v16 = vpop.f32.mrf.mxu0 }
 0x16e   :  { %v5164_v32 = vadd.f32 %v1844_v6, %v1756_v47  ;;  %1895 = vmatmul.bf16.vlgmr.msra.gmra.mxu1 %v5159_v15  ;;  %1984 = vmatmul.bf16.vlgmr.msra.gmra.mxu2 %v5161_v59 }
 0x16f   :  { %2073 = vmatmul.bf16.vlgmr.msra.gmra.mxu3 %v4778_v41 }
 0x170   :  { %2162 = vmatmul.bf16.vlgmr.msra.gmra.mxu0 %v4820_v63  ;;  %v5175_v63 = vor.u32 %v4373_v21, %v3422_v49  ;;  %v3450_v49 = vld [vmem:[#allocation2 + $0x88] sm:$0xf]  ;;  %v4380_v21 = vld [vmem:[#allocation2 + $0xa0] sm:$0xf0] }
 0x171   :  { %v1669_v35 = vpop.f32.mrf.mxu2 }
 0x172   :  { %v1670_v28 = vadd.f32 %v1669_v35, %v1581_v2  ;;  %v1758_v19 = vpop.f32.mrf.mxu3  ;;  %6119 = vst [vmem:[#allocation86_spill] sm:$0xff] %v5175_v63 }
 0x173   :  { %v1582_v42 = vpop.f32.mrf.mxu1 }
 0x174   :  { %v1583_v27 = vadd.f32 %v1582_v42, %v4902_v5  ;;  %v1759_v6 = vadd.f32 %v1758_v19, %v1670_v28 }
 0x175   :  { %v1849_v18 = vpop.f32.mrf.mxu0 }
 0x176   :  { %v5171_v48 = vadd.f32 %v1847_v16, %v1759_v6 }
 0x179   :  { %v1671_v10 = vpop.f32.mrf.mxu2 }
 0x17a   :  { %v1672_v41 = vadd.f32 %v1671_v10, %v1583_v27  ;;  %v1760_v47 = vpop.f32.mrf.mxu3 }
 0x17b   :  { %v1585_v2 = vpop.f32.mrf.mxu1 }
 0x17c   :  { %v1586_v56 = vadd.f32 %v1585_v2, %v4925_v44  ;;  %v1761_v20 = vadd.f32 %v1760_v47, %v1672_v41 }
 0x17d   :  { %v1852_v5 = vpop.f32.mrf.mxu0 }
 0x17e   :  { %v5178_v35 = vadd.f32 %v1849_v18, %v1761_v20  ;;  %1900 = vmatmul.bf16.gmra.mxu1 %v5173_v33  ;;  %1989 = vmatmul.bf16.gmra.mxu2 %v5175_v63  ;;  %v4376_v18 = vld [vmem:[#allocation2 + $0x84] sm:$0xf]  ;;  %v4422_v63 = vld [vmem:[#allocation2 + $0x1f0] sm:$0xf0] }
 0x17f   :  { %2078 = vmatmul.bf16.gmra.mxu3 %v4790_v29  ;;  %v5187_v29 = vor.u32 %v4376_v18, %v3444_v43 }
 0x180   :  { %2167 = vmatmul.bf16.gmra.mxu0 %v4832_v14  ;;  %v5189_v14 = vor.u32 %v4380_v21, %v3450_v49  ;;  %v4383_v21 = vld [vmem:[#allocation2 + $0xbc] sm:$0xf] }
 0x181   :  { %v1674_v16 = vpop.f32.mrf.mxu2 }
 0x182   :  { %v1675_v28 = vadd.f32 %v1674_v16, %v1586_v56  ;;  %v1763_v19 = vpop.f32.mrf.mxu3  ;;  %6120 = vst [vmem:[#allocation87_spill] sm:$0xff] %v5189_v14 }
 0x183   :  { %v1587_v42 = vpop.f32.mrf.mxu1 }
 0x184   :  { %v1588_v27 = vadd.f32 %v1587_v42, %v4936_v9  ;;  %v1764_v6 = vadd.f32 %v1763_v19, %v1675_v28  ;;  %v3988_v28 = vld [vmem:[#allocation5 + $0x158] sm:$0xf0] }
 0x185   :  { %v1854_v44 = vpop.f32.mrf.mxu0 }
 0x186   :  { %v5185_v61 = vadd.f32 %v1852_v5, %v1764_v6  ;;  %v4514_v5 = vld [vmem:[#allocation5 + $0x154] sm:$0xf] }
 0x187   :  { %v3991_v19 = vor.u32 %v4514_v5, %v3988_v28 }
 0x189   :  { %v1676_v10 = vpop.f32.mrf.mxu2  ;;  %2245 = vmatpush.bf16.msrb.mxu1 %v3991_v19 }
 0x18a   :  { %v1677_v41 = vadd.f32 %v1676_v10, %v1588_v27  ;;  %v1765_v47 = vpop.f32.mrf.mxu3  ;;  %v3472_v10 = vld [vmem:[#allocation2 + $0xd4] sm:$0xf0] }
 0x18b   :  { %v1590_v2 = vpop.f32.mrf.mxu1  ;;  %v5201_v5 = vor.u32 %v4383_v21, %v3472_v10  ;;  %v3500_v10 = vld [vmem:[#allocation2 + $0x10c] sm:$0xf0] }
 0x18c   :  { %v1591_v56 = vadd.f32 %v1590_v2, %v4959_v3  ;;  %v1766_v20 = vadd.f32 %v1765_v47, %v1677_v41  ;;  %v3478_v41 = vld [vmem:[#allocation2 + $0xc0] sm:$0xf]  ;;  %v4387_v47 = vld [vmem:[#allocation2 + $0xd8] sm:$0xf0] }
 0x18d   :  { %v1857_v9 = vpop.f32.mrf.mxu0 }
 0x18e   :  { %v5192_v16 = vadd.f32 %v1854_v44, %v1766_v20  ;;  %1905 = vmatmul.bf16.gmra.mxu1 %v5187_v29  ;;  %1994 = vmatmul.bf16.gmra.mxu2 %v5189_v14 }
 0x18f   :  { %2083 = vmatmul.bf16.gmra.mxu3 %v4802_v26 }
 0x190   :  { %2172 = vmatmul.bf16.gmra.mxu0 %v4844_v34  ;;  %v5203_v34 = vor.u32 %v4387_v47, %v3478_v41  ;;  %v3506_v41 = vld [vmem:[#allocation2 + $0xf8] sm:$0xf]  ;;  %v4394_v47 = vld [vmem:[#allocation2 + $0x110] sm:$0xf0] }
 0x191   :  { %v1679_v42 = vpop.f32.mrf.mxu2 }
 0x192   :  { %v1680_v27 = vadd.f32 %v1679_v42, %v1591_v56  ;;  %v1768_v6 = vpop.f32.mrf.mxu3  ;;  %6121 = vst [vmem:[#allocation88_spill] sm:$0xff] %v5203_v34 }
 0x193   :  { %v1592_v3 = vpop.f32.mrf.mxu1 }
 0x194   :  { %v1593_v18 = vadd.f32 %v1592_v3, %v4970_v30  ;;  %v1769_v44 = vadd.f32 %v1768_v6, %v1680_v27 }
 0x195   :  { %v1859_v43 = vpop.f32.mrf.mxu0 }
 0x196   :  { %v5199_v49 = vadd.f32 %v1857_v9, %v1769_v44 }
 0x199   :  { %v1681_v2 = vpop.f32.mrf.mxu2 }
 0x19a   :  { %v1682_v26 = vadd.f32 %v1681_v2, %v1593_v18  ;;  %v1770_v20 = vpop.f32.mrf.mxu3 }
 0x19b   :  { %v1595_v56 = vpop.f32.mrf.mxu1 }
 0x19c   :  { %v1596_v28 = vadd.f32 %v1595_v56, %v4993_v36  ;;  %v1771_v19 = vadd.f32 %v1770_v20, %v1682_v26 }
 0x19d   :  { %v1862_v30 = vpop.f32.mrf.mxu0 }
 0x19e   :  { %v5206_v42 = vadd.f32 %v1859_v43, %v1771_v19  ;;  %1910 = vmatmul.bf16.gmra.mxu1 %v5201_v5  ;;  %1999 = vmatmul.bf16.gmra.mxu2 %v5203_v34  ;;  %v4390_v43 = vld [vmem:[#allocation2 + $0xf4] sm:$0xf]  ;;  %v3584_v34 = vld [vmem:[#allocation2 + $0x1b4] sm:$0xf0] }
 0x19f   :  { %2088 = vmatmul.bf16.gmra.mxu3 %v4814_v54  ;;  %v5215_v54 = vor.u32 %v4390_v43, %v3500_v10 }
 0x1a0   :  { %2177 = vmatmul.bf16.gmra.mxu0 %v4856_v57  ;;  %v5217_v57 = vor.u32 %v4394_v47, %v3506_v41  ;;  %v4397_v47 = vld [vmem:[#allocation2 + $0x12c] sm:$0xf] }
 0x1a1   :  { %v1684_v9 = vpop.f32.mrf.mxu2 }
 0x1a2   :  { %v1685_v27 = vadd.f32 %v1684_v9, %v1596_v28  ;;  %v1773_v6 = vpop.f32.mrf.mxu3  ;;  %6122 = vst [vmem:[#allocation89_spill] sm:$0xff] %v5217_v57 }
 0x1a3   :  { %v1597_v3 = vpop.f32.mrf.mxu1 }
 0x1a4   :  { %v1598_v18 = vadd.f32 %v1597_v3, %v5006_v0  ;;  %v1774_v44 = vadd.f32 %v1773_v6, %v1685_v27  ;;  %v3980_v27 = vld [vmem:[#allocation5 + $0x148] sm:$0xf0] }
 0x1a5   :  { %v1864_v36 = vpop.f32.mrf.mxu0 }
 0x1a6   :  { %v5213_v21 = vadd.f32 %v1862_v30, %v1774_v44  ;;  %v4512_v30 = vld [vmem:[#allocation5 + $0x144] sm:$0xf] }
 0x1a7   :  { %v3983_v6 = vor.u32 %v4512_v30, %v3980_v27 }
 0x1a9   :  { %v1686_v2 = vpop.f32.mrf.mxu2  ;;  %2246 = vmatpush.bf16.msrb.mxu1 %v3983_v6 }
 0x1aa   :  { %v1687_v26 = vadd.f32 %v1686_v2, %v1598_v18  ;;  %v1775_v20 = vpop.f32.mrf.mxu3  ;;  %v3528_v2 = vld [vmem:[#allocation2 + $0x144] sm:$0xf0] }
 0x1ab   :  { %v1600_v56 = vpop.f32.mrf.mxu1  ;;  %v5229_v30 = vor.u32 %v4397_v47, %v3528_v2 }
 0x1ac   :  { %v1601_v28 = vadd.f32 %v1600_v56, %v4894_v45  ;;  %v1776_v19 = vadd.f32 %v1775_v20, %v1687_v26  ;;  %v3534_v26 = vld [vmem:[#allocation2 + $0x130] sm:$0xf]  ;;  %v4401_v20 = vld [vmem:[#allocation2 + $0x148] sm:$0xf0] }
 0x1ad   :  { %v1867_v0 = vpop.f32.mrf.mxu0 }
 0x1ae   :  { %v5220_v9 = vadd.f32 %v1864_v36, %v1776_v19  ;;  %1915 = vmatmul.bf16.gmra.mxu1 %v5215_v54  ;;  %2004 = vmatmul.bf16.gmra.mxu2 %v5217_v57 }
 0x1af   :  { %2093 = vmatmul.bf16.gmra.mxu3 %v4772_v37 }
 0x1b0   :  { %2182 = vmatmul.bf16.gmra.mxu0 %v4873_v11  ;;  %v5231_v11 = vor.u32 %v4401_v20, %v3534_v26  ;;  %v3556_v26 = vld [vmem:[#allocation2 + $0x17c] sm:$0xf0]  ;;  %v3562_v20 = vld [vmem:[#allocation2 + $0x168] sm:$0xf] }
 0x1b1   :  { %v1689_v3 = vpop.f32.mrf.mxu2 }
 0x1b2   :  { %v1690_v18 = vadd.f32 %v1689_v3, %v1601_v28  ;;  %v1778_v44 = vpop.f32.mrf.mxu3  ;;  %6123 = vst [vmem:[#allocation90_spill] sm:$0xff] %v5231_v11 }
 0x1b3   :  { %v1602_v45 = vpop.f32.mrf.mxu1 }
 0x1b4   :  { %v1603_v43 = vadd.f32 %v1602_v45, %v4909_v13  ;;  %v1779_v36 = vadd.f32 %v1778_v44, %v1690_v18 }
 0x1b5   :  { %v1869_v10 = vpop.f32.mrf.mxu0 }
 0x1b6   :  { %v5227_v41 = vadd.f32 %v1867_v0, %v1779_v36 }
 0x1b9   :  { %v1691_v56 = vpop.f32.mrf.mxu2 }
 0x1ba   :  { %v1692_v37 = vadd.f32 %v1691_v56, %v1603_v43  ;;  %v1780_v19 = vpop.f32.mrf.mxu3  ;;  %v6124_v43 = vld [vmem:[#allocation41_spill] sm:$0xff]  ;;  %v4408_v56 = vld [vmem:[#allocation2 + $0x180] sm:$0xf0] }
 0x1bb   :  { %v1605_v28 = vpop.f32.mrf.mxu1 }
 0x1bc   :  { %v1606_v27 = vadd.f32 %v1605_v28, %v4928_v50  ;;  %v1781_v6 = vadd.f32 %v1780_v19, %v1692_v37 }
 0x1bd   :  { %v1872_v13 = vpop.f32.mrf.mxu0 }
 0x1be   :  { %v5234_v3 = vadd.f32 %v1869_v10, %v1781_v6  ;;  %1920 = vmatmul.bf16.gmra.mxu1 %v5229_v30  ;;  %2009 = vmatmul.bf16.gmra.mxu2 %v5231_v11  ;;  %v4404_v10 = vld [vmem:[#allocation2 + $0x164] sm:$0xf]  ;;  %v6126_v6 = vld [vmem:[#allocation44_spill] sm:$0xff] }
 0x1bf   :  { %2098 = vmatmul.bf16.gmra.mxu3 %v4784_v24  ;;  %v5243_v24 = vor.u32 %v4404_v10, %v3556_v26 }
 0x1c0   :  { %2187 = vmatmul.bf16.gmra.mxu0 %v4904_v8  ;;  %v5245_v8 = vor.u32 %v4408_v56, %v3562_v20 }
 0x1c1   :  { %v1694_v0 = vpop.f32.mrf.mxu2 }
 0x1c2   :  { %v1695_v18 = vadd.f32 %v1694_v0, %v1606_v27  ;;  %v1783_v44 = vpop.f32.mrf.mxu3  ;;  %6125 = vst [vmem:[#allocation41_spill] sm:$0xff] %v5245_v8 }
 0x1c3   :  { %v1607_v45 = vpop.f32.mrf.mxu1 }
 0x1c4   :  { %v1608_v36 = vadd.f32 %v1607_v45, %v6124_v43  ;;  %v1784_v47 = vadd.f32 %v1783_v44, %v1695_v18  ;;  %v3972_v44 = vld [vmem:[#allocation5 + $0x138] sm:$0xf0]  ;;  %v6127_v43 = vld [vmem:[#allocation15_spill] sm:$0xff] }
 0x1c5   :  { %v1874_v50 = vpop.f32.mrf.mxu0 }
 0x1c6   :  { %v5241_v2 = vadd.f32 %v1872_v13, %v1784_v47  ;;  %v4510_v13 = vld [vmem:[#allocation5 + $0x134] sm:$0xf]  ;;  %v6128_v47 = vld [vmem:[#allocation39_spill] sm:$0xff] }
 0x1c9   :  { %v1696_v37 = vpop.f32.mrf.mxu2 }
 0x1ca   :  { %v1697_v19 = vadd.f32 %v1696_v37, %v1608_v36  ;;  %v1785_v28 = vpop.f32.mrf.mxu3  ;;  %v3975_v36 = vor.u32 %v4510_v13, %v3972_v44  ;;  %v6129_v37 = vld [vmem:[#allocation47_spill] sm:$0xff]  ;;  %v4415_v13 = vld [vmem:[#allocation2 + $0x1b8] sm:$0xf0] }
 0x1cb   :  { %v1610_v27 = vpop.f32.mrf.mxu1 }
 0x1cc   :  { %v1611_v0 = vadd.f32 %v1610_v27, %v6126_v6  ;;  %v1786_v11 = vadd.f32 %v1785_v28, %v1697_v19  ;;  %2247 = vmatpush.bf16.msrb.mxu1 %v3975_v36  ;;  %v4534_v28 = vld [vmem:[#allocation5 + $0x1f4] sm:$0xf]  ;;  %v4068_v27 = vld [vmem:[#allocation5 + $0x1f8] sm:$0xf0] }
 0x1cd   :  { %v1877_v45 = vpop.f32.mrf.mxu0  ;;  %v4071_v57 = vor.u32 %v4534_v28, %v4068_v27  ;;  %v6132_v28 = vld [vmem:[#allocation18_spill] sm:$0xff] }
 0x1ce   :  { %v5248_v18 = vadd.f32 %v1874_v50, %v1786_v11  ;;  %1925 = vmatmul.bf16.gmra.mxu1 %v5243_v24  ;;  %2014 = vmatmul.bf16.gmra.mxu2 %v5245_v8  ;;  %v4411_v8 = vld [vmem:[#allocation2 + $0x19c] sm:$0xf] }
 0x1cf   :  { %2103 = vmatmul.bf16.gmra.mxu3 %v6127_v43  ;;  %v3590_v43 = vld [vmem:[#allocation2 + $0x1a0] sm:$0xf]  ;;  %2332 = vmatpush.bf16.msrb.mxu2 %v4071_v57  ;;  %v4132_v57 = vld [vmem:[#allocation5 + $0x278] sm:$0xf0] }
 0x1d0   :  { %2192 = vmatmul.bf16.gmra.mxu0 %v6128_v47 }
 0x1d1   :  { %v1699_v10 = vpop.f32.mrf.mxu2 }
 0x1d2   :  { %v1700_v26 = vadd.f32 %v1699_v10, %v1611_v0  ;;  %v1788_v20 = vpop.f32.mrf.mxu3  ;;  %v5257_v0 = vor.u32 %v4411_v8, %v3584_v34  ;;  %v5259_v10 = vor.u32 %v4415_v13, %v3590_v43  ;;  %v6133_v34 = vld [vmem:[#allocation45_spill] sm:$0xff] }
 0x1d3   :  { %v1612_v56 = vpop.f32.mrf.mxu1 }
 0x1d4   :  { %v1613_v19 = vadd.f32 %v1612_v56, %v6129_v37  ;;  %v1789_v11 = vadd.f32 %v1788_v20, %v1700_v26  ;;  %6130 = vst [vmem:[#allocation44_spill] sm:$0xff] %v5259_v10  ;;  %v6131_v26 = vld [vmem:[#allocation50_spill] sm:$0xff] }
 0x1d5   :  { %v1879_v50 = vpop.f32.mrf.mxu0 }
 0x1d6   :  { %v5255_v6 = vadd.f32 %v1877_v45, %v1789_v11  ;;  %v4550_v11 = vld [vmem:[#allocation5 + $0x274] sm:$0xf] }
 0x1d9   :  { %v1701_v44 = vpop.f32.mrf.mxu2 }
 0x1da   :  { %v1702_v47 = vadd.f32 %v1701_v44, %v1613_v19  ;;  %v1790_v36 = vpop.f32.mrf.mxu3  ;;  %v4135_v19 = vor.u32 %v4550_v11, %v4132_v57  ;;  %v6134_v44 = vld [vmem:[#allocation53_spill] sm:$0xff] }
 0x1db   :  { %v1615_v56 = vpop.f32.mrf.mxu1 }
 0x1dc   :  { %v1616_v20 = vadd.f32 %v1615_v56, %v6131_v26  ;;  %v1791_v37 = vadd.f32 %v1790_v36, %v1702_v47  ;;  %2421 = vmatpush.bf16.msrb.mxu3 %v4135_v19  ;;  %v4418_v26 = vld [vmem:[#allocation2 + $0x1d4] sm:$0xf] }
 0x1dd   :  { %v1882_v14 = vpop.f32.mrf.mxu0 }
 0x1de   :  { %v5262_v45 = vadd.f32 %v1879_v50, %v1791_v37  ;;  %1930 = vmatmul.bf16.gmra.mxu1 %v5257_v0  ;;  %2019 = vmatmul.bf16.gmra.mxu2 %v5259_v10  ;;  %v3612_v37 = vld [vmem:[#allocation2 + $0x1ec] sm:$0xf0]  ;;  %v3618_v10 = vld [vmem:[#allocation2 + $0x1d8] sm:$0xf] }
 0x1df   :  { %2108 = vmatmul.bf16.gmra.mxu3 %v6132_v28  ;;  %v5271_v57 = vor.u32 %v4418_v26, %v3612_v37 }
 0x1e0   :  { %2197 = vmatmul.bf16.gmra.mxu0 %v6133_v34  ;;  %v5273_v34 = vor.u32 %v4422_v63, %v3618_v10 }
 0x1e1   :  { %v1704_v8 = vpop.f32.mrf.mxu2 }
 0x1e2   :  { %v1705_v27 = vadd.f32 %v1704_v8, %v1616_v20  ;;  %v1793_v43 = vpop.f32.mrf.mxu3  ;;  %6135 = vst [vmem:[#allocation15_spill] sm:$0xff] %v5273_v34  ;;  %v6136_v8 = vld [vmem:[#allocation56_spill] sm:$0xff] }
 0x1e3   :  { %v1617_v13 = vpop.f32.mrf.mxu1 }
 0x1e4   :  { %v1618_v47 = vadd.f32 %v1617_v13, %v6134_v44  ;;  %v1794_v50 = vadd.f32 %v1793_v43, %v1705_v27  ;;  %v3964_v43 = vld [vmem:[#allocation5 + $0x128] sm:$0xf0]  ;;  %v6137_v44 = vld [vmem:[#allocation11_spill] sm:$0xff] }
 0x1e5   :  { %v1884_v36 = vpop.f32.mrf.mxu0 }
 0x1e6   :  { %v5269_v56 = vadd.f32 %v1882_v14, %v1794_v50  ;;  %v4508_v14 = vld [vmem:[#allocation5 + $0x124] sm:$0xf] }
 0x1e7   :  { %v3967_v10 = vor.u32 %v4508_v14, %v3964_v43  ;;  %v3646_v14 = vld [vmem:[#allocation2 + $0x210] sm:$0xf]  ;;  %v4429_v43 = vld [vmem:[#allocation2 + $0x228] sm:$0xf0] }
 0x1e8   :  { %v5293_v39 = vor.u32 %v4429_v43, %v3646_v14 }
 0x1e9   :  { %v1706_v59 = vpop.f32.mrf.mxu2  ;;  %2248 = vmatpush.bf16.msrb.mxu1 %v3967_v10 }
 0x1ea   :  { %v1707_v28 = vadd.f32 %v1706_v59, %v1618_v47  ;;  %v1795_v11 = vpop.f32.mrf.mxu3  ;;  %v4637_v59 = vld [vmem:[%s5956_s2] sm:$0x3]  ;;  %6139 = vst [vmem:[#allocation39_spill] sm:$0xff] %v5293_v39 }
 0x1eb   :  { %v1896_v20 = vpop.f32.mrf.mxu1  ;;  %v5284_v63 = vperm.slane %v4637_v59, 1  ;;  %v6138_v47 = vld [vmem:[#allocation51_spill] sm:$0xff] }
 0x1ec   :  { %v1796_v19 = vadd.f32 %v1795_v11, %v1707_v28  ;;  %v1897_v22 = vadd.f32 %v1896_v20, %v6136_v8  ;;  %v4532_v8 = vld [vmem:[#allocation5 + $0x1e4] sm:$0xf] }
 0x1ed   :  { %v2163_v13 = vpop.f32.mrf.mxu0 }
 0x1ee   :  { %v5276_v27 = vadd.f32 %v1884_v36, %v1796_v19  ;;  %1935 = vmatmul.bf16.gmra.mxu1 %v5271_v57  ;;  %2024 = vmatmul.bf16.gmra.mxu2 %v5273_v34  ;;  %v4425_v34 = vld [vmem:[#allocation2 + $0x20c] sm:$0xf] }
 0x1ef   :  { %2113 = vmatmul.bf16.gmra.mxu3 %v6137_v44  ;;  %v4060_v44 = vld [vmem:[#allocation5 + $0x1e8] sm:$0xf0] }
 0x1f0   :  { %2202 = vmatmul.bf16.gmra.mxu0 %v6138_v47  ;;  %v4063_v59 = vor.u32 %v4532_v8, %v4060_v44  ;;  %v4124_v8 = vld [vmem:[#allocation5 + $0x268] sm:$0xf0] }
 0x1f1   :  { %v1985_v50 = vpop.f32.mrf.mxu2 }
 0x1f2   :  { %v1986_v36 = vadd.f32 %v1985_v50, %v1897_v22  ;;  %v2074_v26 = vpop.f32.mrf.mxu3  ;;  %2333 = vmatpush.bf16.msrb.mxu2 %v4063_v59  ;;  %v5291_v50 = vor.u32 %v4425_v34, %v3640_v17  ;;  %v4127_v59 = vor.u32 %v4548_v55, %v4124_v8  ;;  %v6141_v17 = vld [vmem:[#allocation13_spill] sm:$0xff] }
 0x1f3   :  { %v1898_v37 = vpop.f32.mrf.mxu1  ;;  %v2075_v28 = vadd.f32 %v2074_v26, %v5284_v63 }
 0x1f4   :  { %v1899_v11 = vadd.f32 %v1898_v37, %v5037_v12  ;;  %2422 = vmatpush.bf16.msrb.mxu3 %v4127_v59 }
 0x1f5   :  { %v5289_v20 = vadd.f32 %v2163_v13, %v2075_v28  ;;  %v2165_v19 = vpop.f32.mrf.mxu0  ;;  %v2688_v13 = vmax.f32 %v1986_v36, 0.0 }
 0x1f9   :  { %v1987_v47 = vpop.f32.mrf.mxu2 }
 0x1fa   :  { %v1988_v10 = vadd.f32 %v1987_v47, %v1899_v11  ;;  %v2076_v22 = vpop.f32.mrf.mxu3  ;;  %v4432_v47 = vld [vmem:[#allocation2 + $0x244] sm:$0xf] }
 0x1fb   :  { %v1901_v26 = vpop.f32.mrf.mxu1  ;;  %v2077_v12 = vadd.f32 %v2076_v22, %v5284_v63  ;;  %v3674_v22 = vld [vmem:[#allocation2 + $0x248] sm:$0xf] }
 0x1fc   :  { %v2690_v37 = vmax.f32 %v1988_v10, 0.0  ;;  %v1902_v28 = vadd.f32 %v1901_v26, %v5045_v4  ;;  %v3668_v10 = vld [vmem:[#allocation2 + $0x25c] sm:$0xf0]  ;;  %v4436_v26 = vld [vmem:[#allocation2 + $0x260] sm:$0xf0] }
 0x1fd   :  { %v5297_v44 = vadd.f32 %v2165_v19, %v2077_v12  ;;  %v2168_v53 = vpop.f32.mrf.mxu0  ;;  %v5311_v8 = vor.u32 %v4436_v26, %v3674_v22  ;;  %v6147_v26 = vld [vmem:[#allocation60_spill] sm:$0xff] }
 0x1fe   :  { %v5299_v25 = vpack.c.bf16 %v2690_v37, %v2688_v13  ;;  %1940 = vmatmul.bf16.gmra.mxu1 %v5291_v50  ;;  %2029 = vmatmul.bf16.gmra.mxu2 %v5293_v39 }
 0x1ff   :  { %2118 = vmatmul.bf16.gmra.mxu3 %v6141_v17  ;;  %6143 = vst [vmem:[#allocation18_spill] sm:$0xff] %v5311_v8 }
 0x200   :  { %6140 = vst [vmem:[#allocation47_spill] sm:$0xff] %v5299_v25  ;;  %2207 = vmatmul.bf16.gmra.mxu0 %v5029_v51  ;;  %v5309_v51 = vor.u32 %v4432_v47, %v3668_v10  ;;  %v6146_v10 = vld [vmem:[#allocation16_spill] sm:$0xff]  ;;  %v4546_v25 = vld [vmem:[#allocation5 + $0x254] sm:$0xf] }
 0x201   :  { %v1990_v34 = vpop.f32.mrf.mxu2 }
 0x202   :  { %v1991_v36 = vadd.f32 %v1990_v34, %v1902_v28  ;;  %v2079_v4 = vpop.f32.mrf.mxu3  ;;  %6142 = vst [vmem:[#allocation50_spill] sm:$0xff] %v5309_v51 }
 0x203   :  { %v1903_v11 = vpop.f32.mrf.mxu1  ;;  %v2080_v19 = vadd.f32 %v2079_v4, %v5284_v63 }
 0x204   :  { %v1904_v14 = vadd.f32 %v1903_v11, %v5057_v40  ;;  %v2692_v17 = vmax.f32 %v1991_v36, 0.0  ;;  %v6144_v40 = vld [vmem:[#allocation64_spill] sm:$0xff] }
 0x205   :  { %v5307_v55 = vadd.f32 %v2168_v53, %v2080_v19  ;;  %v2170_v43 = vpop.f32.mrf.mxu0  ;;  %v4506_v19 = vld [vmem:[#allocation5 + $0x114] sm:$0xf] }
 0x209   :  { %v1992_v12 = vpop.f32.mrf.mxu2 }
 0x20a   :  { %v1993_v13 = vadd.f32 %v1992_v12, %v1904_v14  ;;  %v2081_v37 = vpop.f32.mrf.mxu3  ;;  %v3956_v14 = vld [vmem:[#allocation5 + $0x118] sm:$0xf0] }
 0x20b   :  { %v1906_v28 = vpop.f32.mrf.mxu1  ;;  %v2082_v59 = vadd.f32 %v2081_v37, %v5284_v63  ;;  %v3959_v22 = vor.u32 %v4506_v19, %v3956_v14  ;;  %v3702_v19 = vld [vmem:[#allocation2 + $0x280] sm:$0xf]  ;;  %v4443_v14 = vld [vmem:[#allocation2 + $0x298] sm:$0xf0] }
 0x20c   :  { %v2694_v34 = vmax.f32 %v1993_v13, 0.0  ;;  %v1907_v53 = vadd.f32 %v1906_v28, %v6144_v40 }
 0x20d   :  { %v5315_v4 = vadd.f32 %v2170_v43, %v2082_v59  ;;  %v2173_v11 = vpop.f32.mrf.mxu0  ;;  %2249 = vmatpush.bf16.msrb.mxu1 %v3959_v22 }
 0x20e   :  { %1945 = vmatmul.bf16.gmra.mxu1 %v5309_v51  ;;  %2034 = vmatmul.bf16.gmra.mxu2 %v5311_v8  ;;  %v5319_v47 = vpack.c.bf16 %v2694_v34, %v2692_v17  ;;  %v4530_v8 = vld [vmem:[#allocation5 + $0x1d4] sm:$0xf]  ;;  %v4052_v17 = vld [vmem:[#allocation5 + $0x1d8] sm:$0xf0] }
 0x20f   :  { %2123 = vmatmul.bf16.gmra.mxu3 %v6146_v10  ;;  %v4439_v34 = vld [vmem:[#allocation2 + $0x27c] sm:$0xf]  ;;  %v4055_v39 = vor.u32 %v4530_v8, %v4052_v17  ;;  %v3696_v10 = vld [vmem:[#allocation2 + $0x294] sm:$0xf0] }
 0x210   :  { %6145 = vst [vmem:[#allocation45_spill] sm:$0xff] %v5319_v47  ;;  %2212 = vmatmul.bf16.gmra.mxu0 %v6147_v26  ;;  %v5329_v47 = vor.u32 %v4443_v14, %v3702_v19  ;;  %v4116_v8 = vld [vmem:[#allocation5 + $0x258] sm:$0xf0] }
 0x211   :  { %v1995_v36 = vpop.f32.mrf.mxu2  ;;  %2334 = vmatpush.bf16.msrb.mxu2 %v4055_v39  ;;  %v4119_v39 = vor.u32 %v4546_v25, %v4116_v8 }
 0x212   :  { %v1996_v12 = vadd.f32 %v1995_v36, %v1907_v53  ;;  %v2084_v13 = vpop.f32.mrf.mxu3  ;;  %v5327_v36 = vor.u32 %v4439_v34, %v3696_v10  ;;  %6150 = vst [vmem:[#allocation11_spill] sm:$0xff] %v5329_v47  ;;  %v6153_v34 = vld [vmem:[#allocation19_spill] sm:$0xff] }
 0x213   :  { %v1908_v43 = vpop.f32.mrf.mxu1  ;;  %v2085_v37 = vadd.f32 %v2084_v13, %v5284_v63  ;;  %2423 = vmatpush.bf16.msrb.mxu3 %v4119_v39 }
 0x214   :  { %v1909_v28 = vadd.f32 %v1908_v43, %v5077_v23  ;;  %6149 = vst [vmem:[#allocation56_spill] sm:$0xff] %v5327_v36 }
 0x215   :  { %v5325_v59 = vadd.f32 %v2173_v11, %v2085_v37  ;;  %v2175_v40 = vpop.f32.mrf.mxu0  ;;  %v2696_v11 = vmax.f32 %v1996_v12, 0.0 }
 0x217   :  { %6148 = vst [vmem:[#allocation53_spill] sm:$0xff] %v5325_v59 }
 0x219   :  { %v1997_v26 = vpop.f32.mrf.mxu2 }
 0x21a   :  { %v1998_v22 = vadd.f32 %v1997_v26, %v1909_v28  ;;  %v2086_v53 = vpop.f32.mrf.mxu3 }
 0x21b   :  { %v1911_v13 = vpop.f32.mrf.mxu1  ;;  %v2087_v23 = vadd.f32 %v2086_v53, %v5284_v63  ;;  %v3724_v53 = vld [vmem:[#allocation2 + $0x2cc] sm:$0xf0] }
 0x21c   :  { %v2698_v43 = vmax.f32 %v1998_v22, 0.0  ;;  %v1912_v37 = vadd.f32 %v1911_v13, %v5085_v60  ;;  %v4446_v22 = vld [vmem:[#allocation2 + $0x2b4] sm:$0xf]  ;;  %v3730_v13 = vld [vmem:[#allocation2 + $0x2b8] sm:$0xf] }
 0x21d   :  { %v5333_v17 = vadd.f32 %v2175_v40, %v2087_v23  ;;  %v2178_v51 = vpop.f32.mrf.mxu0  ;;  %v4450_v23 = vld [vmem:[#allocation2 + $0x2d0] sm:$0xf0] }
 0x21e   :  { %1950 = vmatmul.bf16.gmra.mxu1 %v5327_v36  ;;  %2039 = vmatmul.bf16.gmra.mxu2 %v5329_v47  ;;  %v5337_v28 = vpack.c.bf16 %v2698_v43, %v2696_v11  ;;  %v5347_v39 = vor.u32 %v4450_v23, %v3730_v13  ;;  %v6161_v23 = vld [vmem:[#allocation68_spill] sm:$0xff] }
 0x21f   :  { %6151 = vst [vmem:[#allocation51_spill] sm:$0xff] %v5333_v17  ;;  %2128 = vmatmul.bf16.gmra.mxu3 %v6153_v34  ;;  %v4188_v36 = vld [vmem:[#allocation5 + $0x2e8] sm:$0xf0] }
 0x220   :  { %6152 = vst [vmem:[#allocation13_spill] sm:$0xff] %v5337_v28  ;;  %2217 = vmatmul.bf16.gmra.mxu0 %v5069_v58  ;;  %v5345_v58 = vor.u32 %v4446_v22, %v3724_v53  ;;  %v6160_v53 = vld [vmem:[#allocation12_spill] sm:$0xff]  ;;  %v4528_v28 = vld [vmem:[#allocation5 + $0x1c4] sm:$0xf] }
 0x221   :  { %v2000_v12 = vpop.f32.mrf.mxu2  ;;  %6156 = vst [vmem:[#allocation60_spill] sm:$0xff] %v5347_v39 }
 0x222   :  { %v2001_v10 = vadd.f32 %v2000_v12, %v1912_v37  ;;  %v2089_v60 = vpop.f32.mrf.mxu3  ;;  %6155 = vst [vmem:[#allocation16_spill] sm:$0xff] %v5345_v58 }
 0x223   :  { %v1913_v19 = vpop.f32.mrf.mxu1  ;;  %v2090_v40 = vadd.f32 %v2089_v60, %v5284_v63 }
 0x224   :  { %v1914_v14 = vadd.f32 %v1913_v19, %v5096_v38  ;;  %v2700_v12 = vmax.f32 %v2001_v10, 0.0  ;;  %v6157_v38 = vld [vmem:[#allocation72_spill] sm:$0xff] }
 0x225   :  { %v5343_v25 = vadd.f32 %v2178_v51, %v2090_v40  ;;  %v2180_v26 = vpop.f32.mrf.mxu0 }
 0x227   :  { %6154 = vst [vmem:[#allocation64_spill] sm:$0xff] %v5343_v25 }
 0x229   :  { %v2002_v11 = vpop.f32.mrf.mxu2 }
 0x22a   :  { %v2003_v43 = vadd.f32 %v2002_v11, %v1914_v14  ;;  %v2091_v8 = vpop.f32.mrf.mxu3  ;;  %v4504_v14 = vld [vmem:[#allocation5 + $0x104] sm:$0xf]  ;;  %v3948_v11 = vld [vmem:[#allocation5 + $0x108] sm:$0xf0] }
 0x22b   :  { %v1916_v37 = vpop.f32.mrf.mxu1  ;;  %v2092_v34 = vadd.f32 %v2091_v8, %v5284_v63  ;;  %v3951_v13 = vor.u32 %v4504_v14, %v3948_v11  ;;  %v4196_v14 = vld [vmem:[#allocation5 + $0x2f8] sm:$0xf0]  ;;  %v3752_v11 = vld [vmem:[#allocation2 + $0x304] sm:$0xf0] }
 0x22c   :  { %v2702_v60 = vmax.f32 %v2003_v43, 0.0  ;;  %v1917_v51 = vadd.f32 %v1916_v37, %v6157_v38 }
 0x22d   :  { %v5351_v19 = vadd.f32 %v2180_v26, %v2092_v34  ;;  %v2183_v40 = vpop.f32.mrf.mxu0  ;;  %2250 = vmatpush.bf16.msrb.mxu1 %v3951_v13  ;;  %v6162_v34 = vld [vmem:[#allocation77_spill] sm:$0xff] }
 0x22e   :  { %1955 = vmatmul.bf16.gmra.mxu1 %v5345_v58  ;;  %2044 = vmatmul.bf16.gmra.mxu2 %v5347_v39  ;;  %v5355_v22 = vpack.c.bf16 %v2702_v60, %v2700_v12  ;;  %v4044_v12 = vld [vmem:[#allocation5 + $0x1c8] sm:$0xf0] }
 0x22f   :  { %6158 = vst [vmem:[#allocation19_spill] sm:$0xff] %v5351_v19  ;;  %2133 = vmatmul.bf16.gmra.mxu3 %v6160_v53  ;;  %v4453_v60 = vld [vmem:[#allocation2 + $0x2ec] sm:$0xf]  ;;  %v4566_v53 = vld [vmem:[#allocation5 + $0x2f4] sm:$0xf] }
 0x230   :  { %6159 = vst [vmem:[#allocation72_spill] sm:$0xff] %v5355_v22  ;;  %2222 = vmatmul.bf16.gmra.mxu0 %v6161_v23  ;;  %v4047_v22 = vor.u32 %v4528_v28, %v4044_v12  ;;  %v3758_v23 = vld [vmem:[#allocation2 + $0x2f0] sm:$0xf]  ;;  %v4457_v58 = vld [vmem:[#allocation2 + $0x308] sm:$0xf0]  ;;  %v4199_v13 = vor.u32 %v4566_v53, %v4196_v14  ;;  %v5363_v19 = vor.u32 %v4453_v60, %v3752_v11  ;;  %v6166_v53 = vld [vmem:[#allocation78_spill] sm:$0xff] }
 0x231   :  { %v2005_v10 = vpop.f32.mrf.mxu2  ;;  %v4526_v60 = vld [vmem:[#allocation5 + $0x1b4] sm:$0xf] }
 0x232   :  { %v2006_v43 = vadd.f32 %v2005_v10, %v1917_v51  ;;  %v2094_v8 = vpop.f32.mrf.mxu3  ;;  %2335 = vmatpush.bf16.msrb.mxu2 %v4047_v22  ;;  %2510 = vmatpush.bf16.msrb.mxu0 %v4199_v13  ;;  %6164 = vst [vmem:[#allocation68_spill] sm:$0xff] %v5363_v19 }
 0x233   :  { %v1918_v26 = vpop.f32.mrf.mxu1  ;;  %v2095_v37 = vadd.f32 %v2094_v8, %v5284_v63 }
 0x234   :  { %v1919_v38 = vadd.f32 %v1918_v26, %v6162_v34  ;;  %v4544_v26 = vld [vmem:[#allocation5 + $0x244] sm:$0xf]  ;;  %v2704_v25 = vmax.f32 %v2006_v43, 0.0  ;;  %v6169_v43 = vld [vmem:[#allocation14_spill] sm:$0xff] }
 0x235   :  { %v5361_v47 = vadd.f32 %v2183_v40, %v2095_v37  ;;  %v2185_v39 = vpop.f32.mrf.mxu0  ;;  %v5365_v40 = vor.u32 %v4457_v58, %v3758_v23  ;;  %v4108_v37 = vld [vmem:[#allocation5 + $0x248] sm:$0xf0]  ;;  %v4564_v34 = vld [vmem:[#allocation5 + $0x2e4] sm:$0xf]  ;;  %v4036_v58 = vld [vmem:[#allocation5 + $0x1b8] sm:$0xf0] }
 0x236   :  { %v4111_v12 = vor.u32 %v4544_v26, %v4108_v37  ;;  %v4191_v14 = vor.u32 %v4564_v34, %v4188_v36  ;;  %v4039_v11 = vor.u32 %v4526_v60, %v4036_v58  ;;  %v4542_v23 = vld [vmem:[#allocation5 + $0x234] sm:$0xf]  ;;  %v4180_v36 = vld [vmem:[#allocation5 + $0x2d8] sm:$0xf0]  ;;  %v4524_v37 = vld [vmem:[#allocation5 + $0x1a4] sm:$0xf] }
 0x237   :  { %6163 = vst [vmem:[#allocation12_spill] sm:$0xff] %v5361_v47  ;;  %v4028_v34 = vld [vmem:[#allocation5 + $0x1a8] sm:$0xf0]  ;;  %v4540_v58 = vld [vmem:[#allocation5 + $0x224] sm:$0xf] }
 0x238   :  { %6165 = vst [vmem:[#allocation77_spill] sm:$0xff] %v5365_v40  ;;  %2424 = vmatpush.bf16.msrb.mxu3 %v4111_v12  ;;  %2511 = vmatpush.bf16.msrb.mxu0 %v4191_v14  ;;  %v4031_v12 = vor.u32 %v4524_v37, %v4028_v34  ;;  %v3780_v37 = vld [vmem:[#allocation2 + $0x33c] sm:$0xf0] }
 0x239   :  { %v2007_v51 = vpop.f32.mrf.mxu2  ;;  %2336 = vmatpush.bf16.msrb.mxu2 %v4039_v11 }
 0x23a   :  { %v2008_v10 = vadd.f32 %v2007_v51, %v1919_v38  ;;  %v2096_v8 = vpop.f32.mrf.mxu3  ;;  %v4100_v51 = vld [vmem:[#allocation5 + $0x238] sm:$0xf0] }
 0x23b   :  { %v1921_v47 = vpop.f32.mrf.mxu1  ;;  %v2097_v28 = vadd.f32 %v2096_v8, %v5284_v63  ;;  %v4562_v8 = vld [vmem:[#allocation5 + $0x2d4] sm:$0xf] }
 0x23c   :  { %v2706_v17 = vmax.f32 %v2008_v10, 0.0  ;;  %v1922_v22 = vadd.f32 %v1921_v47, %v6166_v53  ;;  %v4103_v47 = vor.u32 %v4542_v23, %v4100_v51  ;;  %v4183_v10 = vor.u32 %v4562_v8, %v4180_v36  ;;  %v4172_v23 = vld [vmem:[#allocation5 + $0x2c8] sm:$0xf0]  ;;  %v4522_v8 = vld [vmem:[#allocation5 + $0x194] sm:$0xf] }
 0x23d   :  { %v5369_v13 = vadd.f32 %v2185_v39, %v2097_v28  ;;  %v2188_v38 = vpop.f32.mrf.mxu0  ;;  %v6170_v39 = vld [vmem:[#allocation73_spill] sm:$0xff]  ;;  %2337 = vmatpush.bf16.msrb.mxu2 %v4031_v12  ;;  %v4020_v36 = vld [vmem:[#allocation5 + $0x198] sm:$0xf0]  ;;  %v4520_v12 = vld [vmem:[#allocation5 + $0x184] sm:$0xf] }
 0x23e   :  { %1960 = vmatmul.bf16.gmra.mxu1 %v5363_v19  ;;  %2049 = vmatmul.bf16.gmra.mxu2 %v5365_v40  ;;  %v5373_v26 = vpack.c.bf16 %v2706_v17, %v2704_v25  ;;  %v4092_v40 = vld [vmem:[#allocation5 + $0x228] sm:$0xf0]  ;;  %v4560_v17 = vld [vmem:[#allocation5 + $0x2c4] sm:$0xf]  ;;  %v4023_v34 = vor.u32 %v4522_v8, %v4020_v36  ;;  %v4558_v19 = vld [vmem:[#allocation5 + $0x2b4] sm:$0xf] }
 0x23f   :  { %6167 = vst [vmem:[#allocation78_spill] sm:$0xff] %v5369_v13  ;;  %2138 = vmatmul.bf16.gmra.mxu3 %v6169_v43  ;;  %2512 = vmatpush.bf16.msrb.mxu0 %v4183_v10  ;;  %v4095_v14 = vor.u32 %v4540_v58, %v4092_v40  ;;  %v4175_v11 = vor.u32 %v4560_v17, %v4172_v23  ;;  %v4464_v10 = vld [vmem:[#allocation2 + $0x340] sm:$0xf0]  ;;  %v4164_v58 = vld [vmem:[#allocation5 + $0x2b8] sm:$0xf0] }
 0x240   :  { %6168 = vst [vmem:[#allocation91_spill] sm:$0xff] %v5373_v26  ;;  %2227 = vmatmul.bf16.gmra.mxu0 %v6170_v39  ;;  %2425 = vmatpush.bf16.msrb.mxu3 %v4103_v47  ;;  %v4084_v26 = vld [vmem:[#allocation5 + $0x218] sm:$0xf0]  ;;  %v4012_v17 = vld [vmem:[#allocation5 + $0x188] sm:$0xf0] }
 0x241   :  { %v2010_v28 = vpop.f32.mrf.mxu2  ;;  %2338 = vmatpush.bf16.msrb.mxu2 %v4023_v34  ;;  %v4536_v8 = vld [vmem:[#allocation5 + $0x204] sm:$0xf]  ;;  %v4076_v36 = vld [vmem:[#allocation5 + $0x208] sm:$0xf0] }
 0x242   :  { %v2011_v53 = vadd.f32 %v2010_v28, %v1922_v22  ;;  %v2099_v60 = vpop.f32.mrf.mxu3  ;;  %v4460_v22 = vld [vmem:[#allocation2 + $0x324] sm:$0xf]  ;;  %v4538_v28 = vld [vmem:[#allocation5 + $0x214] sm:$0xf] }
 0x243   :  { %v1923_v25 = vpop.f32.mrf.mxu1  ;;  %v2100_v43 = vadd.f32 %v2099_v60, %v5284_v63  ;;  %v3786_v60 = vld [vmem:[#allocation2 + $0x328] sm:$0xf]  ;;  %2513 = vmatpush.bf16.msrb.mxu0 %v4175_v11  ;;  %v4087_v40 = vor.u32 %v4538_v28, %v4084_v26  ;;  %v4556_v13 = vld [vmem:[#allocation5 + $0x2a4] sm:$0xf]  ;;  %v4079_v11 = vor.u32 %v4536_v8, %v4076_v36 }
 0x244   :  { %v1924_v51 = vadd.f32 %v1923_v25, %v5132_v31  ;;  %2426 = vmatpush.bf16.msrb.mxu3 %v4095_v14  ;;  %v4167_v31 = vor.u32 %v4558_v19, %v4164_v58  ;;  %v5383_v14 = vor.u32 %v4464_v10, %v3786_v60  ;;  %v4156_v19 = vld [vmem:[#allocation5 + $0x2a8] sm:$0xf0]  ;;  %v2708_v34 = vmax.f32 %v2011_v53, 0.0  ;;  %v4260_v60 = vld [vmem:[#allocation5 + $0x378] sm:$0xf0] }
 0x245   :  { %v5379_v39 = vadd.f32 %v2188_v38, %v2100_v43  ;;  %v2190_v47 = vpop.f32.mrf.mxu0  ;;  %v4015_v38 = vor.u32 %v4520_v12, %v4012_v17  ;;  %v4554_v10 = vld [vmem:[#allocation5 + $0x294] sm:$0xf] }
 0x246   :  { %v6172_v12 = vld [vmem:[#allocation17_spill] sm:$0xff] }
 0x247   :  { %6171 = vst [vmem:[#allocation14_spill] sm:$0xff] %v5379_v39  ;;  %v5381_v39 = vor.u32 %v4460_v22, %v3780_v37  ;;  %2514 = vmatpush.bf16.msrb.mxu0 %v4167_v31  ;;  %2339 = vmatpush.bf16.msrb.mxu2 %v4015_v38  ;;  %v4582_v37 = vld [vmem:[#allocation5 + $0x374] sm:$0xf]  ;;  %v4140_v38 = vld [vmem:[#allocation5 + $0x288] sm:$0xf0] }
 0x248   :  { %2427 = vmatpush.bf16.msrb.mxu3 %v4087_v40  ;;  %v4263_v53 = vor.u32 %v4582_v37, %v4260_v60 }
 0x249   :  { %v2012_v25 = vpop.f32.mrf.mxu2 }
 0x24a   :  { %v2013_v43 = vadd.f32 %v2012_v25, %v1924_v51  ;;  %v2101_v23 = vpop.f32.mrf.mxu3  ;;  %v4159_v51 = vor.u32 %v4556_v13, %v4156_v19  ;;  %2599 = vmatpush.bf16.msra.mxu1 %v4263_v53  ;;  %v4552_v25 = vld [vmem:[#allocation5 + $0x284] sm:$0xf]  ;;  %v4467_v19 = vld [vmem:[#allocation2 + $0x35c] sm:$0xf] }
 0x24b   :  { %v1926_v59 = vpop.f32.mrf.mxu1  ;;  %v2102_v26 = vadd.f32 %v2101_v23, %v5284_v63  ;;  %v4143_v8 = vor.u32 %v4552_v25, %v4140_v38  ;;  %v6173_v25 = vld [vmem:[#allocation20_spill] sm:$0xff] }
 0x24c   :  { %v2710_v28 = vmax.f32 %v2013_v43, 0.0  ;;  %v1927_v40 = vadd.f32 %v1926_v59, %v5139_v1  ;;  %2428 = vmatpush.bf16.msrb.mxu3 %v4079_v11  ;;  %2515 = vmatpush.bf16.msrb.mxu0 %v4159_v51  ;;  %v4148_v1 = vld [vmem:[#allocation5 + $0x298] sm:$0xf0] }
 0x24d   :  { %v5387_v58 = vadd.f32 %v2190_v47, %v2102_v26  ;;  %v2193_v22 = vpop.f32.mrf.mxu0  ;;  %v4151_v59 = vor.u32 %v4554_v10, %v4148_v1 }
 0x24e   :  { %1965 = vmatmul.bf16.gmra.mxu1 %v5381_v39  ;;  %2054 = vmatmul.bf16.gmra.mxu2 %v5383_v14  ;;  %v5391_v31 = vpack.c.bf16 %v2710_v28, %v2708_v34  ;;  %v3808_v34 = vld [vmem:[#allocation2 + $0x374] sm:$0xf0]  ;;  %v4471_v28 = vld [vmem:[#allocation2 + $0x378] sm:$0xf0] }
 0x24f   :  { %2143 = vmatmul.bf16.gmra.mxu3 %v6172_v12  ;;  %v5399_v60 = vor.u32 %v4467_v19, %v3808_v34 }
 0x250   :  { %2232 = vmatmul.bf16.gmra.mxu0 %v5123_v52  ;;  %v3814_v52 = vld [vmem:[#allocation2 + $0x360] sm:$0xf] }
 0x251   :  { %v2015_v13 = vpop.f32.mrf.mxu2  ;;  %2516 = vmatpush.bf16.msrb.mxu0 %v4151_v59  ;;  %v5401_v10 = vor.u32 %v4471_v28, %v3814_v52 }
 0x252   :  { %v2016_v47 = vadd.f32 %v2015_v13, %v1927_v40  ;;  %v2104_v17 = vpop.f32.mrf.mxu3 }
 0x253   :  { %v1928_v43 = vpop.f32.mrf.mxu1  ;;  %v2105_v23 = vadd.f32 %v2104_v17, %v5284_v63 }
 0x254   :  { %v1929_v36 = vadd.f32 %v1928_v43, %v5150_v46  ;;  %v2712_v1 = vmax.f32 %v2016_v47, 0.0 }
 0x255   :  { %v5397_v26 = vadd.f32 %v2193_v22, %v2105_v23  ;;  %v2195_v11 = vpop.f32.mrf.mxu0  ;;  %2517 = vmatpush.bf16.msrb.mxu0 %v4143_v8 }
 0x259   :  { %v2017_v51 = vpop.f32.mrf.mxu2 }
 0x25a   :  { %v2018_v40 = vadd.f32 %v2017_v51, %v1929_v36  ;;  %v2106_v37 = vpop.f32.mrf.mxu3 }
 0x25b   :  { %v1931_v12 = vpop.f32.mrf.mxu1  ;;  %v2107_v53 = vadd.f32 %v2106_v37, %v5284_v63 }
 0x25c   :  { %v2714_v46 = vmax.f32 %v2018_v40, 0.0  ;;  %v1932_v22 = vadd.f32 %v1931_v12, %v5157_v7 }
 0x25d   :  { %v5405_v59 = vadd.f32 %v2195_v11, %v2107_v53  ;;  %v2198_v13 = vpop.f32.mrf.mxu0 }
 0x25e   :  { %1970 = vmatmul.bf16.gmra.mxu1 %v5399_v60  ;;  %2059 = vmatmul.bf16.gmra.mxu2 %v5401_v10  ;;  %v5409_v17 = vpack.c.bf16 %v2714_v46, %v2712_v1  ;;  %v6174_v1 = vld [vmem:[#allocation21_spill] sm:$0xff]  ;;  %v6175_v46 = vld [vmem:[#allocation22_spill] sm:$0xff] }
 0x25f   :  { %2148 = vmatmul.bf16.gmra.mxu3 %v6173_v25  ;;  %v6176_v25 = vld [vmem:[#allocation23_spill] sm:$0xff] }
 0x260   :  { %2237 = vmatmul.bf16.gmra.mxu0 %v5141_v62 }
 0x261   :  { %v2020_v38 = vpop.f32.mrf.mxu2 }
 0x262   :  { %v2021_v43 = vadd.f32 %v2020_v38, %v1932_v22  ;;  %v2109_v23 = vpop.f32.mrf.mxu3  ;;  %v4252_v22 = vld [vmem:[#allocation5 + $0x368] sm:$0xf0] }
 0x263   :  { %v1933_v47 = vpop.f32.mrf.mxu1  ;;  %v2110_v8 = vadd.f32 %v2109_v23, %v5284_v63 }
 0x264   :  { %v1934_v7 = vadd.f32 %v1933_v47, %v5164_v32  ;;  %v2716_v40 = vmax.f32 %v2021_v43, 0.0  ;;  %v4580_v32 = vld [vmem:[#allocation5 + $0x364] sm:$0xf] }
 0x265   :  { %v5415_v36 = vadd.f32 %v2198_v13, %v2110_v8  ;;  %v2200_v11 = vpop.f32.mrf.mxu0  ;;  %v4255_v38 = vor.u32 %v4580_v32, %v4252_v22  ;;  %v6177_v32 = vld [vmem:[#allocation24_spill] sm:$0xff]  ;;  %v6178_v22 = vld [vmem:[#allocation25_spill] sm:$0xff] }
 0x267   :  { %2600 = vmatpush.bf16.msra.mxu1 %v4255_v38 }
 0x269   :  { %v2022_v19 = vpop.f32.mrf.mxu2 }
 0x26a   :  { %v2023_v34 = vadd.f32 %v2022_v19, %v1934_v7  ;;  %v2111_v52 = vpop.f32.mrf.mxu3 }
 0x26b   :  { %v1936_v28 = vpop.f32.mrf.mxu1  ;;  %v2112_v51 = vadd.f32 %v2111_v52, %v5284_v63 }
 0x26c   :  { %v2718_v37 = vmax.f32 %v2023_v34, 0.0  ;;  %v1937_v62 = vadd.f32 %v1936_v28, %v5171_v48 }
 0x26d   :  { %v5419_v12 = vadd.f32 %v2200_v11, %v2112_v51  ;;  %v2203_v53 = vpop.f32.mrf.mxu0 }
 0x26e   :  { %2251 = vmatmul.bf16.vlgmr.msrb.gmra.mxu1 %v6174_v1  ;;  %2340 = vmatmul.bf16.vlgmr.msrb.gmra.mxu2 %v6175_v46  ;;  %v5423_v13 = vpack.c.bf16 %v2718_v37, %v2716_v40 }
 0x26f   :  { %2429 = vmatmul.bf16.vlgmr.msrb.gmra.mxu3 %v6176_v25 }
 0x270   :  { %2518 = vmatmul.bf16.vlgmr.msrb.gmra.mxu0 %v5159_v15 }
 0x271   :  { %v2025_v43 = vpop.f32.mrf.mxu2 }
 0x272   :  { %v2026_v23 = vadd.f32 %v2025_v43, %v1937_v62  ;;  %v2114_v48 = vpop.f32.mrf.mxu3 }
 0x273   :  { %v1938_v47 = vpop.f32.mrf.mxu1  ;;  %v2115_v8 = vadd.f32 %v2114_v48, %v5284_v63 }
 0x274   :  { %v1939_v7 = vadd.f32 %v1938_v47, %v5178_v35  ;;  %v2720_v37 = vmax.f32 %v2026_v23, 0.0 }
 0x275   :  { %v5429_v11 = vadd.f32 %v2203_v53, %v2115_v8  ;;  %v2205_v19 = vpop.f32.mrf.mxu0  ;;  %v6179_v53 = vld [vmem:[#allocation26_spill] sm:$0xff] }
 0x279   :  { %v2027_v34 = vpop.f32.mrf.mxu2 }
 0x27a   :  { %v2028_v52 = vadd.f32 %v2027_v34, %v1939_v7  ;;  %v2116_v28 = vpop.f32.mrf.mxu3 }
 0x27b   :  { %v1941_v51 = vpop.f32.mrf.mxu1  ;;  %v2117_v40 = vadd.f32 %v2116_v28, %v5284_v63 }
 0x27c   :  { %v2722_v15 = vmax.f32 %v2028_v52, 0.0  ;;  %v1942_v1 = vadd.f32 %v1941_v51, %v5185_v61 }
 0x27d   :  { %v5433_v62 = vadd.f32 %v2205_v19, %v2117_v40  ;;  %v2208_v46 = vpop.f32.mrf.mxu0 }
 0x27e   :  { %2256 = vmatmul.bf16.gmra.mxu1 %v6177_v32  ;;  %2345 = vmatmul.bf16.gmra.mxu2 %v6178_v22  ;;  %v5437_v35 = vpack.c.bf16 %v2722_v15, %v2720_v37  ;;  %v6181_v32 = vld [vmem:[#allocation28_spill] sm:$0xff] }
 0x27f   :  { %2434 = vmatmul.bf16.gmra.mxu3 %v6179_v53  ;;  %v6182_v53 = vld [vmem:[#allocation29_spill] sm:$0xff] }
 0x280   :  { %2523 = vmatmul.bf16.gmra.mxu0 %v5173_v33 }
 0x281   :  { %v2030_v25 = vpop.f32.mrf.mxu2 }
 0x282   :  { %v2031_v38 = vadd.f32 %v2030_v25, %v1942_v1  ;;  %v2119_v43 = vpop.f32.mrf.mxu3  ;;  %v6180_v1 = vld [vmem:[#allocation27_spill] sm:$0xff] }
 0x283   :  { %v1943_v23 = vpop.f32.mrf.mxu1  ;;  %v2120_v48 = vadd.f32 %v2119_v43, %v5284_v63 }
 0x284   :  { %v1944_v61 = vadd.f32 %v1943_v23, %v5192_v16  ;;  %v2724_v51 = vmax.f32 %v2031_v38, 0.0  ;;  %v4578_v16 = vld [vmem:[#allocation5 + $0x354] sm:$0xf] }
 0x285   :  { %v5443_v47 = vadd.f32 %v2208_v46, %v2120_v48  ;;  %v2210_v8 = vpop.f32.mrf.mxu0  ;;  %v4244_v46 = vld [vmem:[#allocation5 + $0x358] sm:$0xf0] }
 0x286   :  { %v4247_v25 = vor.u32 %v4578_v16, %v4244_v46  ;;  %v6183_v16 = vld [vmem:[#allocation30_spill] sm:$0xff]  ;;  %v6184_v46 = vld [vmem:[#allocation31_spill] sm:$0xff] }
 0x288   :  { %2601 = vmatpush.bf16.msra.mxu1 %v4247_v25 }
 0x289   :  { %v2032_v7 = vpop.f32.mrf.mxu2 }
 0x28a   :  { %v2033_v19 = vadd.f32 %v2032_v7, %v1944_v61  ;;  %v2121_v34 = vpop.f32.mrf.mxu3 }
 0x28b   :  { %v1946_v52 = vpop.f32.mrf.mxu1  ;;  %v2122_v28 = vadd.f32 %v2121_v34, %v5284_v63 }
 0x28c   :  { %v2726_v40 = vmax.f32 %v2033_v19, 0.0  ;;  %v1947_v33 = vadd.f32 %v1946_v52, %v5199_v49 }
 0x28d   :  { %v5447_v37 = vadd.f32 %v2210_v8, %v2122_v28  ;;  %v2213_v15 = vpop.f32.mrf.mxu0 }
 0x28e   :  { %2261 = vmatmul.bf16.gmra.mxu1 %v6180_v1  ;;  %2350 = vmatmul.bf16.gmra.mxu2 %v6181_v32  ;;  %v5451_v22 = vpack.c.bf16 %v2726_v40, %v2724_v51 }
 0x28f   :  { %2439 = vmatmul.bf16.gmra.mxu3 %v6182_v53 }
 0x290   :  { %2528 = vmatmul.bf16.gmra.mxu0 %v5187_v29 }
 0x291   :  { %v2035_v38 = vpop.f32.mrf.mxu2 }
 0x292   :  { %v2036_v43 = vadd.f32 %v2035_v38, %v1947_v33  ;;  %v2124_v49 = vpop.f32.mrf.mxu3 }
 0x293   :  { %v1948_v23 = vpop.f32.mrf.mxu1  ;;  %v2125_v48 = vadd.f32 %v2124_v49, %v5284_v63 }
 0x294   :  { %v1949_v61 = vadd.f32 %v1948_v23, %v5206_v42  ;;  %v2728_v40 = vmax.f32 %v2036_v43, 0.0 }
 0x295   :  { %v5457_v8 = vadd.f32 %v2213_v15, %v2125_v48  ;;  %v2215_v7 = vpop.f32.mrf.mxu0  ;;  %v6185_v15 = vld [vmem:[#allocation32_spill] sm:$0xff] }
 0x299   :  { %v2037_v19 = vpop.f32.mrf.mxu2 }
 0x29a   :  { %v2038_v34 = vadd.f32 %v2037_v19, %v1949_v61  ;;  %v2126_v52 = vpop.f32.mrf.mxu3 }
 0x29b   :  { %v1951_v28 = vpop.f32.mrf.mxu1  ;;  %v2127_v51 = vadd.f32 %v2126_v52, %v5284_v63 }
 0x29c   :  { %v2730_v29 = vmax.f32 %v2038_v34, 0.0  ;;  %v1952_v1 = vadd.f32 %v1951_v28, %v5213_v21 }
 0x29d   :  { %v5461_v33 = vadd.f32 %v2215_v7, %v2127_v51  ;;  %v2218_v32 = vpop.f32.mrf.mxu0 }
 0x29e   :  { %2266 = vmatmul.bf16.gmra.mxu1 %v6183_v16  ;;  %2355 = vmatmul.bf16.gmra.mxu2 %v6184_v46  ;;  %v5465_v42 = vpack.c.bf16 %v2730_v29, %v2728_v40  ;;  %v6187_v16 = vld [vmem:[#allocation34_spill] sm:$0xff] }
 0x29f   :  { %2444 = vmatmul.bf16.gmra.mxu3 %v6185_v15  ;;  %v6188_v15 = vld [vmem:[#allocation35_spill] sm:$0xff] }
 0x2a0   :  { %2533 = vmatmul.bf16.gmra.mxu0 %v5201_v5 }
 0x2a1   :  { %v2040_v53 = vpop.f32.mrf.mxu2 }
 0x2a2   :  { %v2041_v25 = vadd.f32 %v2040_v53, %v1952_v1  ;;  %v2129_v38 = vpop.f32.mrf.mxu3  ;;  %v6186_v1 = vld [vmem:[#allocation33_spill] sm:$0xff] }
 0x2a3   :  { %v1953_v43 = vpop.f32.mrf.mxu1  ;;  %v2130_v49 = vadd.f32 %v2129_v38, %v5284_v63 }
 0x2a4   :  { %v1954_v21 = vadd.f32 %v1953_v43, %v5220_v9  ;;  %v2732_v28 = vmax.f32 %v2041_v25, 0.0  ;;  %v4576_v9 = vld [vmem:[#allocation5 + $0x344] sm:$0xf] }
 0x2a5   :  { %v5471_v23 = vadd.f32 %v2218_v32, %v2130_v49  ;;  %v2220_v48 = vpop.f32.mrf.mxu0  ;;  %v4236_v32 = vld [vmem:[#allocation5 + $0x348] sm:$0xf0] }
 0x2a6   :  { %v4239_v53 = vor.u32 %v4576_v9, %v4236_v32  ;;  %v6189_v9 = vld [vmem:[#allocation36_spill] sm:$0xff]  ;;  %v6190_v32 = vld [vmem:[#allocation37_spill] sm:$0xff] }
 0x2a8   :  { %2602 = vmatpush.bf16.msra.mxu1 %v4239_v53 }
 0x2a9   :  { %v2042_v61 = vpop.f32.mrf.mxu2 }
 0x2aa   :  { %v2043_v7 = vadd.f32 %v2042_v61, %v1954_v21  ;;  %v2131_v19 = vpop.f32.mrf.mxu3 }
 0x2ab   :  { %v1956_v34 = vpop.f32.mrf.mxu1  ;;  %v2132_v52 = vadd.f32 %v2131_v19, %v5284_v63 }
 0x2ac   :  { %v2734_v51 = vmax.f32 %v2043_v7, 0.0  ;;  %v1957_v5 = vadd.f32 %v1956_v34, %v5227_v41 }
 0x2ad   :  { %v5475_v40 = vadd.f32 %v2220_v48, %v2132_v52  ;;  %v2223_v29 = vpop.f32.mrf.mxu0 }
 0x2ae   :  { %2271 = vmatmul.bf16.gmra.mxu1 %v6186_v1  ;;  %2360 = vmatmul.bf16.gmra.mxu2 %v6187_v16  ;;  %v5479_v46 = vpack.c.bf16 %v2734_v51, %v2732_v28 }
 0x2af   :  { %2449 = vmatmul.bf16.gmra.mxu3 %v6188_v15 }
 0x2b0   :  { %2538 = vmatmul.bf16.gmra.mxu0 %v5215_v54 }
 0x2b1   :  { %v2045_v25 = vpop.f32.mrf.mxu2 }
 0x2b2   :  { %v2046_v38 = vadd.f32 %v2045_v25, %v1957_v5  ;;  %v2134_v41 = vpop.f32.mrf.mxu3 }
 0x2b3   :  { %v1958_v43 = vpop.f32.mrf.mxu1  ;;  %v2135_v49 = vadd.f32 %v2134_v41, %v5284_v63 }
 0x2b4   :  { %v1959_v21 = vadd.f32 %v1958_v43, %v5234_v3  ;;  %v2736_v51 = vmax.f32 %v2046_v38, 0.0 }
 0x2b5   :  { %v5485_v48 = vadd.f32 %v2223_v29, %v2135_v49  ;;  %v2225_v61 = vpop.f32.mrf.mxu0  ;;  %v6191_v29 = vld [vmem:[#allocation38_spill] sm:$0xff] }
 0x2b9   :  { %v2047_v7 = vpop.f32.mrf.mxu2 }
 0x2ba   :  { %v2048_v19 = vadd.f32 %v2047_v7, %v1959_v21  ;;  %v2136_v34 = vpop.f32.mrf.mxu3 }
 0x2bb   :  { %v1961_v52 = vpop.f32.mrf.mxu1  ;;  %v2137_v28 = vadd.f32 %v2136_v34, %v5284_v63 }
 0x2bc   :  { %v2738_v54 = vmax.f32 %v2048_v19, 0.0  ;;  %v1962_v1 = vadd.f32 %v1961_v52, %v5241_v2 }
 0x2bd   :  { %v5489_v5 = vadd.f32 %v2225_v61, %v2137_v28  ;;  %v2228_v16 = vpop.f32.mrf.mxu0 }
 0x2be   :  { %2276 = vmatmul.bf16.gmra.mxu1 %v6189_v9  ;;  %2365 = vmatmul.bf16.gmra.mxu2 %v6190_v32  ;;  %v5493_v3 = vpack.c.bf16 %v2738_v54, %v2736_v51  ;;  %v6193_v9 = vld [vmem:[#allocation42_spill] sm:$0xff] }
 0x2bf   :  { %2454 = vmatmul.bf16.gmra.mxu3 %v6191_v29  ;;  %v6194_v29 = vld [vmem:[#allocation43_spill] sm:$0xff] }
 0x2c0   :  { %2543 = vmatmul.bf16.gmra.mxu0 %v5229_v30 }
 0x2c1   :  { %v2050_v15 = vpop.f32.mrf.mxu2 }
 0x2c2   :  { %v2051_v53 = vadd.f32 %v2050_v15, %v1962_v1  ;;  %v2139_v25 = vpop.f32.mrf.mxu3  ;;  %v6192_v1 = vld [vmem:[#allocation40_spill] sm:$0xff] }
 0x2c3   :  { %v1963_v38 = vpop.f32.mrf.mxu1  ;;  %v2140_v41 = vadd.f32 %v2139_v25, %v5284_v63 }
 0x2c4   :  { %v1964_v2 = vadd.f32 %v1963_v38, %v5248_v18  ;;  %v2740_v52 = vmax.f32 %v2051_v53, 0.0  ;;  %v4574_v18 = vld [vmem:[#allocation5 + $0x334] sm:$0xf] }
 0x2c5   :  { %v5499_v43 = vadd.f32 %v2228_v16, %v2140_v41  ;;  %v2230_v49 = vpop.f32.mrf.mxu0  ;;  %v4228_v16 = vld [vmem:[#allocation5 + $0x338] sm:$0xf0] }
 0x2c6   :  { %v4231_v15 = vor.u32 %v4574_v18, %v4228_v16  ;;  %v6195_v18 = vld [vmem:[#allocation46_spill] sm:$0xff]  ;;  %v6196_v16 = vld [vmem:[#allocation48_spill] sm:$0xff] }
 0x2c8   :  { %2603 = vmatpush.bf16.msra.mxu1 %v4231_v15  ;;  %v6197_v15 = vld [vmem:[#allocation49_spill] sm:$0xff] }
 0x2c9   :  { %v2052_v21 = vpop.f32.mrf.mxu2 }
 0x2ca   :  { %v2053_v61 = vadd.f32 %v2052_v21, %v1964_v2  ;;  %v2141_v7 = vpop.f32.mrf.mxu3 }
 0x2cb   :  { %v1966_v19 = vpop.f32.mrf.mxu1  ;;  %v2142_v34 = vadd.f32 %v2141_v7, %v5284_v63 }
 0x2cc   :  { %v2742_v28 = vmax.f32 %v2053_v61, 0.0  ;;  %v1967_v30 = vadd.f32 %v1966_v19, %v5255_v6  ;;  %v4591_v61 = vld [vmem:[%s5957_s3 + $0x38] sm:$0xff] }
 0x2cd   :  { %v5503_v51 = vadd.f32 %v2230_v49, %v2142_v34  ;;  %v2233_v54 = vpop.f32.mrf.mxu0  ;;  %2916 = vmatpush.bf16.msra.mxu2 %v4591_v61  ;;  %v4599_v34 = vld [vmem:[%s5957_s3 + $0x78] sm:$0xff] }
 0x2ce   :  { %2281 = vmatmul.bf16.gmra.mxu1 %v6192_v1  ;;  %2370 = vmatmul.bf16.gmra.mxu2 %v6193_v9  ;;  %v5507_v32 = vpack.c.bf16 %v2742_v28, %v2740_v52 }
 0x2cf   :  { %2459 = vmatmul.bf16.gmra.mxu3 %v6194_v29 }
 0x2d0   :  { %2548 = vmatmul.bf16.gmra.mxu0 %v5243_v24  ;;  %3005 = vmatpush.bf16.msra.mxu3 %v4599_v34 }
 0x2d1   :  { %v2055_v53 = vpop.f32.mrf.mxu2 }
 0x2d2   :  { %v2056_v25 = vadd.f32 %v2055_v53, %v1967_v30  ;;  %v2144_v6 = vpop.f32.mrf.mxu3 }
 0x2d3   :  { %v1968_v38 = vpop.f32.mrf.mxu1  ;;  %v2145_v41 = vadd.f32 %v2144_v6, %v5284_v63 }
 0x2d4   :  { %v1969_v2 = vadd.f32 %v1968_v38, %v5262_v45  ;;  %v2744_v30 = vmax.f32 %v2056_v25, 0.0 }
 0x2d5   :  { %v5513_v49 = vadd.f32 %v2233_v54, %v2145_v41  ;;  %v2235_v21 = vpop.f32.mrf.mxu0 }
 0x2d9   :  { %v2057_v7 = vpop.f32.mrf.mxu2 }
 0x2da   :  { %v2058_v19 = vadd.f32 %v2057_v7, %v1969_v2  ;;  %v2146_v24 = vpop.f32.mrf.mxu3 }
 0x2db   :  { %v1971_v52 = vpop.f32.mrf.mxu1  ;;  %v2147_v28 = vadd.f32 %v2146_v24, %v5284_v63 }
 0x2dc   :  { %v2746_v45 = vmax.f32 %v2058_v19, 0.0  ;;  %v1972_v54 = vadd.f32 %v1971_v52, %v5269_v56 }
 0x2dd   :  { %v5523_v1 = vadd.f32 %v2235_v21, %v2147_v28  ;;  %v2238_v9 = vpop.f32.mrf.mxu0 }
 0x2de   :  { %2286 = vmatmul.bf16.gmra.mxu1 %v6195_v18  ;;  %2375 = vmatmul.bf16.gmra.mxu2 %v6196_v16  ;;  %v5527_v29 = vpack.c.bf16 %v2746_v45, %v2744_v30  ;;  %v6199_v18 = vld [vmem:[#allocation54_spill] sm:$0xff] }
 0x2df   :  { %2464 = vmatmul.bf16.gmra.mxu3 %v6197_v15  ;;  %v6200_v15 = vld [vmem:[#allocation55_spill] sm:$0xff] }
 0x2e0   :  { %2553 = vmatmul.bf16.gmra.mxu0 %v5257_v0 }
 0x2e1   :  { %v2060_v53 = vpop.f32.mrf.mxu2 }
 0x2e2   :  { %v2061_v6 = vadd.f32 %v2060_v53, %v1972_v54  ;;  %v2149_v25 = vpop.f32.mrf.mxu3  ;;  %v6198_v54 = vld [vmem:[#allocation52_spill] sm:$0xff] }
 0x2e3   :  { %v1973_v38 = vpop.f32.mrf.mxu1  ;;  %v2150_v56 = vadd.f32 %v2149_v25, %v5284_v63 }
 0x2e4   :  { %v1974_v41 = vadd.f32 %v1973_v38, %v5276_v27  ;;  %v2748_v52 = vmax.f32 %v2061_v6, 0.0  ;;  %v4572_v27 = vld [vmem:[#allocation5 + $0x324] sm:$0xf] }
 0x2e5   :  { %v5533_v2 = vadd.f32 %v2238_v9, %v2150_v56  ;;  %v2240_v21 = vpop.f32.mrf.mxu0  ;;  %v4220_v9 = vld [vmem:[#allocation5 + $0x328] sm:$0xf0] }
 0x2e6   :  { %v4223_v53 = vor.u32 %v4572_v27, %v4220_v9 }
 0x2e8   :  { %2604 = vmatpush.bf16.msra.mxu1 %v4223_v53 }
 0x2e9   :  { %v2062_v61 = vpop.f32.mrf.mxu2 }
 0x2ea   :  { %v2063_v7 = vadd.f32 %v2062_v61, %v1974_v41  ;;  %v2151_v19 = vpop.f32.mrf.mxu3  ;;  %v4590_v61 = vld [vmem:[%s5957_s3 + $0x30] sm:$0xff] }
 0x2eb   :  { %v2152_v24 = vadd.f32 %v2151_v19, %v5284_v63  ;;  %v2252_v34 = vpop.f32.mrf.mxu1  ;;  %2917 = vmatpush.bf16.msra.mxu2 %v4590_v61  ;;  %v6204_v61 = vld [vmem:[#allocation53_spill] sm:$0xff] }
 0x2ec   :  { %v2750_v28 = vmax.f32 %v2063_v7, 0.0  ;;  %v2253_v0 = vadd.f32 %v2252_v34, %v5289_v20 }
 0x2ed   :  { %v5537_v30 = vadd.f32 %v2240_v21, %v2152_v24  ;;  %v2519_v45 = vpop.f32.mrf.mxu0 }
 0x2ee   :  { %2291 = vmatmul.bf16.gmra.mxu1 %v6198_v54  ;;  %2380 = vmatmul.bf16.gmra.mxu2 %v6199_v18  ;;  %v5541_v16 = vpack.c.bf16 %v2750_v28, %v2748_v52  ;;  %v6202_v54 = vld [vmem:[#allocation58_spill] sm:$0xff]  ;;  %v6203_v18 = vld [vmem:[#allocation59_spill] sm:$0xff] }
 0x2ef   :  { %2469 = vmatmul.bf16.gmra.mxu3 %v6200_v15 }
 0x2f0   :  { %2558 = vmatmul.bf16.gmra.mxu0 %v5271_v57  ;;  %v4598_v57 = vld [vmem:[%s5957_s3 + $0x70] sm:$0xff] }
 0x2f1   :  { %v2341_v63 = vpop.f32.mrf.mxu2  ;;  %3006 = vmatpush.bf16.msra.mxu3 %v4598_v57 }
 0x2f2   :  { %v2342_v6 = vadd.f32 %v2341_v63, %v2253_v0  ;;  %v2430_v20 = vpop.f32.mrf.mxu3 }
 0x2f3   :  { %v2254_v25 = vpop.f32.mrf.mxu1 }
 0x2f4   :  { %v2255_v38 = vadd.f32 %v2254_v25, %v5297_v44  ;;  %v2431_v56 = vadd.f32 %v2430_v20, %v2342_v6 }
 0x2f5   :  { %v2521_v41 = vpop.f32.mrf.mxu0 }
 0x2f6   :  { %v5546_v21 = vadd.f32 %v2519_v45, %v2431_v56  ;;  %v6201_v45 = vld [vmem:[#allocation57_spill] sm:$0xff] }
 0x2f9   :  { %v2343_v7 = vpop.f32.mrf.mxu2 }
 0x2fa   :  { %v2344_v19 = vadd.f32 %v2343_v7, %v2255_v38  ;;  %v2432_v24 = vpop.f32.mrf.mxu3 }
 0x2fb   :  { %v2257_v34 = vpop.f32.mrf.mxu1 }
 0x2fc   :  { %v2258_v52 = vadd.f32 %v2257_v34, %v5307_v55  ;;  %v2433_v44 = vadd.f32 %v2432_v24, %v2344_v19  ;;  %v6206_v34 = vld [vmem:[#allocation62_spill] sm:$0xff] }
 0x2fd   :  { %v2524_v28 = vpop.f32.mrf.mxu0 }
 0x2fe   :  { %v5555_v0 = vadd.f32 %v2521_v41, %v2433_v44  ;;  %2296 = vmatmul.bf16.gmra.mxu1 %v6201_v45  ;;  %2385 = vmatmul.bf16.gmra.mxu2 %v6202_v54  ;;  %v6207_v44 = vld [vmem:[#allocation63_spill] sm:$0xff]  ;;  %v6208_v45 = vld [vmem:[#allocation50_spill] sm:$0xff] }
 0x2ff   :  { %2474 = vmatmul.bf16.gmra.mxu3 %v6203_v18 }
 0x300   :  { %2563 = vmatmul.bf16.gmra.mxu0 %v5291_v50  ;;  %v6205_v50 = vld [vmem:[#allocation61_spill] sm:$0xff] }
 0x301   :  { %v2346_v27 = vpop.f32.mrf.mxu2 }
 0x302   :  { %v2347_v9 = vadd.f32 %v2346_v27, %v2258_v52  ;;  %v2435_v15 = vpop.f32.mrf.mxu3  ;;  %v4570_v52 = vld [vmem:[#allocation5 + $0x314] sm:$0xf] }
 0x303   :  { %v2259_v53 = vpop.f32.mrf.mxu1 }
 0x304   :  { %v2260_v63 = vadd.f32 %v2259_v53, %v5315_v4  ;;  %v2436_v55 = vadd.f32 %v2435_v15, %v2347_v9  ;;  %v4212_v4 = vld [vmem:[#allocation5 + $0x318] sm:$0xf0]  ;;  %v6209_v15 = vld [vmem:[#allocation51_spill] sm:$0xff] }
 0x305   :  { %v2526_v6 = vpop.f32.mrf.mxu0 }
 0x306   :  { %v5562_v20 = vadd.f32 %v2524_v28, %v2436_v55  ;;  %v4215_v28 = vor.u32 %v4570_v52, %v4212_v4  ;;  %v6211_v52 = vld [vmem:[#allocation65_spill] sm:$0xff]  ;;  %v6212_v4 = vld [vmem:[#allocation66_spill] sm:$0xff] }
 0x308   :  { %2605 = vmatpush.bf16.msra.mxu1 %v4215_v28  ;;  %v6214_v28 = vld [vmem:[#allocation56_spill] sm:$0xff] }
 0x309   :  { %v2348_v25 = vpop.f32.mrf.mxu2 }
 0x30a   :  { %v2349_v38 = vadd.f32 %v2348_v25, %v2260_v63  ;;  %v2437_v56 = vpop.f32.mrf.mxu3 }
 0x30b   :  { %v2262_v41 = vpop.f32.mrf.mxu1 }
 0x30c   :  { %v2263_v7 = vadd.f32 %v2262_v41, %v6204_v61  ;;  %v2438_v19 = vadd.f32 %v2437_v56, %v2349_v38  ;;  %v4597_v61 = vld [vmem:[%s5957_s3 + $0x68] sm:$0xff] }
 0x30d   :  { %v2529_v24 = vpop.f32.mrf.mxu0  ;;  %3007 = vmatpush.bf16.msra.mxu3 %v4597_v61 }
 0x30e   :  { %v5565_v57 = vadd.f32 %v2526_v6, %v2438_v19  ;;  %2301 = vmatmul.bf16.gmra.mxu1 %v6205_v50  ;;  %2390 = vmatmul.bf16.gmra.mxu2 %v6206_v34  ;;  %v4589_v6 = vld [vmem:[%s5957_s3 + $0x28] sm:$0xff] }
 0x30f   :  { %2479 = vmatmul.bf16.gmra.mxu3 %v6207_v44  ;;  %2918 = vmatpush.bf16.msra.mxu2 %v4589_v6  ;;  %v6210_v19 = vld [vmem:[#allocation64_spill] sm:$0xff]  ;;  %v6213_v44 = vld [vmem:[#allocation67_spill] sm:$0xff] }
 0x310   :  { %2568 = vmatmul.bf16.gmra.mxu0 %v6208_v45 }
 0x311   :  { %v2351_v54 = vpop.f32.mrf.mxu2 }
 0x312   :  { %v2352_v18 = vadd.f32 %v2351_v54, %v2263_v7  ;;  %v2440_v27 = vpop.f32.mrf.mxu3 }
 0x313   :  { %v2264_v9 = vpop.f32.mrf.mxu1 }
 0x314   :  { %v2265_v53 = vadd.f32 %v2264_v9, %v6209_v15  ;;  %v2441_v63 = vadd.f32 %v2440_v27, %v2352_v18  ;;  %v6215_v15 = vld [vmem:[#allocation19_spill] sm:$0xff] }
 0x315   :  { %v2531_v25 = vpop.f32.mrf.mxu0 }
 0x316   :  { %v5572_v55 = vadd.f32 %v2529_v24, %v2441_v63 }
 0x319   :  { %v2353_v38 = vpop.f32.mrf.mxu2 }
 0x31a   :  { %v2354_v56 = vadd.f32 %v2353_v38, %v2265_v53  ;;  %v2442_v41 = vpop.f32.mrf.mxu3 }
 0x31b   :  { %v2267_v7 = vpop.f32.mrf.mxu1 }
 0x31c   :  { %v2268_v50 = vadd.f32 %v2267_v7, %v6210_v19  ;;  %v2443_v34 = vadd.f32 %v2442_v41, %v2354_v56  ;;  %v6216_v7 = vld [vmem:[#allocation12_spill] sm:$0xff] }
 0x31d   :  { %v2534_v54 = vpop.f32.mrf.mxu0 }
 0x31e   :  { %v5581_v24 = vadd.f32 %v2531_v25, %v2443_v34  ;;  %2306 = vmatmul.bf16.gmra.mxu1 %v6211_v52  ;;  %2395 = vmatmul.bf16.gmra.mxu2 %v6212_v4  ;;  %v6217_v4 = vld [vmem:[#allocation69_spill] sm:$0xff] }
 0x31f   :  { %2484 = vmatmul.bf16.gmra.mxu3 %v6213_v44  ;;  %v4568_v44 = vld [vmem:[#allocation5 + $0x304] sm:$0xf] }
 0x320   :  { %2573 = vmatmul.bf16.gmra.mxu0 %v6214_v28  ;;  %v4204_v28 = vld [vmem:[#allocation5 + $0x308] sm:$0xf0] }
 0x321   :  { %v2356_v45 = vpop.f32.mrf.mxu2 }
 0x322   :  { %v2357_v18 = vadd.f32 %v2356_v45, %v2268_v50  ;;  %v2445_v27 = vpop.f32.mrf.mxu3  ;;  %v6218_v50 = vld [vmem:[#allocation70_spill] sm:$0xff]  ;;  %v6219_v45 = vld [vmem:[#allocation71_spill] sm:$0xff] }
 0x323   :  { %v2269_v9 = vpop.f32.mrf.mxu1 }
 0x324   :  { %v2270_v53 = vadd.f32 %v2269_v9, %v6215_v15  ;;  %v2446_v63 = vadd.f32 %v2445_v27, %v2357_v18  ;;  %v6220_v18 = vld [vmem:[#allocation16_spill] sm:$0xff] }
 0x325   :  { %v2536_v61 = vpop.f32.mrf.mxu0 }
 0x326   :  { %v5588_v6 = vadd.f32 %v2534_v54, %v2446_v63  ;;  %v4207_v54 = vor.u32 %v4568_v44, %v4204_v28  ;;  %v6221_v63 = vld [vmem:[#allocation78_spill] sm:$0xff] }
 0x327   :  { %v4587_v44 = vld [vmem:[%s5957_s3 + $0x18] sm:$0xff] }
 0x328   :  { %2606 = vmatpush.bf16.msra.mxu1 %v4207_v54  ;;  %v6223_v28 = vld [vmem:[#allocation74_spill] sm:$0xff]  ;;  %v6225_v54 = vld [vmem:[#allocation76_spill] sm:$0xff] }
 0x329   :  { %v2358_v25 = vpop.f32.mrf.mxu2 }
 0x32a   :  { %v2359_v38 = vadd.f32 %v2358_v25, %v2270_v53  ;;  %v2447_v56 = vpop.f32.mrf.mxu3 }
 0x32b   :  { %v2272_v41 = vpop.f32.mrf.mxu1 }
 0x32c   :  { %v2273_v19 = vadd.f32 %v2272_v41, %v6216_v7  ;;  %v2448_v34 = vadd.f32 %v2447_v56, %v2359_v38  ;;  %v4588_v56 = vld [vmem:[%s5957_s3 + $0x20] sm:$0xff] }
 0x32d   :  { %2919 = vmatpush.bf16.msra.mxu2 %v4588_v56 }
 0x32e   :  { %v5591_v52 = vadd.f32 %v2536_v61, %v2448_v34  ;;  %2311 = vmatmul.bf16.gmra.mxu1 %v6217_v4  ;;  %2400 = vmatmul.bf16.gmra.mxu2 %v6218_v50  ;;  %v6222_v4 = vld [vmem:[#allocation14_spill] sm:$0xff] }
 0x32f   :  { %2489 = vmatmul.bf16.gmra.mxu3 %v6219_v45  ;;  %v6224_v45 = vld [vmem:[#allocation75_spill] sm:$0xff] }
 0x330   :  { %2578 = vmatmul.bf16.gmra.mxu0 %v6220_v18  ;;  %v6226_v18 = vld [vmem:[#allocation68_spill] sm:$0xff] }
 0x331   :  { %v2361_v27 = vpop.f32.mrf.mxu2  ;;  %2920 = vmatpush.bf16.msra.mxu2 %v4587_v44 }
 0x332   :  { %v2362_v9 = vadd.f32 %v2361_v27, %v2273_v19  ;;  %v2450_v15 = vpop.f32.mrf.mxu3  ;;  %v4596_v19 = vld [vmem:[%s5957_s3 + $0x60] sm:$0xff] }
 0x333   :  { %v2274_v53 = vpop.f32.mrf.mxu1  ;;  %3008 = vmatpush.bf16.msra.mxu3 %v4596_v19 }
 0x334   :  { %v2275_v25 = vadd.f32 %v2274_v53, %v6221_v63  ;;  %v5598_v38 = vadd.f32 %v2450_v15, %v2362_v9  ;;  %v4586_v9 = vld [vmem:[%s5957_s3 + $0x10] sm:$0xff] }
 0x335   :  { %2921 = vmatpush.bf16.msra.mxu2 %v4586_v9 }
 0x339   :  { %v2363_v41 = vpop.f32.mrf.mxu2 }
 0x33a   :  { %v5603_v61 = vadd.f32 %v2363_v41, %v2275_v25  ;;  %v5605_v7 = vpop.f32.mrf.mxu3  ;;  %v4585_v41 = vld [vmem:[%s5957_s3 + $0x8] sm:$0xff] }
 0x33b   :  { %v2277_v34 = vpop.f32.mrf.mxu1  ;;  %2922 = vmatpush.bf16.msra.mxu2 %v4585_v41 }
 0x33c   :  { %v2278_v50 = vadd.f32 %v2277_v34, %v6222_v4  ;;  %v4584_v34 = vld [vmem:[%s5957_s3] sm:$0xff] }
 0x33e   :  { %2316 = vmatmul.bf16.gmra.mxu1 %v6223_v28  ;;  %2405 = vmatmul.bf16.gmra.mxu2 %v6224_v45  ;;  %v6227_v28 = vld [vmem:[#allocation79_spill] sm:$0xff]  ;;  %v6228_v45 = vld [vmem:[#allocation80_spill] sm:$0xff] }
 0x33f   :  { %2494 = vmatmul.bf16.gmra.mxu3 %v6225_v54  ;;  %2923 = vmatpush.bf16.msra.mxu2 %v4584_v34  ;;  %v6229_v54 = vld [vmem:[#allocation81_spill] sm:$0xff] }
 0x340   :  { %2583 = vmatmul.bf16.gmra.mxu0 %v6226_v18 }
 0x341   :  { %v2366_v27 = vpop.f32.mrf.mxu2 }
 0x342   :  { %v2367_v15 = vadd.f32 %v2366_v27, %v2278_v50  ;;  %v2455_v53 = vpop.f32.mrf.mxu3 }
 0x343   :  { %v2279_v63 = vpop.f32.mrf.mxu1 }
 0x344   :  { %v2280_v25 = vadd.f32 %v2279_v63, %v5387_v58  ;;  %v5622_v56 = vadd.f32 %v2455_v53, %v2367_v15 }
 0x349   :  { %v2368_v19 = vpop.f32.mrf.mxu2 }
 0x34a   :  { %v5630_v4 = vadd.f32 %v2368_v19, %v2280_v25  ;;  %v5632_v50 = vpop.f32.mrf.mxu3  ;;  %v4595_v19 = vld [vmem:[%s5957_s3 + $0x58] sm:$0xff] }
 0x34b   :  { %v2282_v44 = vpop.f32.mrf.mxu1  ;;  %3009 = vmatpush.bf16.msra.mxu3 %v4595_v19 }
 0x34c   :  { %v2283_v58 = vadd.f32 %v2282_v44, %v5397_v26  ;;  %v6230_v44 = vld [vmem:[#allocation82_spill] sm:$0xff] }
 0x34e   :  { %2321 = vmatmul.bf16.gmra.mxu1 %v6227_v28  ;;  %2410 = vmatmul.bf16.gmra.mxu2 %v6228_v45 }
 0x34f   :  { %2499 = vmatmul.bf16.gmra.mxu3 %v6229_v54 }
 0x350   :  { %2588 = vmatmul.bf16.gmra.mxu0 %v5381_v39 }
 0x351   :  { %v2371_v18 = vpop.f32.mrf.mxu2 }
 0x352   :  { %v2372_v27 = vadd.f32 %v2371_v18, %v2283_v58  ;;  %v2460_v9 = vpop.f32.mrf.mxu3  ;;  %v6231_v58 = vld [vmem:[#allocation83_spill] sm:$0xff] }
 0x353   :  { %v2284_v15 = vpop.f32.mrf.mxu1 }
 0x354   :  { %v2285_v53 = vadd.f32 %v2284_v15, %v5405_v59  ;;  %v5640_v63 = vadd.f32 %v2460_v9, %v2372_v27  ;;  %v6232_v59 = vld [vmem:[#allocation84_spill] sm:$0xff] }
 0x359   :  { %v2373_v25 = vpop.f32.mrf.mxu2 }
 0x35a   :  { %v5642_v41 = vadd.f32 %v2373_v25, %v2285_v53  ;;  %v5644_v26 = vpop.f32.mrf.mxu3 }
 0x35b   :  { %v2287_v34 = vpop.f32.mrf.mxu1 }
 0x35c   :  { %v2288_v39 = vadd.f32 %v2287_v34, %v5415_v36  ;;  %v6233_v34 = vld [vmem:[#allocation85_spill] sm:$0xff] }
 0x35e   :  { %2326 = vmatmul.bf16.gmra.mxu1 %v6230_v44  ;;  %2415 = vmatmul.bf16.gmra.mxu2 %v6231_v58 }
 0x35f   :  { %2504 = vmatmul.bf16.gmra.mxu3 %v6232_v59 }
 0x360   :  { %2593 = vmatmul.bf16.gmra.mxu0 %v5399_v60  ;;  %v4603_v60 = vld [vmem:[%s5959_s5 + $0x18] sm:$0xff] }
 0x361   :  { %v2376_v28 = vpop.f32.mrf.mxu2  ;;  %3231 = vmatpush.bf16.msra.mxu0 %v4603_v60  ;;  %v6237_v60 = vld [vmem:[#allocation45_spill] sm:$0xff] }
 0x362   :  { %v2377_v45 = vadd.f32 %v2376_v28, %v2288_v39  ;;  %v2465_v54 = vpop.f32.mrf.mxu3  ;;  %v6234_v39 = vld [vmem:[#allocation47_spill] sm:$0xff] }
 0x363   :  { %v2289_v18 = vpop.f32.mrf.mxu1 }
 0x364   :  { %v2290_v27 = vadd.f32 %v2289_v18, %v5419_v12  ;;  %v5655_v9 = vadd.f32 %v2465_v54, %v2377_v45 }
 0x369   :  { %v2378_v15 = vpop.f32.mrf.mxu2 }
 0x36a   :  { %v5657_v53 = vadd.f32 %v2378_v15, %v2290_v27  ;;  %v5659_v36 = vpop.f32.mrf.mxu3  ;;  %v4594_v27 = vld [vmem:[%s5957_s3 + $0x50] sm:$0xff] }
 0x36b   :  { %v2292_v25 = vpop.f32.mrf.mxu1  ;;  %3010 = vmatpush.bf16.msra.mxu3 %v4594_v27  ;;  %v6238_v27 = vld [vmem:[#allocation87_spill] sm:$0xff] }
 0x36c   :  { %v2293_v19 = vadd.f32 %v2292_v25, %v5429_v11 }
 0x36e   :  { %2607 = vmatmul.bf16.vlgmr.msra.gmra.mxu1 %v6233_v34  ;;  %2924 = vmatmul.bf16.vlgmr.msra.gmra.mxu2 %v6234_v39 }
 0x371   :  { %v2381_v12 = vpop.f32.mrf.mxu2 }
 0x372   :  { %v2382_v44 = vadd.f32 %v2381_v12, %v2293_v19  ;;  %v2470_v58 = vpop.f32.mrf.mxu3  ;;  %v6236_v19 = vld [vmem:[#allocation86_spill] sm:$0xff] }
 0x373   :  { %v2294_v59 = vpop.f32.mrf.mxu1 }
 0x374   :  { %v2295_v28 = vadd.f32 %v2294_v59, %v5433_v62  ;;  %v5668_v45 = vadd.f32 %v2470_v58, %v2382_v44 }
 0x376   :  { %6235 = vst [vmem:[#allocation73_spill] sm:$0xff] %v5668_v45 }
 0x379   :  { %v2383_v54 = vpop.f32.mrf.mxu2 }
 0x37a   :  { %v5670_v18 = vadd.f32 %v2383_v54, %v2295_v28  ;;  %v5672_v11 = vpop.f32.mrf.mxu3 }
 0x37b   :  { %v2297_v15 = vpop.f32.mrf.mxu1 }
 0x37c   :  { %v2298_v25 = vadd.f32 %v2297_v15, %v5443_v47  ;;  %v6239_v15 = vld [vmem:[#allocation13_spill] sm:$0xff] }
 0x37e   :  { %2612 = vmatmul.bf16.gmra.mxu1 %v6236_v19  ;;  %2929 = vmatmul.bf16.gmra.mxu2 %v6237_v60 }
 0x381   :  { %v2386_v62 = vpop.f32.mrf.mxu2 }
 0x382   :  { %v2387_v34 = vadd.f32 %v2386_v62, %v2298_v25  ;;  %v2475_v39 = vpop.f32.mrf.mxu3 }
 0x383   :  { %v2299_v12 = vpop.f32.mrf.mxu1 }
 0x384   :  { %v2300_v44 = vadd.f32 %v2299_v12, %v5447_v37  ;;  %v5681_v58 = vadd.f32 %v2475_v39, %v2387_v34 }
 0x389   :  { %v2388_v59 = vpop.f32.mrf.mxu2 }
 0x38a   :  { %v5683_v28 = vadd.f32 %v2388_v59, %v2300_v44  ;;  %v5685_v54 = vpop.f32.mrf.mxu3 }
 0x38b   :  { %v2302_v45 = vpop.f32.mrf.mxu1 }
 0x38c   :  { %v2303_v47 = vadd.f32 %v2302_v45, %v5457_v8  ;;  %v4593_v8 = vld [vmem:[%s5957_s3 + $0x48] sm:$0xff] }
 0x38d   :  { %3011 = vmatpush.bf16.msra.mxu3 %v4593_v8  ;;  %v4602_v8 = vld [vmem:[%s5959_s5 + $0x10] sm:$0xff] }
 0x38e   :  { %2617 = vmatmul.bf16.gmra.mxu1 %v6238_v27  ;;  %2934 = vmatmul.bf16.gmra.mxu2 %v6239_v15  ;;  %v6243_v27 = vld [vmem:[#allocation72_spill] sm:$0xff] }
 0x38f   :  { %3232 = vmatpush.bf16.msra.mxu0 %v4602_v8 }
 0x391   :  { %v2391_v19 = vpop.f32.mrf.mxu2 }
 0x392   :  { %v2392_v25 = vadd.f32 %v2391_v19, %v2303_v47  ;;  %v2480_v60 = vpop.f32.mrf.mxu3  ;;  %v6242_v47 = vld [vmem:[#allocation88_spill] sm:$0xff] }
 0x393   :  { %v2304_v62 = vpop.f32.mrf.mxu1 }
 0x394   :  { %v2305_v37 = vadd.f32 %v2304_v62, %v5461_v33  ;;  %v5691_v34 = vadd.f32 %v2480_v60, %v2392_v25 }
 0x396   :  { %6240 = vst [vmem:[#allocation17_spill] sm:$0xff] %v5691_v34 }
 0x399   :  { %v2393_v39 = vpop.f32.mrf.mxu2 }
 0x39a   :  { %v5693_v12 = vadd.f32 %v2393_v39, %v2305_v37  ;;  %v5695_v44 = vpop.f32.mrf.mxu3 }
 0x39b   :  { %6241 = vst [vmem:[#allocation20_spill] sm:$0xff] %v5695_v44  ;;  %v2307_v45 = vpop.f32.mrf.mxu1 }
 0x39c   :  { %v2308_v59 = vadd.f32 %v2307_v45, %v5471_v23  ;;  %v6244_v45 = vld [vmem:[#allocation89_spill] sm:$0xff] }
 0x39e   :  { %2622 = vmatmul.bf16.gmra.mxu1 %v6242_v47  ;;  %2939 = vmatmul.bf16.gmra.mxu2 %v6243_v27 }
 0x3a1   :  { %v2396_v33 = vpop.f32.mrf.mxu2 }
 0x3a2   :  { %v2397_v15 = vadd.f32 %v2396_v33, %v2308_v59  ;;  %v2485_v19 = vpop.f32.mrf.mxu3  ;;  %v6245_v59 = vld [vmem:[#allocation91_spill] sm:$0xff] }
 0x3a3   :  { %v2309_v25 = vpop.f32.mrf.mxu1 }
 0x3a4   :  { %v2310_v60 = vadd.f32 %v2309_v25, %v5475_v40  ;;  %v5704_v62 = vadd.f32 %v2485_v19, %v2397_v15 }
 0x3a9   :  { %v2398_v37 = vpop.f32.mrf.mxu2 }
 0x3aa   :  { %v5706_v39 = vadd.f32 %v2398_v37, %v2310_v60  ;;  %v5708_v34 = vpop.f32.mrf.mxu3 }
 0x3ab   :  { %v2312_v44 = vpop.f32.mrf.mxu1 }
 0x3ac   :  { %v2313_v23 = vadd.f32 %v2312_v44, %v5485_v48  ;;  %v4592_v44 = vld [vmem:[%s5957_s3 + $0x40] sm:$0xff] }
 0x3ad   :  { %3012 = vmatpush.bf16.msra.mxu3 %v4592_v44  ;;  %v6248_v44 = vld [vmem:[#allocation41_spill] sm:$0xff] }
 0x3ae   :  { %2627 = vmatmul.bf16.gmra.mxu1 %v6244_v45  ;;  %2944 = vmatmul.bf16.gmra.mxu2 %v6245_v59 }
 0x3b1   :  { %v2401_v40 = vpop.f32.mrf.mxu2 }
 0x3b2   :  { %v2402_v47 = vadd.f32 %v2401_v40, %v2313_v23  ;;  %v2490_v27 = vpop.f32.mrf.mxu3  ;;  %v6247_v23 = vld [vmem:[#allocation90_spill] sm:$0xff] }
 0x3b3   :  { %v2314_v33 = vpop.f32.mrf.mxu1 }
 0x3b4   :  { %v2315_v15 = vadd.f32 %v2314_v33, %v5489_v5  ;;  %v5717_v19 = vadd.f32 %v2490_v27, %v2402_v47 }
 0x3b6   :  { %6246 = vst [vmem:[#allocation21_spill] sm:$0xff] %v5717_v19 }
 0x3b9   :  { %v2403_v25 = vpop.f32.mrf.mxu2 }
 0x3ba   :  { %v5719_v60 = vadd.f32 %v2403_v25, %v2315_v15  ;;  %v5721_v48 = vpop.f32.mrf.mxu3 }
 0x3bb   :  { %v2317_v37 = vpop.f32.mrf.mxu1 }
 0x3bc   :  { %v2318_v8 = vadd.f32 %v2317_v37, %v5499_v43 }
 0x3be   :  { %2632 = vmatmul.bf16.gmra.mxu1 %v6247_v23  ;;  %2949 = vmatmul.bf16.gmra.mxu2 %v5391_v31 }
 0x3c1   :  { %v2406_v5 = vpop.f32.mrf.mxu2 }
 0x3c2   :  { %v2407_v45 = vadd.f32 %v2406_v5, %v2318_v8  ;;  %v2495_v59 = vpop.f32.mrf.mxu3 }
 0x3c3   :  { %v2319_v40 = vpop.f32.mrf.mxu1 }
 0x3c4   :  { %v2320_v47 = vadd.f32 %v2319_v40, %v5503_v51  ;;  %v5730_v27 = vadd.f32 %v2495_v59, %v2407_v45 }
 0x3c9   :  { %v2408_v33 = vpop.f32.mrf.mxu2 }
 0x3ca   :  { %v5732_v15 = vadd.f32 %v2408_v33, %v2320_v47  ;;  %v5734_v25 = vpop.f32.mrf.mxu3 }
 0x3cb   :  { %v2322_v19 = vpop.f32.mrf.mxu1 }
 0x3cc   :  { %v2323_v43 = vadd.f32 %v2322_v19, %v5513_v49  ;;  %v6249_v19 = vld [vmem:[#allocation44_spill] sm:$0xff] }
 0x3ce   :  { %2637 = vmatmul.bf16.gmra.mxu1 %v6248_v44  ;;  %2954 = vmatmul.bf16.gmra.mxu2 %v5409_v17 }
 0x3d1   :  { %v2411_v31 = vpop.f32.mrf.mxu2 }
 0x3d2   :  { %v2412_v37 = vadd.f32 %v2411_v31, %v2323_v43  ;;  %v2500_v8 = vpop.f32.mrf.mxu3 }
 0x3d3   :  { %v2324_v23 = vpop.f32.mrf.mxu1 }
 0x3d4   :  { %v2325_v51 = vadd.f32 %v2324_v23, %v5523_v1  ;;  %v5740_v5 = vadd.f32 %v2500_v8, %v2412_v37 }
 0x3d9   :  { %v2413_v45 = vpop.f32.mrf.mxu2 }
 0x3da   :  { %v5742_v59 = vadd.f32 %v2413_v45, %v2325_v51  ;;  %v5744_v40 = vpop.f32.mrf.mxu3  ;;  %v6250_v51 = vld [vmem:[#allocation15_spill] sm:$0xff] }
 0x3db   :  { %v2327_v47 = vpop.f32.mrf.mxu1 }
 0x3dc   :  { %v2328_v49 = vadd.f32 %v2327_v47, %v5533_v2 }
 0x3de   :  { %2642 = vmatmul.bf16.gmra.mxu1 %v6249_v19  ;;  %2959 = vmatmul.bf16.gmra.mxu2 %v5423_v13  ;;  %v4601_v13 = vld [vmem:[%s5959_s5 + $0x8] sm:$0xff] }
 0x3df   :  { %3233 = vmatpush.bf16.msra.mxu0 %v4601_v13 }
 0x3e1   :  { %v2416_v17 = vpop.f32.mrf.mxu2 }
 0x3e2   :  { %v2417_v33 = vadd.f32 %v2416_v17, %v2328_v49  ;;  %v2505_v43 = vpop.f32.mrf.mxu3  ;;  %v2539_v17 = vpop.f32.mrf.mxu0 }
 0x3e3   :  { %v2329_v44 = vpop.f32.mrf.mxu1 }
 0x3e4   :  { %v2330_v1 = vadd.f32 %v2329_v44, %v5537_v30  ;;  %v5750_v31 = vadd.f32 %v2505_v43, %v2417_v33  ;;  %v6251_v43 = vld [vmem:[#allocation39_spill] sm:$0xff] }
 0x3e9   :  { %v2418_v37 = vpop.f32.mrf.mxu2 }
 0x3ea   :  { %v5752_v8 = vadd.f32 %v2418_v37, %v2330_v1  ;;  %v2541_v44 = vpop.f32.mrf.mxu0 }
 0x3eb   :  { %v2608_v23 = vpop.f32.mrf.mxu1 }
 0x3ec   :  { %v2609_v2 = vadd.f32 %v2608_v23, %v5546_v21 }
 0x3ee   :  { %2647 = vmatmul.bf16.gmra.mxu1 %v6250_v51  ;;  %2964 = vmatmul.bf16.gmra.mxu2 %v5437_v35  ;;  %v2689_v47 = vmax.f32 %v2609_v2, 0.0  ;;  %v6252_v2 = vld [vmem:[#allocation18_spill] sm:$0xff] }
 0x3f2   :  { %v2544_v13 = vpop.f32.mrf.mxu0 }
 0x3f3   :  { %v2610_v45 = vpop.f32.mrf.mxu1 }
 0x3f4   :  { %v2611_v30 = vadd.f32 %v2610_v45, %v5555_v0 }
 0x3f6   :  { %v2691_v49 = vmax.f32 %v2611_v30, 0.0 }
 0x3f8   :  { %v2753_v19 = vpack.c.bf16 %v2691_v49, %v2689_v47 }
 0x3fa   :  { %3013 = vmatmul.bf16.vlgmr.msra.gmra.mxu3 %v2753_v19  ;;  %v2546_v49 = vpop.f32.mrf.mxu0  ;;  %v5769_v19 = vpop.f32.mrf.mxu2 }
 0x3fb   :  { %v2613_v33 = vpop.f32.mrf.mxu1 }
 0x3fc   :  { %v2614_v35 = vadd.f32 %v2613_v33, %v5562_v20 }
 0x3fe   :  { %2652 = vmatmul.bf16.gmra.mxu1 %v6251_v43  ;;  %2969 = vmatmul.bf16.gmra.mxu2 %v5451_v22  ;;  %v2693_v21 = vmax.f32 %v2614_v35, 0.0  ;;  %v6253_v43 = vld [vmem:[#allocation11_spill] sm:$0xff] }
 0x402   :  { %v2549_v35 = vpop.f32.mrf.mxu0 }
 0x403   :  { %v2615_v1 = vpop.f32.mrf.mxu1 }
 0x404   :  { %v2616_v37 = vadd.f32 %v2615_v1, %v5565_v57  ;;  %v5773_v1 = vpop.f32.mrf.mxu2 }
 0x406   :  { %v2695_v23 = vmax.f32 %v2616_v37, 0.0 }
 0x408   :  { %v2755_v51 = vpack.c.bf16 %v2695_v23, %v2693_v21 }
 0x40a   :  { %3018 = vmatmul.bf16.gmra.mxu3 %v2755_v51  ;;  %v2551_v51 = vpop.f32.mrf.mxu0 }
 0x40b   :  { %v2618_v0 = vpop.f32.mrf.mxu1 }
 0x40c   :  { %v2619_v45 = vadd.f32 %v2618_v0, %v5572_v55 }
 0x40e   :  { %2657 = vmatmul.bf16.gmra.mxu1 %v6252_v2  ;;  %2974 = vmatmul.bf16.gmra.mxu2 %v5465_v42  ;;  %v2697_v20 = vmax.f32 %v2619_v45, 0.0  ;;  %v5777_v2 = vpop.f32.mrf.mxu2  ;;  %v2453_v45 = vadd.f32 %v5605_v7, %v5603_v61 }
 0x413   :  { %v2620_v30 = vpop.f32.mrf.mxu1 }
 0x414   :  { %v2621_v22 = vadd.f32 %v2620_v30, %v5581_v24  ;;  %v2542_v30 = vadd.f32 %v2541_v44, %v2453_v45 }
 0x416   :  { %v2699_v47 = vmax.f32 %v2621_v22, 0.0 }
 0x418   :  { %v2757_v57 = vpack.c.bf16 %v2699_v47, %v2697_v20 }
 0x41a   :  { %3023 = vmatmul.bf16.gmra.mxu3 %v2757_v57  ;;  %v2554_v57 = vpop.f32.mrf.mxu0 }
 0x41b   :  { %v2623_v33 = vpop.f32.mrf.mxu1 }
 0x41c   :  { %v2624_v42 = vadd.f32 %v2623_v33, %v5588_v6  ;;  %v4600_v6 = vld [vmem:[%s5959_s5] sm:$0xff]  ;;  %v5787_v33 = vpop.f32.mrf.mxu2 }
 0x41d   :  { %3234 = vmatpush.bf16.msra.mxu0 %v4600_v6 }
 0x41e   :  { %2662 = vmatmul.bf16.gmra.mxu1 %v6253_v43  ;;  %2979 = vmatmul.bf16.gmra.mxu2 %v5479_v46  ;;  %v2701_v37 = vmax.f32 %v2624_v42, 0.0  ;;  %v6254_v46 = vld [vmem:[#allocation60_spill] sm:$0xff] }
 0x423   :  { %v2625_v55 = vpop.f32.mrf.mxu1 }
 0x424   :  { %v2626_v24 = vadd.f32 %v2625_v55, %v5591_v52  ;;  %v2540_v52 = vadd.f32 %v2539_v17, %v5598_v38  ;;  %v6255_v55 = vld [vmem:[#allocation77_spill] sm:$0xff]  ;;  %v2556_v38 = vpop.f32.mrf.mxu0  ;;  %v2545_v17 = vadd.f32 %v2544_v13, %v5622_v56  ;;  %v5794_v44 = vpop.f32.mrf.mxu2  ;;  %v2550_v56 = vadd.f32 %v2549_v35, %v5640_v63 }
 0x426   :  { %v2703_v21 = vmax.f32 %v2626_v24, 0.0 }
 0x428   :  { %v2759_v23 = vpack.c.bf16 %v2703_v21, %v2701_v37 }
 0x42a   :  { %3028 = vmatmul.bf16.gmra.mxu3 %v2759_v23 }
 0x42b   :  { %v2628_v0 = vpop.f32.mrf.mxu1 }
 0x42c   :  { %v2629_v22 = vadd.f32 %v2628_v0, %v2540_v52  ;;  %v2559_v6 = vpop.f32.mrf.mxu0  ;;  %v5796_v52 = vpop.f32.mrf.mxu2 }
 0x42e   :  { %2667 = vmatmul.bf16.gmra.mxu1 %v6254_v46  ;;  %2984 = vmatmul.bf16.gmra.mxu2 %v5493_v3  ;;  %v2705_v43 = vmax.f32 %v2629_v22, 0.0  ;;  %v2458_v3 = vadd.f32 %v5632_v50, %v5630_v4 }
 0x430   :  { %v2547_v24 = vadd.f32 %v2546_v49, %v2458_v3 }
 0x433   :  { %v2630_v20 = vpop.f32.mrf.mxu1 }
 0x434   :  { %v2631_v47 = vadd.f32 %v2630_v20, %v2542_v30  ;;  %v2561_v49 = vpop.f32.mrf.mxu0  ;;  %v5803_v22 = vpop.f32.mrf.mxu2 }
 0x436   :  { %v2707_v61 = vmax.f32 %v2631_v47, 0.0 }
 0x438   :  { %v2761_v7 = vpack.c.bf16 %v2707_v61, %v2705_v43 }
 0x43a   :  { %3033 = vmatmul.bf16.gmra.mxu3 %v2761_v7 }
 0x43b   :  { %v2633_v42 = vpop.f32.mrf.mxu1 }
 0x43c   :  { %v2634_v37 = vadd.f32 %v2633_v42, %v2545_v17  ;;  %v2564_v42 = vpop.f32.mrf.mxu0 }
 0x43e   :  { %2672 = vmatmul.bf16.gmra.mxu1 %v6255_v55  ;;  %2989 = vmatmul.bf16.gmra.mxu2 %v5507_v32  ;;  %v2709_v0 = vmax.f32 %v2634_v37, 0.0  ;;  %v2463_v32 = vadd.f32 %v5644_v26, %v5642_v41  ;;  %v5807_v41 = vpop.f32.mrf.mxu2 }
 0x440   :  { %v2552_v50 = vadd.f32 %v2551_v51, %v2463_v32 }
 0x443   :  { %v2635_v21 = vpop.f32.mrf.mxu1 }
 0x444   :  { %v2636_v23 = vadd.f32 %v2635_v21, %v2547_v24  ;;  %v2566_v17 = vpop.f32.mrf.mxu0 }
 0x446   :  { %v2711_v45 = vmax.f32 %v2636_v23, 0.0 }
 0x448   :  { %v2763_v46 = vpack.c.bf16 %v2711_v45, %v2709_v0 }
 0x44a   :  { %3038 = vmatmul.bf16.gmra.mxu3 %v2763_v46 }
 0x44b   :  { %v2638_v4 = vpop.f32.mrf.mxu1 }
 0x44c   :  { %v2639_v13 = vadd.f32 %v2638_v4, %v2550_v56 }
 0x44e   :  { %2677 = vmatmul.bf16.gmra.mxu1 %v5383_v14  ;;  %2994 = vmatmul.bf16.gmra.mxu2 %v5527_v29  ;;  %v2713_v47 = vmax.f32 %v2639_v13, 0.0  ;;  %v2468_v14 = vadd.f32 %v5659_v36, %v5657_v53  ;;  %v2555_v29 = vadd.f32 %v2554_v57, %v5655_v9  ;;  %v2473_v53 = vadd.f32 %v5672_v11, %v5670_v18  ;;  %v6256_v36 = vld [vmem:[#allocation73_spill] sm:$0xff]  ;;  %v5815_v57 = vpop.f32.mrf.mxu3  ;;  %v5822_v18 = vld [vmem:[%s5958_s4] ss:$0 sm:$0xff] }
 0x44f   :  { %v2560_v21 = vadd.f32 %v2559_v6, %v6256_v36  ;;  %v2565_v11 = vadd.f32 %v2564_v42, %v5681_v58  ;;  %v2926_v13 = vadd.f32 %v5822_v18, %v5769_v19  ;;  %v5829_v42 = vpop.f32.mrf.mxu2 }
 0x450   :  { %v2557_v63 = vadd.f32 %v2556_v38, %v2468_v14  ;;  %v2562_v23 = vadd.f32 %v2561_v49, %v2473_v53 }
 0x453   :  { %v2640_v30 = vpop.f32.mrf.mxu1 }
 0x454   :  { %v2641_v20 = vadd.f32 %v2640_v30, %v2552_v50  ;;  %v2478_v50 = vadd.f32 %v5685_v54, %v5683_v28 }
 0x456   :  { %v2715_v43 = vmax.f32 %v2641_v20, 0.0  ;;  %v2567_v6 = vadd.f32 %v2566_v17, %v2478_v50  ;;  %v2928_v20 = vadd.f32 %v5822_v18, %v5773_v1  ;;  %v6257_v1 = vld [vmem:[#allocation20_spill] sm:$0xff] }
 0x458   :  { %v2765_v61 = vpack.c.bf16 %v2715_v43, %v2713_v47 }
 0x45a   :  { %3043 = vmatmul.bf16.gmra.mxu3 %v2765_v61 }
 0x45b   :  { %v2643_v7 = vpop.f32.mrf.mxu1 }
 0x45c   :  { %v2644_v26 = vadd.f32 %v2643_v7, %v2555_v29 }
 0x45e   :  { %2682 = vmatmul.bf16.gmra.mxu1 %v5401_v10  ;;  %2999 = vmatmul.bf16.gmra.mxu2 %v5541_v16  ;;  %v2717_v3 = vmax.f32 %v2644_v26, 0.0  ;;  %v2569_v10 = vpop.f32.mrf.mxu0 }
 0x463   :  { %v2645_v35 = vpop.f32.mrf.mxu1 }
 0x464   :  { %v2646_v51 = vadd.f32 %v2645_v35, %v2557_v63 }
 0x466   :  { %v2719_v55 = vmax.f32 %v2646_v51, 0.0  ;;  %v2571_v4 = vpop.f32.mrf.mxu0  ;;  %v2483_v51 = vadd.f32 %v6257_v1, %v5693_v12 }
 0x468   :  { %v2767_v24 = vpack.c.bf16 %v2719_v55, %v2717_v3  ;;  %v6258_v55 = vld [vmem:[#allocation17_spill] sm:$0xff] }
 0x469   :  { %v2570_v17 = vadd.f32 %v2569_v10, %v6258_v55 }
 0x46a   :  { %3048 = vmatmul.bf16.gmra.mxu3 %v2767_v24  ;;  %v2572_v24 = vadd.f32 %v2571_v4, %v2483_v51 }
 0x46b   :  { %v2648_v37 = vpop.f32.mrf.mxu1 }
 0x46c   :  { %v2649_v16 = vadd.f32 %v2648_v37, %v2560_v21  ;;  %v2931_v37 = vadd.f32 %v5822_v18, %v5777_v2  ;;  %v2933_v21 = vadd.f32 %v5822_v18, %v5787_v33  ;;  %v2488_v33 = vadd.f32 %v5708_v34, %v5706_v39 }
 0x46e   :  { %v2721_v38 = vmax.f32 %v2649_v16, 0.0  ;;  %v2574_v61 = vpop.f32.mrf.mxu0 }
 0x473   :  { %v2650_v0 = vpop.f32.mrf.mxu1 }
 0x474   :  { %v2651_v9 = vadd.f32 %v2650_v0, %v2562_v23  ;;  %v5839_v0 = vpop.f32.mrf.mxu2 }
 0x476   :  { %v2723_v45 = vmax.f32 %v2651_v9, 0.0  ;;  %v2576_v3 = vpop.f32.mrf.mxu0 }
 0x478   :  { %v2769_v46 = vpack.c.bf16 %v2723_v45, %v2721_v38 }
 0x47a   :  { %3053 = vmatmul.bf16.gmra.mxu3 %v2769_v46 }
 0x47b   :  { %v2653_v32 = vpop.f32.mrf.mxu1 }
 0x47c   :  { %v2654_v49 = vadd.f32 %v2653_v32, %v2565_v11  ;;  %v5844_v11 = vpop.f32.mrf.mxu2 }
 0x47d   :  { %v3014_v56 = vpop.f32.mrf.mxu3 }
 0x47e   :  { %v3015_v47 = vadd.f32 %v3014_v56, %v2926_v13  ;;  %v2725_v54 = vmax.f32 %v2654_v49, 0.0  ;;  %v2579_v4 = vpop.f32.mrf.mxu0  ;;  %v2577_v13 = vadd.f32 %v2576_v3, %v2488_v33  ;;  %v2936_v49 = vadd.f32 %v5822_v18, %v5794_v44 }
 0x47f   :  { %v2941_v3 = vadd.f32 %v5822_v18, %v5803_v22 }
 0x480   :  { %v3094_v29 = vmax.f32 %v3015_v47, 0.0 }
 0x483   :  { %v2655_v30 = vpop.f32.mrf.mxu1 }
 0x484   :  { %v2656_v43 = vadd.f32 %v2655_v30, %v2567_v6  ;;  %v2575_v6 = vadd.f32 %v2574_v61, %v5704_v62  ;;  %v2952_v62 = vpop.f32.mrf.mxu2 }
 0x485   :  { %v3016_v28 = vpop.f32.mrf.mxu3 }
 0x486   :  { %v2727_v7 = vmax.f32 %v2656_v43, 0.0  ;;  %v3017_v14 = vadd.f32 %v3016_v28, %v2928_v20  ;;  %v2581_v20 = vpop.f32.mrf.mxu0  ;;  %v2938_v43 = vadd.f32 %v5822_v18, %v5796_v52  ;;  %v2493_v52 = vadd.f32 %v5721_v48, %v5719_v60 }
 0x488   :  { %v2771_v63 = vpack.c.bf16 %v2727_v7, %v2725_v54  ;;  %v3095_v26 = vmax.f32 %v3017_v14, 0.0  ;;  %v2582_v51 = vadd.f32 %v2581_v20, %v2493_v52 }
 0x48a   :  { %v3126_v58 = vpack.c.bf16 %v3095_v26, %v3094_v29  ;;  %3058 = vmatmul.bf16.gmra.mxu3 %v2771_v63 }
 0x48b   :  { %v2658_v19 = vpop.f32.mrf.mxu1 }
 0x48c   :  { %4344 = vmatmul.msk.bf16.vlgmr.msra.gmra.mxu0 %vm3178_vm0, %v3126_v58  ;;  %v2659_v53 = vadd.f32 %v2658_v19, %v2570_v17  ;;  %v5857_v17 = vpop.f32.mrf.mxu2 }
 0x48d   :  { %v3019_v35 = vpop.f32.mrf.mxu3 }
 0x48e   :  { %v3020_v23 = vadd.f32 %v3019_v35, %v2931_v37  ;;  %v2729_v38 = vmax.f32 %v2659_v53, 0.0  ;;  %v2584_v44 = vpop.f32.mrf.mxu0  ;;  %v6259_v35 = vld [vmem:[#allocation21_spill] sm:$0xff]  ;;  %v2943_v37 = vadd.f32 %v5822_v18, %v5807_v41  ;;  %v2498_v41 = vadd.f32 %v5734_v25, %v5732_v15 }
 0x48f   :  { %v2580_v1 = vadd.f32 %v2579_v4, %v6259_v35 }
 0x490   :  { %v3096_v46 = vmax.f32 %v3020_v23, 0.0 }
 0x493   :  { %v2660_v36 = vpop.f32.mrf.mxu1 }
 0x494   :  { %v2661_v16 = vadd.f32 %v2660_v36, %v2572_v24 }
 0x495   :  { %v3021_v9 = vpop.f32.mrf.mxu3 }
 0x496   :  { %v2731_v45 = vmax.f32 %v2661_v16, 0.0  ;;  %v3022_v12 = vadd.f32 %v3021_v9, %v2933_v21  ;;  %v2586_v60 = vpop.f32.mrf.mxu0 }
 0x498   :  { %v2773_v32 = vpack.c.bf16 %v2731_v45, %v2729_v38  ;;  %v3097_v10 = vmax.f32 %v3022_v12, 0.0 }
 0x49a   :  { %v3127_v56 = vpack.c.bf16 %v3097_v10, %v3096_v46  ;;  %3063 = vmatmul.bf16.gmra.mxu3 %v2773_v32  ;;  %v2957_v46 = vpop.f32.mrf.mxu2  ;;  %v2585_v10 = vadd.f32 %v2584_v44, %v5730_v27 }
 0x49b   :  { %v2663_v2 = vpop.f32.mrf.mxu1 }
 0x49c   :  { %4345 = vmatmul.msk.bf16.gmra.mxu0 %vm3178_vm0, %v3127_v56  ;;  %v2664_v30 = vadd.f32 %v2663_v2, %v2575_v6  ;;  %v2587_v56 = vadd.f32 %v2586_v60, %v2498_v41  ;;  %v2946_v2 = vadd.f32 %v5822_v18, %v5829_v42  ;;  %v2948_v6 = vadd.f32 %v5822_v18, %v5839_v0 }
 0x49d   :  { %v3024_v50 = vpop.f32.mrf.mxu3  ;;  %v2503_v0 = vadd.f32 %v5744_v40, %v5742_v59  ;;  %v2958_v60 = vadd.f32 %v5822_v18, %v2957_v46 }
 0x49e   :  { %v3025_v28 = vadd.f32 %v3024_v50, %v2936_v49  ;;  %v2733_v14 = vmax.f32 %v2664_v30, 0.0  ;;  %v2589_v4 = vpop.f32.mrf.mxu0 }
 0x4a0   :  { %v3098_v39 = vmax.f32 %v3025_v28, 0.0 }
 0x4a2   :  { %v2960_v28 = vpop.f32.mrf.mxu2 }
 0x4a3   :  { %v2665_v47 = vpop.f32.mrf.mxu1 }
 0x4a4   :  { %v2666_v54 = vadd.f32 %v2665_v47, %v2577_v13 }
 0x4a5   :  { %v3026_v7 = vpop.f32.mrf.mxu3 }
 0x4a6   :  { %v2735_v29 = vmax.f32 %v2666_v54, 0.0  ;;  %v3027_v34 = vadd.f32 %v3026_v7, %v2938_v43  ;;  %v2591_v7 = vpop.f32.mrf.mxu0 }
 0x4a8   :  { %v2775_v63 = vpack.c.bf16 %v2735_v29, %v2733_v14  ;;  %v3099_v26 = vmax.f32 %v3027_v34, 0.0  ;;  %v2590_v29 = vadd.f32 %v2589_v4, %v5740_v5 }
 0x4aa   :  { %v3128_v61 = vpack.c.bf16 %v3099_v26, %v3098_v39  ;;  %3068 = vmatmul.bf16.gmra.mxu3 %v2775_v63  ;;  %v2962_v34 = vpop.f32.mrf.mxu2  ;;  %v2592_v39 = vadd.f32 %v2591_v7, %v2503_v0  ;;  %v2951_v63 = vadd.f32 %v5822_v18, %v5844_v11 }
 0x4ab   :  { %v2668_v58 = vpop.f32.mrf.mxu1  ;;  %v2963_v46 = vadd.f32 %v5822_v18, %v2962_v34 }
 0x4ac   :  { %4346 = vmatmul.msk.bf16.gmra.mxu0 %vm3178_vm0, %v3128_v61  ;;  %v2669_v55 = vadd.f32 %v2668_v58, %v2580_v1  ;;  %v2953_v58 = vadd.f32 %v5822_v18, %v2952_v62  ;;  %v2508_v62 = vadd.f32 %v5815_v57, %v5752_v8 }
 0x4ad   :  { %v3029_v19 = vpop.f32.mrf.mxu3 }
 0x4ae   :  { %v3030_v53 = vadd.f32 %v3029_v19, %v2941_v3  ;;  %v2737_v23 = vmax.f32 %v2669_v55, 0.0  ;;  %v2594_v52 = vpop.f32.mrf.mxu0 }
 0x4b0   :  { %v3100_v48 = vmax.f32 %v3030_v53, 0.0 }
 0x4b3   :  { %v2670_v24 = vpop.f32.mrf.mxu1 }
 0x4b4   :  { %v2671_v36 = vadd.f32 %v2670_v24, %v2582_v51  ;;  %v2965_v24 = vpop.f32.mrf.mxu2 }
 0x4b5   :  { %v3031_v21 = vpop.f32.mrf.mxu3 }
 0x4b6   :  { %v2739_v16 = vmax.f32 %v2671_v36, 0.0  ;;  %v3032_v9 = vadd.f32 %v3031_v21, %v2943_v37  ;;  %v2596_v53 = vpop.f32.mrf.mxu0  ;;  %v2595_v36 = vadd.f32 %v2594_v52, %v5750_v31 }
 0x4b7   :  { %v2597_v21 = vadd.f32 %v2596_v53, %v2508_v62 }
 0x4b8   :  { %v2777_v38 = vpack.c.bf16 %v2739_v16, %v2737_v23  ;;  %v3101_v45 = vmax.f32 %v3032_v9, 0.0  ;;  %v2956_v23 = vadd.f32 %v5822_v18, %v5857_v17 }
 0x4ba   :  { %v3129_v12 = vpack.c.bf16 %v3101_v45, %v3100_v48  ;;  %3073 = vmatmul.bf16.gmra.mxu3 %v2777_v38 }
 0x4bb   :  { %v2673_v22 = vpop.f32.mrf.mxu1 }
 0x4bc   :  { %4347 = vmatmul.msk.bf16.gmra.mxu0 %vm3178_vm0, %v3129_v12  ;;  %v2674_v50 = vadd.f32 %v2673_v22, %v2585_v10  ;;  %v2967_v45 = vpop.f32.mrf.mxu2 }
 0x4bd   :  { %v3034_v32 = vpop.f32.mrf.mxu3 }
 0x4be   :  { %v3035_v13 = vadd.f32 %v3034_v32, %v2946_v2  ;;  %v2741_v20 = vmax.f32 %v2674_v50, 0.0 }
 0x4c0   :  { %v3102_v15 = vmax.f32 %v3035_v13, 0.0 }
 0x4c3   :  { %v2675_v33 = vpop.f32.mrf.mxu1 }
 0x4c4   :  { %v2676_v49 = vadd.f32 %v2675_v33, %v2587_v56  ;;  %v2970_v17 = vpop.f32.mrf.mxu2  ;;  %v2961_v56 = vadd.f32 %v5822_v18, %v2960_v28 }
 0x4c5   :  { %v3036_v30 = vpop.f32.mrf.mxu3 }
 0x4c6   :  { %v2743_v47 = vmax.f32 %v2676_v49, 0.0  ;;  %v3037_v43 = vadd.f32 %v3036_v30, %v2948_v6 }
 0x4c8   :  { %v2779_v25 = vpack.c.bf16 %v2743_v47, %v2741_v20  ;;  %v3103_v27 = vmax.f32 %v3037_v43, 0.0  ;;  %v2966_v47 = vadd.f32 %v5822_v18, %v2965_v24 }
 0x4ca   :  { %v3130_v54 = vpack.c.bf16 %v3103_v27, %v3102_v15  ;;  %3078 = vmatmul.bf16.gmra.mxu3 %v2779_v25  ;;  %v2968_v15 = vadd.f32 %v5822_v18, %v2967_v45 }
 0x4cb   :  { %v2678_v14 = vpop.f32.mrf.mxu1 }
 0x4cc   :  { %4348 = vmatmul.msk.bf16.gmra.mxu0 %vm3178_vm0, %v3130_v54  ;;  %v2679_v26 = vadd.f32 %v2678_v14, %v2590_v29  ;;  %v2972_v49 = vpop.f32.mrf.mxu2  ;;  %v5892_v54 = vld [vmem:[%s5960_s6] ss:$0 sm:$0xff]  ;;  %s4722_s6 = smov [#allocation7]  }
 0x4cd   :  { %v3039_v42 = vpop.f32.mrf.mxu3  ;;  %s3352_s10 = sshll.u32 %s4722_s6, 4  ;;  %s3353_s10 = int_to_ptr.vmem [resolvable:$true] %s3352_s10 }
 0x4ce   :  { %v3040_v44 = vadd.f32 %v3039_v42, %v2951_v63  ;;  %v2745_v1 = vmax.f32 %v2679_v26, 0.0  ;;  %v2971_v26 = vadd.f32 %v5822_v18, %v2970_v17 }
 0x4d0   :  { %v3104_v55 = vmax.f32 %v3040_v44, 0.0 }
 0x4d3   :  { %v2680_v61 = vpop.f32.mrf.mxu1 }
 0x4d4   :  { %v2681_v19 = vadd.f32 %v2680_v61, %v2592_v39  ;;  %v2975_v43 = vpop.f32.mrf.mxu2 }
 0x4d5   :  { %v3041_v35 = vpop.f32.mrf.mxu3 }
 0x4d6   :  { %v2747_v51 = vmax.f32 %v2681_v19, 0.0  ;;  %v3042_v3 = vadd.f32 %v3041_v35, %v2953_v58  ;;  %v2973_v58 = vadd.f32 %v5822_v18, %v2972_v49 }
 0x4d8   :  { %v2781_v59 = vpack.c.bf16 %v2747_v51, %v2745_v1  ;;  %v3105_v40 = vmax.f32 %v3042_v3, 0.0 }
 0x4da   :  { %v3131_v5 = vpack.c.bf16 %v3105_v40, %v3104_v55  ;;  %3083 = vmatmul.bf16.gmra.mxu3 %v2781_v59 }
 0x4db   :  { %v2683_v37 = vpop.f32.mrf.mxu1 }
 0x4dc   :  { %4349 = vmatmul.msk.bf16.gmra.mxu0 %vm3178_vm0, %v3131_v5  ;;  %v2684_v16 = vadd.f32 %v2683_v37, %v2595_v36  ;;  %v2977_v34 = vpop.f32.mrf.mxu2  ;;  %v2976_v37 = vadd.f32 %v5822_v18, %v2975_v43 }
 0x4dd   :  { %v3044_v11 = vpop.f32.mrf.mxu3  ;;  %v2978_v62 = vadd.f32 %v5822_v18, %v2977_v34 }
 0x4de   :  { %v3045_v48 = vadd.f32 %v3044_v11, %v2956_v23  ;;  %v2749_v22 = vmax.f32 %v2684_v16, 0.0 }
 0x4e0   :  { %v3106_v10 = vmax.f32 %v3045_v48, 0.0 }
 0x4e3   :  { %v2685_v9 = vpop.f32.mrf.mxu1 }
 0x4e4   :  { %v2686_v38 = vadd.f32 %v2685_v9, %v2597_v21  ;;  %v2980_v35 = vpop.f32.mrf.mxu2 }
 0x4e5   :  { %v3046_v12 = vpop.f32.mrf.mxu3 }
 0x4e6   :  { %v2751_v32 = vmax.f32 %v2686_v38, 0.0  ;;  %v3047_v41 = vadd.f32 %v3046_v12, %v2958_v60 }
 0x4e8   :  { %v2783_v8 = vpack.c.bf16 %v2751_v32, %v2749_v22  ;;  %v3107_v57 = vmax.f32 %v3047_v41, 0.0  ;;  %v2981_v22 = vadd.f32 %v5822_v18, %v2980_v35 }
 0x4ea   :  { %v3132_v4 = vpack.c.bf16 %v3107_v57, %v3106_v10  ;;  %3088 = vmatmul.bf16.gmra.mxu3 %v2783_v8 }
 0x4ec   :  { %4350 = vmatmul.msk.bf16.gmra.mxu0 %vm3178_vm0, %v3132_v4  ;;  %v2982_v5 = vpop.f32.mrf.mxu2 }
 0x4ed   :  { %v3049_v31 = vpop.f32.mrf.mxu3  ;;  %v2983_v41 = vadd.f32 %v5822_v18, %v2982_v5 }
 0x4ee   :  { %v3050_v2 = vadd.f32 %v3049_v31, %v2961_v56 }
 0x4f0   :  { %v3108_v6 = vmax.f32 %v3050_v2, 0.0 }
 0x4f4   :  { %v2985_v38 = vpop.f32.mrf.mxu2 }
 0x4f5   :  { %v3051_v50 = vpop.f32.mrf.mxu3 }
 0x4f6   :  { %v3052_v33 = vadd.f32 %v3051_v50, %v2963_v46 }
 0x4f8   :  { %v3109_v13 = vmax.f32 %v3052_v33, 0.0 }
 0x4fa   :  { %v3133_v30 = vpack.c.bf16 %v3109_v13, %v3108_v6  ;;  %v2986_v13 = vadd.f32 %v5822_v18, %v2985_v38 }
 0x4fc   :  { %4351 = vmatmul.msk.bf16.gmra.mxu0 %vm3178_vm0, %v3133_v30  ;;  %v2987_v8 = vpop.f32.mrf.mxu2 }
 0x4fd   :  { %v3054_v20 = vpop.f32.mrf.mxu3  ;;  %v2988_v30 = vadd.f32 %v5822_v18, %v2987_v8 }
 0x4fe   :  { %v3055_v25 = vadd.f32 %v3054_v20, %v2966_v47 }
 0x500   :  { %v3110_v7 = vmax.f32 %v3055_v25, 0.0 }
 0x504   :  { %v2990_v33 = vpop.f32.mrf.mxu2 }
 0x505   :  { %v3056_v27 = vpop.f32.mrf.mxu3 }
 0x506   :  { %v3057_v28 = vadd.f32 %v3056_v27, %v2968_v15 }
 0x508   :  { %v3111_v14 = vmax.f32 %v3057_v28, 0.0 }
 0x509   :  { %v3236_v42 = vpop.f32.mrf.mxu0 }
 0x50a   :  { %v3134_v0 = vpack.c.bf16 %v3111_v14, %v3110_v7  ;;  %v3237_v29 = vadd.f32 %v5892_v54, %v3236_v42 }
 0x50c   :  { %3316 = vst [vmem:[#allocation7] sm:$0xff] %v3237_v29  ;;  %4352 = vmatmul.msk.bf16.gmra.mxu0 %vm3178_vm0, %v3134_v0  ;;  %v2992_v27 = vpop.f32.mrf.mxu2  ;;  %v2991_v29 = vadd.f32 %v5822_v18, %v2990_v33 }
 0x50d   :  { %v3059_v39 = vpop.f32.mrf.mxu3 }
 0x50e   :  { %v3060_v44 = vadd.f32 %v3059_v39, %v2971_v26 }
 0x510   :  { %v3112_v1 = vmax.f32 %v3060_v44, 0.0 }
 0x511   :  { %v3238_v63 = vpop.f32.mrf.mxu0 }
 0x512   :  { %v3239_v61 = vadd.f32 %v5892_v54, %v3238_v63  ;;  %v2993_v63 = vadd.f32 %v5822_v18, %v2992_v27 }
 0x514   :  { %3317 = vst [vmem:[#allocation7 + $0x8] sm:$0xff] %v3239_v61  ;;  %v2995_v39 = vpop.f32.mrf.mxu2 }
 0x515   :  { %v3061_v19 = vpop.f32.mrf.mxu3 }
 0x516   :  { %v3062_v52 = vadd.f32 %v3061_v19, %v2973_v58 }
 0x518   :  { %v3113_v51 = vmax.f32 %v3062_v52, 0.0 }
 0x519   :  { %v3241_v3 = vpop.f32.mrf.mxu0 }
 0x51a   :  { %v3135_v55 = vpack.c.bf16 %v3113_v51, %v3112_v1  ;;  %v3242_v59 = vadd.f32 %v5892_v54, %v3241_v3 }
 0x51c   :  { %3318 = vst [vmem:[#allocation7 + $0x10] sm:$0xff] %v3242_v59  ;;  %4353 = vmatmul.msk.bf16.gmra.mxu0 %vm3178_vm0, %v3135_v55  ;;  %v2997_v51 = vpop.f32.mrf.mxu2  ;;  %v2996_v59 = vadd.f32 %v5822_v18, %v2995_v39 }
 0x51d   :  { %v3064_v40 = vpop.f32.mrf.mxu3  ;;  %v2998_v5 = vadd.f32 %v5822_v18, %v2997_v51 }
 0x51e   :  { %v3065_v53 = vadd.f32 %v3064_v40, %v2976_v37 }
 0x520   :  { %v3114_v23 = vmax.f32 %v3065_v53, 0.0 }
 0x521   :  { %v3243_v24 = vpop.f32.mrf.mxu0 }
 0x522   :  { %v3244_v11 = vadd.f32 %v5892_v54, %v3243_v24 }
 0x524   :  { %3319 = vst [vmem:[#allocation7 + $0x18] sm:$0xff] %v3244_v11 }
 0x525   :  { %v3066_v36 = vpop.f32.mrf.mxu3 }
 0x526   :  { %v3067_v21 = vadd.f32 %v3066_v36, %v2978_v62  ;;  %v3000_v62 = vpop.f32.mrf.mxu2 }
 0x527   :  { %v3001_v38 = vadd.f32 %v5822_v18, %v3000_v62 }
 0x528   :  { %v3115_v16 = vmax.f32 %v3067_v21, 0.0 }
 0x529   :  { %v3246_v9 = vpop.f32.mrf.mxu0 }
 0x52a   :  { %v3136_v60 = vpack.c.bf16 %v3115_v16, %v3114_v23  ;;  %v3247_v48 = vadd.f32 %v5892_v54, %v3246_v9 }
 0x52c   :  { %3320 = vst [vmem:[#allocation7 + $0x20] sm:$0xff] %v3247_v48  ;;  %4354 = vmatmul.msk.bf16.gmra.mxu0 %vm3178_vm0, %v3136_v60 }
 0x52d   :  { %v3069_v45 = vpop.f32.mrf.mxu3 }
 0x52e   :  { %v3070_v10 = vadd.f32 %v3069_v45, %v2981_v22  ;;  %v3002_v60 = vpop.f32.mrf.mxu2 }
 0x530   :  { %v3116_v31 = vmax.f32 %v3070_v10, 0.0 }
 0x531   :  { %v3248_v12 = vpop.f32.mrf.mxu0 }
 0x532   :  { %v3249_v32 = vadd.f32 %v5892_v54, %v3248_v12  ;;  %v3003_v12 = vadd.f32 %v5822_v18, %v3002_v60 }
 0x534   :  { %3321 = vst [vmem:[#allocation7 + $0x28] sm:$0xff] %v3249_v32 }
 0x535   :  { %v3071_v57 = vpop.f32.mrf.mxu3 }
 0x536   :  { %v3072_v4 = vadd.f32 %v3071_v57, %v2983_v41 }
 0x538   :  { %v3117_v17 = vmax.f32 %v3072_v4, 0.0 }
 0x539   :  { %v3251_v56 = vpop.f32.mrf.mxu0 }
 0x53a   :  { %v3137_v46 = vpack.c.bf16 %v3117_v17, %v3116_v31  ;;  %v3252_v2 = vadd.f32 %v5892_v54, %v3251_v56 }
 0x53c   :  { %3322 = vst [vmem:[#allocation7 + $0x30] sm:$0xff] %v3252_v2  ;;  %4355 = vmatmul.msk.bf16.gmra.mxu0 %vm3178_vm0, %v3137_v46 }
 0x53d   :  { %v3074_v50 = vpop.f32.mrf.mxu3 }
 0x53e   :  { %v3075_v20 = vadd.f32 %v3074_v50, %v2986_v13 }
 0x540   :  { %v3118_v15 = vmax.f32 %v3075_v20, 0.0 }
 0x541   :  { %v3253_v6 = vpop.f32.mrf.mxu0 }
 0x542   :  { %v3254_v49 = vadd.f32 %v5892_v54, %v3253_v6 }
 0x544   :  { %3323 = vst [vmem:[#allocation7 + $0x38] sm:$0xff] %v3254_v49 }
 0x545   :  { %v3076_v47 = vpop.f32.mrf.mxu3 }
 0x546   :  { %v3077_v43 = vadd.f32 %v3076_v47, %v2988_v30 }
 0x548   :  { %v3119_v25 = vmax.f32 %v3077_v43, 0.0 }
 0x549   :  { %v3256_v28 = vpop.f32.mrf.mxu0 }
 0x54a   :  { %v3138_v7 = vpack.c.bf16 %v3119_v25, %v3118_v15  ;;  %v3257_v14 = vadd.f32 %v5892_v54, %v3256_v28 }
 0x54c   :  { %3324 = vst [vmem:[#allocation7 + $0x40] sm:$0xff] %v3257_v14  ;;  %4356 = vmatmul.msk.bf16.gmra.mxu0 %vm3178_vm0, %v3138_v7 }
 0x54d   :  { %v3079_v42 = vpop.f32.mrf.mxu3 }
 0x54e   :  { %v3080_v26 = vadd.f32 %v3079_v42, %v2991_v29 }
 0x550   :  { %v3120_v44 = vmax.f32 %v3080_v26, 0.0 }
 0x551   :  { %v3258_v0 = vpop.f32.mrf.mxu0 }
 0x552   :  { %v3259_v34 = vadd.f32 %v5892_v54, %v3258_v0 }
 0x554   :  { %3325 = vst [vmem:[#allocation7 + $0x48] sm:$0xff] %v3259_v34 }
 0x555   :  { %v3081_v61 = vpop.f32.mrf.mxu3 }
 0x556   :  { %v3082_v58 = vadd.f32 %v3081_v61, %v2993_v63 }
 0x558   :  { %v3121_v19 = vmax.f32 %v3082_v58, 0.0 }
 0x559   :  { %v3261_v52 = vpop.f32.mrf.mxu0 }
 0x55a   :  { %v3139_v35 = vpack.c.bf16 %v3121_v19, %v3120_v44  ;;  %v3262_v1 = vadd.f32 %v5892_v54, %v3261_v52 }
 0x55c   :  { %3326 = vst [vmem:[#allocation7 + $0x50] sm:$0xff] %v3262_v1  ;;  %4357 = vmatmul.msk.bf16.gmra.mxu0 %vm3178_vm0, %v3139_v35 }
 0x55d   :  { %v3084_v3 = vpop.f32.mrf.mxu3 }
 0x55e   :  { %v3085_v24 = vadd.f32 %v3084_v3, %v2996_v59 }
 0x560   :  { %v3122_v53 = vmax.f32 %v3085_v24, 0.0 }
 0x561   :  { %v3263_v55 = vpop.f32.mrf.mxu0 }
 0x562   :  { %v3264_v40 = vadd.f32 %v5892_v54, %v3263_v55 }
 0x564   :  { %3327 = vst [vmem:[#allocation7 + $0x58] sm:$0xff] %v3264_v40 }
 0x565   :  { %v3086_v37 = vpop.f32.mrf.mxu3 }
 0x566   :  { %v3087_v11 = vadd.f32 %v3086_v37, %v2998_v5 }
 0x568   :  { %v3123_v36 = vmax.f32 %v3087_v11, 0.0 }
 0x569   :  { %v3266_v21 = vpop.f32.mrf.mxu0 }
 0x56a   :  { %v3140_v23 = vpack.c.bf16 %v3123_v36, %v3122_v53  ;;  %v3267_v16 = vadd.f32 %v5892_v54, %v3266_v21 }
 0x56c   :  { %3328 = vst [vmem:[#allocation7 + $0x60] sm:$0xff] %v3267_v16  ;;  %4358 = vmatmul.msk.bf16.gmra.mxu0 %vm3178_vm0, %v3140_v23 }
 0x56d   :  { %v3089_v9 = vpop.f32.mrf.mxu3 }
 0x56e   :  { %v3090_v22 = vadd.f32 %v3089_v9, %v3001_v38 }
 0x570   :  { %v3124_v10 = vmax.f32 %v3090_v22, 0.0 }
 0x571   :  { %v3268_v48 = vpop.f32.mrf.mxu0 }
 0x572   :  { %v3269_v45 = vadd.f32 %v5892_v54, %v3268_v48 }
 0x574   :  { %3329 = vst [vmem:[#allocation7 + $0x68] sm:$0xff] %v3269_v45 }
 0x575   :  { %v3091_v32 = vpop.f32.mrf.mxu3 }
 0x576   :  { %v3092_v41 = vadd.f32 %v3091_v32, %v3003_v12 }
 0x578   :  { %v3125_v8 = vmax.f32 %v3092_v41, 0.0 }
 0x579   :  { %v3271_v57 = vpop.f32.mrf.mxu0 }
 0x57a   :  { %v3141_v4 = vpack.c.bf16 %v3125_v8, %v3124_v10  ;;  %v3272_v31 = vadd.f32 %v5892_v54, %v3271_v57 }
 0x57c   :  { %3330 = vst [vmem:[#allocation7 + $0x70] sm:$0xff] %v3272_v31  ;;  %4359 = vmatmul.msk.bf16.gmra.mxu0 %vm3178_vm0, %v3141_v4 }
 0x581   :  { %v3273_v17 = vpop.f32.mrf.mxu0 }
 0x582   :  { %v3274_v56 = vadd.f32 %v5892_v54, %v3273_v17 }
 0x584   :  { %3331 = vst [vmem:[#allocation7 + $0x78] sm:$0xff] %v3274_v56 }
 0x589   :  { %v3276_v46 = vpop.f32.mrf.mxu0 }
 0x58a   :  { %v3277_v18 = vadd.f32 %v5892_v54, %v3276_v46 }
 0x58c   :  { %3332 = vst [vmem:[#allocation7 + $0x80] sm:$0xff] %v3277_v18 }
 0x591   :  { %v3278_v2 = vpop.f32.mrf.mxu0 }
 0x592   :  { %v3279_v50 = vadd.f32 %v5892_v54, %v3278_v2 }
 0x594   :  { %3333 = vst [vmem:[#allocation7 + $0x88] sm:$0xff] %v3279_v50 }
 0x599   :  { %v3281_v33 = vpop.f32.mrf.mxu0 }
 0x59a   :  { %v3282_v6 = vadd.f32 %v5892_v54, %v3281_v33 }
 0x59c   :  { %3334 = vst [vmem:[#allocation7 + $0x90] sm:$0xff] %v3282_v6 }
 0x5a1   :  { %v3283_v13 = vpop.f32.mrf.mxu0 }
 0x5a2   :  { %v3284_v49 = vadd.f32 %v5892_v54, %v3283_v13 }
 0x5a4   :  { %3335 = vst [vmem:[#allocation7 + $0x98] sm:$0xff] %v3284_v49 }
 0x5a9   :  { %v3286_v30 = vpop.f32.mrf.mxu0 }
 0x5aa   :  { %v3287_v20 = vadd.f32 %v5892_v54, %v3286_v30 }
 0x5ac   :  { %3336 = vst [vmem:[#allocation7 + $0xa0] sm:$0xff] %v3287_v20 }
 0x5b1   :  { %v3288_v47 = vpop.f32.mrf.mxu0 }
 0x5b2   :  { %v3289_v43 = vadd.f32 %v5892_v54, %v3288_v47 }
 0x5b4   :  { %3337 = vst [vmem:[#allocation7 + $0xa8] sm:$0xff] %v3289_v43 }
 0x5b9   :  { %v3291_v15 = vpop.f32.mrf.mxu0 }
 0x5ba   :  { %v3292_v25 = vadd.f32 %v5892_v54, %v3291_v15 }
 0x5bc   :  { %3338 = vst [vmem:[#allocation7 + $0xb0] sm:$0xff] %v3292_v25 }
 0x5c1   :  { %v3293_v27 = vpop.f32.mrf.mxu0 }
 0x5c2   :  { %v3294_v28 = vadd.f32 %v5892_v54, %v3293_v27 }
 0x5c4   :  { %3339 = vst [vmem:[#allocation7 + $0xb8] sm:$0xff] %v3294_v28 }
 0x5c9   :  { %v3296_v7 = vpop.f32.mrf.mxu0 }
 0x5ca   :  { %v3297_v14 = vadd.f32 %v5892_v54, %v3296_v7 }
 0x5cc   :  { %3340 = vst [vmem:[#allocation7 + $0xc0] sm:$0xff] %v3297_v14 }
 0x5d1   :  { %v3298_v42 = vpop.f32.mrf.mxu0 }
 0x5d2   :  { %v3299_v0 = vadd.f32 %v5892_v54, %v3298_v42 }
 0x5d4   :  { %3341 = vst [vmem:[#allocation7 + $0xc8] sm:$0xff] %v3299_v0 }
 0x5d9   :  { %v3301_v29 = vpop.f32.mrf.mxu0 }
 0x5da   :  { %v3302_v34 = vadd.f32 %v5892_v54, %v3301_v29 }
 0x5dc   :  { %3342 = vst [vmem:[#allocation7 + $0xd0] sm:$0xff] %v3302_v34 }
 0x5e1   :  { %v3303_v39 = vpop.f32.mrf.mxu0 }
 0x5e2   :  { %v3304_v63 = vadd.f32 %v5892_v54, %v3303_v39 }
 0x5e4   :  { %3343 = vst [vmem:[#allocation7 + $0xd8] sm:$0xff] %v3304_v63 }
 0x5e9   :  { %v3306_v26 = vpop.f32.mrf.mxu0 }
 0x5ea   :  { %v3307_v61 = vadd.f32 %v5892_v54, %v3306_v26 }
 0x5ec   :  { %3344 = vst [vmem:[#allocation7 + $0xe0] sm:$0xff] %v3307_v61 }
 0x5f1   :  { %v3308_v58 = vpop.f32.mrf.mxu0 }
 0x5f2   :  { %v3309_v44 = vadd.f32 %v5892_v54, %v3308_v58 }
 0x5f4   :  { %3345 = vst [vmem:[#allocation7 + $0xe8] sm:$0xff] %v3309_v44 }
 0x5f9   :  { %v3311_v19 = vpop.f32.mrf.mxu0 }
 0x5fa   :  { %v3312_v52 = vadd.f32 %v5892_v54, %v3311_v19 }
 0x5fc   :  { %3346 = vst [vmem:[#allocation7 + $0xf0] sm:$0xff] %v3312_v52 }
 0x601   :  { %v3313_v35 = vpop.f32.mrf.mxu0 }
 0x602   :  { %v3314_v1 = vadd.f32 %v5892_v54, %v3313_v35 }
 0x604   :  { %3347 = vst [vmem:[#allocation7 + $0xf8] sm:$0xff] %v3314_v1 }
 0x605   :  { %3360 = dma.vmem_to_hbm [thread:$0]  %s3353_s10, 4096, %s3355_s0, [#allocation4], %s4720_s13, %s4720_s13, %s4721_s14  }
 0x606   :  { %4714 = dma.done.wait [#allocation4], 4096  }
 0x607   :  { %4715 = vsyncadd [#allocation4], 4294963200 }
 0x608   :  { %3365 = vsyncpa [#allocation3], 1 }
 0x609   :  { %3366 = vsyncpa [#allocation6], 1 }
 0x60a   :  { %3367 = vsyncpa [#allocation4], 1 }

</bundles_post_ra>
